<compile_context>
chip_gen: v7x
topology: tpu7x:2x2x1
jax: 0.10.0
libtpu: 0.0.40
codegen_flags: <defaults>
</compile_context>

<pallas_src>
import functools

import jax
import jax.numpy as jnp
from jax.experimental import pallas as pl
from jax.experimental.pallas import tpu as pltpu

LANE = 128


def _round_up(x, m):
    return (x + m - 1) // m * m


# ---------------------------------------------------------------------------
# Fused Pallas kernel: whole coord-conv chain for one batch element.
# ---------------------------------------------------------------------------
def _coord_n_conv_kernel(x_ref, w_ref, b_ref, o_ref, xpad_ref, acc_ref):
    # x_ref:    (H, W, C0)            input (+coord) channels, one batch element
    # w_ref:    (L, 9, Cpad, Cpad)    zero-padded weights, tap index = dy*3 + dx
    # b_ref:    (L, 1, Cpad)          zero-padded biases (f32)
    # o_ref:    (H, W, Cpad)          padded output (real channels in [:Cout])
    # xpad_ref: (H+2, W+2, Cpad) f32  resident activation with zero halo (scratch)
    # acc_ref:  (H*W, Cpad)      f32  matmul accumulator (scratch)
    H, W, C0 = x_ref.shape
    num_convs = w_ref.shape[0]
    Cpad = o_ref.shape[-1]
    HW = H * W
    compute_dtype = w_ref.dtype

    # Zero halo (== the conv's SAME zero padding) and zero padded channels, then
    # drop the first-layer input into the interior.
    xpad_ref[...] = jnp.zeros_like(xpad_ref)
    xpad_ref[1:1 + H, 1:1 + W, :C0] = x_ref[...].astype(jnp.float32)

    # Conv chain with the activation resident in VMEM (static unroll, L is small).
    for layer in range(num_convs):
        acc_ref[...] = jnp.zeros_like(acc_ref)
        for dy in range(3):
            for dx in range(3):
                win = xpad_ref[dy:dy + H, dx:dx + W, :]          # shifted tap window (f32)
                win = win.reshape(HW, Cpad).astype(compute_dtype)
                acc_ref[...] += jnp.dot(
                    win, w_ref[layer, dy * 3 + dx],
                    preferred_element_type=jnp.float32)
        act = jnp.maximum(acc_ref[...] + b_ref[layer], 0.0)      # bias + ReLU (f32)
        if layer + 1 < num_convs:
            xpad_ref[1:1 + H, 1:1 + W, :] = act.reshape(H, W, Cpad)
        else:
            o_ref[...] = act.reshape(H, W, Cpad).astype(o_ref.dtype)


# ---------------------------------------------------------------------------
# Wrapper (layout glue) + parameter packing
# ---------------------------------------------------------------------------
def add_coord_nchw(feat):
    """feat: (B, C, H, W) -> (B, C+2, H, W) with [grid_y, grid_x] appended."""
    B, C, H, W = feat.shape
    y_pos = jnp.linspace(-1.0, 1.0, H, dtype=feat.dtype)
    x_pos = jnp.linspace(-1.0, 1.0, W, dtype=feat.dtype)
    grid_y, grid_x = jnp.meshgrid(y_pos, x_pos, indexing="ij")   # torch default 'ij'
    grid_yx = jnp.stack([grid_y, grid_x], axis=0)
    grid_yx = jnp.broadcast_to(grid_yx[None], (B, 2, H, W))
    return jnp.concatenate([feat, grid_yx], axis=1)


def _pack_params(params, cpad, compute_dtype):
    """Stack per-layer (3,3,cin,cout) / (cout,) params into zero-padded
    (L, 9, cpad, cpad) / (L, 1, cpad) tensors (tap index = dy*3 + dx)."""
    L = len(params)
    w_stack = jnp.zeros((L, 9, cpad, cpad), compute_dtype)
    b_stack = jnp.zeros((L, 1, cpad), jnp.float32)
    for k, (w, b) in enumerate(params):
        _, _, cin, cout = w.shape
        w_stack = w_stack.at[k, :, :cin, :cout].set(
            w.reshape(9, cin, cout).astype(compute_dtype))
        b_stack = b_stack.at[k, 0, :cout].set(b.astype(jnp.float32))
    return w_stack, b_stack


@functools.partial(jax.jit, static_argnames=("use_coord", "compute_dtype"))
def coord_n_conv_forward(x_nchw, params, use_coord=True,
                         compute_dtype=jnp.float32):
    in_dtype = x_nchw.dtype
    B, _, H, W = x_nchw.shape
    num_convs = len(params)
    cout = params[-1][0].shape[-1]

    # Coord concat + NCHW->NHWC fuse into the single layout copy the TPU kernel
    # needs anyway (channels-last so channels ride the 128-lane axis).
    if use_coord:
        x_nchw = add_coord_nchw(x_nchw)
    c0 = x_nchw.shape[1]
    x_nhwc = jnp.transpose(x_nchw, (0, 2, 3, 1)).astype(compute_dtype)

    cpad = _round_up(max([c0] + [w.shape[-1] for (w, _) in params]), LANE)
    w_stack, b_stack = _pack_params(params, cpad, compute_dtype)

    # VMEM budget: double-buffered pipeline blocks + resident scratch, with headroom.
    dsz = jax.dtypes.canonicalize_dtype(compute_dtype).itemsize
    est = (2 * H * W * c0 * dsz                       # input block
           + 2 * H * W * cpad * dsz                   # output block
           + 2 * num_convs * 9 * cpad * cpad * dsz    # weights (resident)
           + 2 * num_convs * cpad * 4                 # bias
           + (H + 2) * (W + 2) * cpad * 4             # activation scratch
           + H * W * cpad * 4)                        # accumulator scratch
    vmem_limit = min(max(int(est * 1.5) + (4 << 20), 32 << 20), 64 << 20)
    # TODO(synk): for large H*W the per-image tile outgrows v7x's 64 MiB VMEM;
    # add a spatially tiled grid axis with num_convs-deep row halos in that regime.

    y = pl.pallas_call(
        _coord_n_conv_kernel,
        out_shape=jax.ShapeDtypeStruct((B, H, W, cpad), compute_dtype),
        grid_spec=pltpu.PrefetchScalarGridSpec(
            num_scalar_prefetch=0,
            grid=(B,),
            in_specs=[
                pl.BlockSpec((None, H, W, c0), lambda b: (b, 0, 0, 0)),
                pl.BlockSpec((num_convs, 9, cpad, cpad), lambda b: (0, 0, 0, 0)),
                pl.BlockSpec((num_convs, 1, cpad), lambda b: (0, 0, 0)),
            ],
            out_specs=pl.BlockSpec((None, H, W, cpad), lambda b: (b, 0, 0, 0)),
            scratch_shapes=[
                pltpu.VMEM((H + 2, W + 2, cpad), jnp.float32),
                pltpu.VMEM((H * W, cpad), jnp.float32),
            ]),
        compiler_params=pltpu.CompilerParams(
            dimension_semantics=("parallel",),        # batch across TensorCores
            vmem_limit_bytes=vmem_limit),
    )(x_nhwc, w_stack, b_stack)

    # Drop channel padding and return to the PyTorch NCHW interface.
    return jnp.transpose(y[..., :cout], (0, 3, 1, 2)).astype(in_dtype)


# ---------------------------------------------------------------------------
# Params init + pure-JAX reference (for correctness check)
# ---------------------------------------------------------------------------
def init_coord_n_conv_params(key, in_channels, out_channels, num_convs,
                             use_coord=True):
    params = []
    cin0 = in_channels + 2 if use_coord else in_channels
    for k in range(num_convs):
        cin = cin0 if k == 0 else out_channels
        key, kw, kb = jax.random.split(key, 3)
        fan_in = cin * 9
        w = jax.random.normal(kw, (3, 3, cin, out_channels), jnp.float32) * (fan_in ** -0.5)
        b = jax.random.normal(kb, (out_channels,), jnp.float32) * 0.01
        params.append((w, b))
    return params


def coord_n_conv_reference(x_nchw, params, use_coord=True,
                           compute_dtype=jnp.float32):
    if use_coord:
        x_nchw = add_coord_nchw(x_nchw)
    x = jnp.transpose(x_nchw, (0, 2, 3, 1)).astype(jnp.float32)
    for (w, b) in params:
        y = jax.lax.conv_general_dilated(
            x.astype(compute_dtype), w.astype(compute_dtype),
            window_strides=(1, 1), padding="SAME",
            dimension_numbers=("NHWC", "HWIO", "NHWC"),
            preferred_element_type=jnp.float32)
        x = jnp.maximum(y + b.astype(jnp.float32), 0.0)
    return jnp.transpose(x, (0, 3, 1, 2))


if __name__ == "__main__":
    B, Cin, H, W = 2, 4, 16, 16
    Cout, num_convs = 8, 2

    key = jax.random.PRNGKey(0)
    kx, kp = jax.random.split(key)
    x = jax.random.normal(kx, (B, Cin, H, W), jnp.float32)
    params = init_coord_n_conv_params(kp, Cin, Cout, num_convs, use_coord=True)

    # f32 operands: tight check vs XLA's conv.
    y = jax.block_until_ready(
        coord_n_conv_forward(x, params, use_coord=True, compute_dtype=jnp.float32))
    y_ref = coord_n_conv_reference(x, params, use_coord=True,
                                   compute_dtype=jnp.float32)
    assert y.shape == (B, Cout, H, W), y.shape
    assert jnp.allclose(y, y_ref, atol=2e-4, rtol=2e-4), \
        float(jnp.max(jnp.abs(y - y_ref)))

    # bf16 operands / f32 accumulate (native MXU rate on v5e/v6e/v7x).
    y_bf = jax.block_until_ready(
        coord_n_conv_forward(x, params, use_coord=True, compute_dtype=jnp.bfloat16))
    y_bf_ref = coord_n_conv_reference(x, params, use_coord=True,
                                      compute_dtype=jnp.bfloat16)
    assert y_bf.shape == (B, Cout, H, W), y_bf.shape
    assert jnp.allclose(y_bf, y_bf_ref, atol=3e-2, rtol=3e-2), \
        float(jnp.max(jnp.abs(y_bf - y_bf_ref)))

    print("KERNEL_OK")
</pallas_src>

<mosaic_0001>
module attributes {stable_mosaic.version = 11 : i64} {
  func.func @_coord_n_conv_kernel(%arg0: i32, %arg1: memref<1x16x16x6xf32, #tpu.memory_space<vmem>>, %arg2: memref<2x9x128x128xf32, #tpu.memory_space<vmem>>, %arg3: memref<2x1x128xf32, #tpu.memory_space<vmem>>, %arg4: memref<1x16x16x128xf32, #tpu.memory_space<vmem>>, %arg5: memref<18x18x128xf32, #tpu.memory_space<vmem>>, %arg6: memref<256x128xf32, #tpu.memory_space<vmem>>) attributes {dimension_semantics = [#tpu.dimension_semantics<parallel>], iteration_bounds = array<i64: 2>, scalar_prefetch = 0 : i64, scratch_operands = 2 : i64, tpu.core_type = #tpu.core_type<tc>, window_params = [{transform_indices = @transform_0, window_bounds = array<i64: 1, 16, 16, 6>}, {pipeline_mode = #tpu.pipeline_mode<synchronous>, transform_indices = @transform_1, window_bounds = array<i64: 2, 9, 128, 128>}, {pipeline_mode = #tpu.pipeline_mode<synchronous>, transform_indices = @transform_2, window_bounds = array<i64: 2, 1, 128>}, {transform_indices = @transform_3, window_bounds = array<i64: 1, 16, 16, 128>}]} {
    %cst = arith.constant 0.000000e+00 : f32
    %0 = vector.broadcast %cst : f32 to vector<18x18x128xf32>
    %c0 = arith.constant 0 : index
    %c0_0 = arith.constant 0 : index
    %c0_1 = arith.constant 0 : index
    %1 = vector.load %arg5[%c0, %c0_0, %c0_1] : memref<18x18x128xf32, #tpu.memory_space<vmem>>, vector<18x18x128xf32>
    tpu.vector_store %arg5[%c0, %c0_0, %c0_1], %0 {strides = array<i32>} : memref<18x18x128xf32, #tpu.memory_space<vmem>>, vector<18x18x128xf32>,
    %c0_2 = arith.constant 0 : index
    %c0_3 = arith.constant 0 : index
    %c0_4 = arith.constant 0 : index
    %c0_5 = arith.constant 0 : index
    %2 = vector.load %arg1[%c0_2, %c0_3, %c0_4, %c0_5] : memref<1x16x16x6xf32, #tpu.memory_space<vmem>>, vector<1x16x16x6xf32>
    %3 = vector.shape_cast %2 : vector<1x16x16x6xf32> to vector<16x16x6xf32>
    %c1 = arith.constant 1 : index
    %c1_6 = arith.constant 1 : index
    %c0_7 = arith.constant 0 : index
    %4 = vector.load %arg5[%c1, %c1_6, %c0_7] : memref<18x18x128xf32, #tpu.memory_space<vmem>>, vector<16x16x6xf32>
    tpu.vector_store %arg5[%c1, %c1_6, %c0_7], %3 {strides = array<i32>} : memref<18x18x128xf32, #tpu.memory_space<vmem>>, vector<16x16x6xf32>,
    %cst_8 = arith.constant 0.000000e+00 : f32
    %5 = vector.broadcast %cst_8 : f32 to vector<256x128xf32>
    %c0_9 = arith.constant 0 : index
    %c0_10 = arith.constant 0 : index
    %6 = vector.load %arg6[%c0_9, %c0_10] : memref<256x128xf32, #tpu.memory_space<vmem>>, vector<256x128xf32>
    tpu.vector_store %arg6[%c0_9, %c0_10], %5 {strides = array<i32>} : memref<256x128xf32, #tpu.memory_space<vmem>>, vector<256x128xf32>,
    %c0_11 = arith.constant 0 : index
    %c0_12 = arith.constant 0 : index
    %c0_13 = arith.constant 0 : index
    %7 = vector.load %arg5[%c0_11, %c0_12, %c0_13] : memref<18x18x128xf32, #tpu.memory_space<vmem>>, vector<16x16x128xf32>
    %8 = vector.shape_cast %7 : vector<16x16x128xf32> to vector<256x128xf32>
    %c0_14 = arith.constant 0 : index
    %c0_15 = arith.constant 0 : index
    %9 = vector.load %arg6[%c0_14, %c0_15] : memref<256x128xf32, #tpu.memory_space<vmem>>, vector<256x128xf32>
    %c0_16 = arith.constant 0 : index
    %c0_17 = arith.constant 0 : index
    %c0_18 = arith.constant 0 : index
    %c0_19 = arith.constant 0 : index
    %10 = vector.load %arg2[%c0_16, %c0_17, %c0_18, %c0_19] : memref<2x9x128x128xf32, #tpu.memory_space<vmem>>, vector<1x1x128x128xf32>
    %11 = vector.shape_cast %10 : vector<1x1x128x128xf32> to vector<128x128xf32>
    %cst_20 = arith.constant dense<0.000000e+00> : vector<256x128xf32>
    %12 = tpu.matmul %8, %11, %cst_20 {dimension_numbers = #tpu.dot_dimension_numbers<[1], [0], [0], [1], [0, 0, 1, 1], [], []>} : vector<256x128xf32>, vector<128x128xf32>, vector<256x128xf32> -> vector<256x128xf32>
    %13 = arith.addf %9, %12 : vector<256x128xf32>
    %c0_21 = arith.constant 0 : index
    %c0_22 = arith.constant 0 : index
    %14 = vector.load %arg6[%c0_21, %c0_22] : memref<256x128xf32, #tpu.memory_space<vmem>>, vector<256x128xf32>
    tpu.vector_store %arg6[%c0_21, %c0_22], %13 {strides = array<i32>} : memref<256x128xf32, #tpu.memory_space<vmem>>, vector<256x128xf32>,
    %c0_23 = arith.constant 0 : index
    %c1_24 = arith.constant 1 : index
    %c0_25 = arith.constant 0 : index
    %15 = vector.load %arg5[%c0_23, %c1_24, %c0_25] : memref<18x18x128xf32, #tpu.memory_space<vmem>>, vector<16x16x128xf32>
    %16 = vector.shape_cast %15 : vector<16x16x128xf32> to vector<256x128xf32>
    %c0_26 = arith.constant 0 : index
    %c0_27 = arith.constant 0 : index
    %17 = vector.load %arg6[%c0_26, %c0_27] : memref<256x128xf32, #tpu.memory_space<vmem>>, vector<256x128xf32>
    %c0_28 = arith.constant 0 : index
    %c1_29 = arith.constant 1 : index
    %c0_30 = arith.constant 0 : index
    %c0_31 = arith.constant 0 : index
    %18 = vector.load %arg2[%c0_28, %c1_29, %c0_30, %c0_31] : memref<2x9x128x128xf32, #tpu.memory_space<vmem>>, vector<1x1x128x128xf32>
    %19 = vector.shape_cast %18 : vector<1x1x128x128xf32> to vector<128x128xf32>
    %cst_32 = arith.constant dense<0.000000e+00> : vector<256x128xf32>
    %20 = tpu.matmul %16, %19, %cst_32 {dimension_numbers = #tpu.dot_dimension_numbers<[1], [0], [0], [1], [0, 0, 1, 1], [], []>} : vector<256x128xf32>, vector<128x128xf32>, vector<256x128xf32> -> vector<256x128xf32>
    %21 = arith.addf %17, %20 : vector<256x128xf32>
    %c0_33 = arith.constant 0 : index
    %c0_34 = arith.constant 0 : index
    %22 = vector.load %arg6[%c0_33, %c0_34] : memref<256x128xf32, #tpu.memory_space<vmem>>, vector<256x128xf32>
    tpu.vector_store %arg6[%c0_33, %c0_34], %21 {strides = array<i32>} : memref<256x128xf32, #tpu.memory_space<vmem>>, vector<256x128xf32>,
    %c0_35 = arith.constant 0 : index
    %c2 = arith.constant 2 : index
    %c0_36 = arith.constant 0 : index
    %23 = vector.load %arg5[%c0_35, %c2, %c0_36] : memref<18x18x128xf32, #tpu.memory_space<vmem>>, vector<16x16x128xf32>
    %24 = vector.shape_cast %23 : vector<16x16x128xf32> to vector<256x128xf32>
    %c0_37 = arith.constant 0 : index
    %c0_38 = arith.constant 0 : index
    %25 = vector.load %arg6[%c0_37, %c0_38] : memref<256x128xf32, #tpu.memory_space<vmem>>, vector<256x128xf32>
    %c0_39 = arith.constant 0 : index
    %c2_40 = arith.constant 2 : index
    %c0_41 = arith.constant 0 : index
    %c0_42 = arith.constant 0 : index
    %26 = vector.load %arg2[%c0_39, %c2_40, %c0_41, %c0_42] : memref<2x9x128x128xf32, #tpu.memory_space<vmem>>, vector<1x1x128x128xf32>
    %27 = vector.shape_cast %26 : vector<1x1x128x128xf32> to vector<128x128xf32>
    %cst_43 = arith.constant dense<0.000000e+00> : vector<256x128xf32>
    %28 = tpu.matmul %24, %27, %cst_43 {dimension_numbers = #tpu.dot_dimension_numbers<[1], [0], [0], [1], [0, 0, 1, 1], [], []>} : vector<256x128xf32>, vector<128x128xf32>, vector<256x128xf32> -> vector<256x128xf32>
    %29 = arith.addf %25, %28 : vector<256x128xf32>
    %c0_44 = arith.constant 0 : index
    %c0_45 = arith.constant 0 : index
    %30 = vector.load %arg6[%c0_44, %c0_45] : memref<256x128xf32, #tpu.memory_space<vmem>>, vector<256x128xf32>
    tpu.vector_store %arg6[%c0_44, %c0_45], %29 {strides = array<i32>} : memref<256x128xf32, #tpu.memory_space<vmem>>, vector<256x128xf32>,
    %c1_46 = arith.constant 1 : index
    %c0_47 = arith.constant 0 : index
    %c0_48 = arith.constant 0 : index
    %31 = vector.load %arg5[%c1_46, %c0_47, %c0_48] : memref<18x18x128xf32, #tpu.memory_space<vmem>>, vector<16x16x128xf32>
    %32 = vector.shape_cast %31 : vector<16x16x128xf32> to vector<256x128xf32>
    %c0_49 = arith.constant 0 : index
    %c0_50 = arith.constant 0 : index
    %33 = vector.load %arg6[%c0_49, %c0_50] : memref<256x128xf32, #tpu.memory_space<vmem>>, vector<256x128xf32>
    %c0_51 = arith.constant 0 : index
    %c3 = arith.constant 3 : index
    %c0_52 = arith.constant 0 : index
    %c0_53 = arith.constant 0 : index
    %34 = vector.load %arg2[%c0_51, %c3, %c0_52, %c0_53] : memref<2x9x128x128xf32, #tpu.memory_space<vmem>>, vector<1x1x128x128xf32>
    %35 = vector.shape_cast %34 : vector<1x1x128x128xf32> to vector<128x128xf32>
    %cst_54 = arith.constant dense<0.000000e+00> : vector<256x128xf32>
    %36 = tpu.matmul %32, %35, %cst_54 {dimension_numbers = #tpu.dot_dimension_numbers<[1], [0], [0], [1], [0, 0, 1, 1], [], []>} : vector<256x128xf32>, vector<128x128xf32>, vector<256x128xf32> -> vector<256x128xf32>
    %37 = arith.addf %33, %36 : vector<256x128xf32>
    %c0_55 = arith.constant 0 : index
    %c0_56 = arith.constant 0 : index
    %38 = vector.load %arg6[%c0_55, %c0_56] : memref<256x128xf32, #tpu.memory_space<vmem>>, vector<256x128xf32>
    tpu.vector_store %arg6[%c0_55, %c0_56], %37 {strides = array<i32>} : memref<256x128xf32, #tpu.memory_space<vmem>>, vector<256x128xf32>,
    %c1_57 = arith.constant 1 : index
    %c1_58 = arith.constant 1 : index
    %c0_59 = arith.constant 0 : index
    %39 = vector.load %arg5[%c1_57, %c1_58, %c0_59] : memref<18x18x128xf32, #tpu.memory_space<vmem>>, vector<16x16x128xf32>
    %40 = vector.shape_cast %39 : vector<16x16x128xf32> to vector<256x128xf32>
    %c0_60 = arith.constant 0 : index
    %c0_61 = arith.constant 0 : index
    %41 = vector.load %arg6[%c0_60, %c0_61] : memref<256x128xf32, #tpu.memory_space<vmem>>, vector<256x128xf32>
    %c0_62 = arith.constant 0 : index
    %c4 = arith.constant 4 : index
    %c0_63 = arith.constant 0 : index
    %c0_64 = arith.constant 0 : index
    %42 = vector.load %arg2[%c0_62, %c4, %c0_63, %c0_64] : memref<2x9x128x128xf32, #tpu.memory_space<vmem>>, vector<1x1x128x128xf32>
    %43 = vector.shape_cast %42 : vector<1x1x128x128xf32> to vector<128x128xf32>
    %cst_65 = arith.constant dense<0.000000e+00> : vector<256x128xf32>
    %44 = tpu.matmul %40, %43, %cst_65 {dimension_numbers = #tpu.dot_dimension_numbers<[1], [0], [0], [1], [0, 0, 1, 1], [], []>} : vector<256x128xf32>, vector<128x128xf32>, vector<256x128xf32> -> vector<256x128xf32>
    %45 = arith.addf %41, %44 : vector<256x128xf32>
    %c0_66 = arith.constant 0 : index
    %c0_67 = arith.constant 0 : index
    %46 = vector.load %arg6[%c0_66, %c0_67] : memref<256x128xf32, #tpu.memory_space<vmem>>, vector<256x128xf32>
    tpu.vector_store %arg6[%c0_66, %c0_67], %45 {strides = array<i32>} : memref<256x128xf32, #tpu.memory_space<vmem>>, vector<256x128xf32>,
    %c1_68 = arith.constant 1 : index
    %c2_69 = arith.constant 2 : index
    %c0_70 = arith.constant 0 : index
    %47 = vector.load %arg5[%c1_68, %c2_69, %c0_70] : memref<18x18x128xf32, #tpu.memory_space<vmem>>, vector<16x16x128xf32>
    %48 = vector.shape_cast %47 : vector<16x16x128xf32> to vector<256x128xf32>
    %c0_71 = arith.constant 0 : index
    %c0_72 = arith.constant 0 : index
    %49 = vector.load %arg6[%c0_71, %c0_72] : memref<256x128xf32, #tpu.memory_space<vmem>>, vector<256x128xf32>
    %c0_73 = arith.constant 0 : index
    %c5 = arith.constant 5 : index
    %c0_74 = arith.constant 0 : index
    %c0_75 = arith.constant 0 : index
    %50 = vector.load %arg2[%c0_73, %c5, %c0_74, %c0_75] : memref<2x9x128x128xf32, #tpu.memory_space<vmem>>, vector<1x1x128x128xf32>
    %51 = vector.shape_cast %50 : vector<1x1x128x128xf32> to vector<128x128xf32>
    %cst_76 = arith.constant dense<0.000000e+00> : vector<256x128xf32>
    %52 = tpu.matmul %48, %51, %cst_76 {dimension_numbers = #tpu.dot_dimension_numbers<[1], [0], [0], [1], [0, 0, 1, 1], [], []>} : vector<256x128xf32>, vector<128x128xf32>, vector<256x128xf32> -> vector<256x128xf32>
    %53 = arith.addf %49, %52 : vector<256x128xf32>
    %c0_77 = arith.constant 0 : index
    %c0_78 = arith.constant 0 : index
    %54 = vector.load %arg6[%c0_77, %c0_78] : memref<256x128xf32, #tpu.memory_space<vmem>>, vector<256x128xf32>
    tpu.vector_store %arg6[%c0_77, %c0_78], %53 {strides = array<i32>} : memref<256x128xf32, #tpu.memory_space<vmem>>, vector<256x128xf32>,
    %c2_79 = arith.constant 2 : index
    %c0_80 = arith.constant 0 : index
    %c0_81 = arith.constant 0 : index
    %55 = vector.load %arg5[%c2_79, %c0_80, %c0_81] : memref<18x18x128xf32, #tpu.memory_space<vmem>>, vector<16x16x128xf32>
    %56 = vector.shape_cast %55 : vector<16x16x128xf32> to vector<256x128xf32>
    %c0_82 = arith.constant 0 : index
    %c0_83 = arith.constant 0 : index
    %57 = vector.load %arg6[%c0_82, %c0_83] : memref<256x128xf32, #tpu.memory_space<vmem>>, vector<256x128xf32>
    %c0_84 = arith.constant 0 : index
    %c6 = arith.constant 6 : index
    %c0_85 = arith.constant 0 : index
    %c0_86 = arith.constant 0 : index
    %58 = vector.load %arg2[%c0_84, %c6, %c0_85, %c0_86] : memref<2x9x128x128xf32, #tpu.memory_space<vmem>>, vector<1x1x128x128xf32>
    %59 = vector.shape_cast %58 : vector<1x1x128x128xf32> to vector<128x128xf32>
    %cst_87 = arith.constant dense<0.000000e+00> : vector<256x128xf32>
    %60 = tpu.matmul %56, %59, %cst_87 {dimension_numbers = #tpu.dot_dimension_numbers<[1], [0], [0], [1], [0, 0, 1, 1], [], []>} : vector<256x128xf32>, vector<128x128xf32>, vector<256x128xf32> -> vector<256x128xf32>
    %61 = arith.addf %57, %60 : vector<256x128xf32>
    %c0_88 = arith.constant 0 : index
    %c0_89 = arith.constant 0 : index
    %62 = vector.load %arg6[%c0_88, %c0_89] : memref<256x128xf32, #tpu.memory_space<vmem>>, vector<256x128xf32>
    tpu.vector_store %arg6[%c0_88, %c0_89], %61 {strides = array<i32>} : memref<256x128xf32, #tpu.memory_space<vmem>>, vector<256x128xf32>,
    %c2_90 = arith.constant 2 : index
    %c1_91 = arith.constant 1 : index
    %c0_92 = arith.constant 0 : index
    %63 = vector.load %arg5[%c2_90, %c1_91, %c0_92] : memref<18x18x128xf32, #tpu.memory_space<vmem>>, vector<16x16x128xf32>
    %64 = vector.shape_cast %63 : vector<16x16x128xf32> to vector<256x128xf32>
    %c0_93 = arith.constant 0 : index
    %c0_94 = arith.constant 0 : index
    %65 = vector.load %arg6[%c0_93, %c0_94] : memref<256x128xf32, #tpu.memory_space<vmem>>, vector<256x128xf32>
    %c0_95 = arith.constant 0 : index
    %c7 = arith.constant 7 : index
    %c0_96 = arith.constant 0 : index
    %c0_97 = arith.constant 0 : index
    %66 = vector.load %arg2[%c0_95, %c7, %c0_96, %c0_97] : memref<2x9x128x128xf32, #tpu.memory_space<vmem>>, vector<1x1x128x128xf32>
    %67 = vector.shape_cast %66 : vector<1x1x128x128xf32> to vector<128x128xf32>
    %cst_98 = arith.constant dense<0.000000e+00> : vector<256x128xf32>
    %68 = tpu.matmul %64, %67, %cst_98 {dimension_numbers = #tpu.dot_dimension_numbers<[1], [0], [0], [1], [0, 0, 1, 1], [], []>} : vector<256x128xf32>, vector<128x128xf32>, vector<256x128xf32> -> vector<256x128xf32>
    %69 = arith.addf %65, %68 : vector<256x128xf32>
    %c0_99 = arith.constant 0 : index
    %c0_100 = arith.constant 0 : index
    %70 = vector.load %arg6[%c0_99, %c0_100] : memref<256x128xf32, #tpu.memory_space<vmem>>, vector<256x128xf32>
    tpu.vector_store %arg6[%c0_99, %c0_100], %69 {strides = array<i32>} : memref<256x128xf32, #tpu.memory_space<vmem>>, vector<256x128xf32>,
    %c2_101 = arith.constant 2 : index
    %c2_102 = arith.constant 2 : index
    %c0_103 = arith.constant 0 : index
    %71 = vector.load %arg5[%c2_101, %c2_102, %c0_103] : memref<18x18x128xf32, #tpu.memory_space<vmem>>, vector<16x16x128xf32>
    %72 = vector.shape_cast %71 : vector<16x16x128xf32> to vector<256x128xf32>
    %c0_104 = arith.constant 0 : index
    %c0_105 = arith.constant 0 : index
    %73 = vector.load %arg6[%c0_104, %c0_105] : memref<256x128xf32, #tpu.memory_space<vmem>>, vector<256x128xf32>
    %c0_106 = arith.constant 0 : index
    %c8 = arith.constant 8 : index
    %c0_107 = arith.constant 0 : index
    %c0_108 = arith.constant 0 : index
    %74 = vector.load %arg2[%c0_106, %c8, %c0_107, %c0_108] : memref<2x9x128x128xf32, #tpu.memory_space<vmem>>, vector<1x1x128x128xf32>
    %75 = vector.shape_cast %74 : vector<1x1x128x128xf32> to vector<128x128xf32>
    %cst_109 = arith.constant dense<0.000000e+00> : vector<256x128xf32>
    %76 = tpu.matmul %72, %75, %cst_109 {dimension_numbers = #tpu.dot_dimension_numbers<[1], [0], [0], [1], [0, 0, 1, 1], [], []>} : vector<256x128xf32>, vector<128x128xf32>, vector<256x128xf32> -> vector<256x128xf32>
    %77 = arith.addf %73, %76 : vector<256x128xf32>
    %c0_110 = arith.constant 0 : index
    %c0_111 = arith.constant 0 : index
    %78 = vector.load %arg6[%c0_110, %c0_111] : memref<256x128xf32, #tpu.memory_space<vmem>>, vector<256x128xf32>
    tpu.vector_store %arg6[%c0_110, %c0_111], %77 {strides = array<i32>} : memref<256x128xf32, #tpu.memory_space<vmem>>, vector<256x128xf32>,
    %c0_112 = arith.constant 0 : index
    %c0_113 = arith.constant 0 : index
    %79 = vector.load %arg6[%c0_112, %c0_113] : memref<256x128xf32, #tpu.memory_space<vmem>>, vector<256x128xf32>
    %c0_114 = arith.constant 0 : index
    %c0_115 = arith.constant 0 : index
    %c0_116 = arith.constant 0 : index
    %80 = vector.load %arg3[%c0_114, %c0_115, %c0_116] : memref<2x1x128xf32, #tpu.memory_space<vmem>>, vector<1x1x128xf32>
    %81 = vector.shape_cast %80 : vector<1x1x128xf32> to vector<1x128xf32>
    %82 = vector.broadcast %81 : vector<1x128xf32> to vector<256x128xf32>
    %83 = arith.addf %79, %82 : vector<256x128xf32>
    %cst_117 = arith.constant 0.000000e+00 : f32
    %84 = vector.broadcast %cst_117 : f32 to vector<256x128xf32>
    %85 = arith.maximumf %83, %84 : vector<256x128xf32>
    %86 = vector.shape_cast %85 : vector<256x128xf32> to vector<16x16x128xf32>
    %c1_118 = arith.constant 1 : index
    %c1_119 = arith.constant 1 : index
    %c0_120 = arith.constant 0 : index
    %87 = vector.load %arg5[%c1_118, %c1_119, %c0_120] : memref<18x18x128xf32, #tpu.memory_space<vmem>>, vector<16x16x128xf32>
    tpu.vector_store %arg5[%c1_118, %c1_119, %c0_120], %86 {strides = array<i32>} : memref<18x18x128xf32, #tpu.memory_space<vmem>>, vector<16x16x128xf32>,
    %cst_121 = arith.constant 0.000000e+00 : f32
    %88 = vector.broadcast %cst_121 : f32 to vector<256x128xf32>
    %c0_122 = arith.constant 0 : index
    %c0_123 = arith.constant 0 : index
    %89 = vector.load %arg6[%c0_122, %c0_123] : memref<256x128xf32, #tpu.memory_space<vmem>>, vector<256x128xf32>
    tpu.vector_store %arg6[%c0_122, %c0_123], %88 {strides = array<i32>} : memref<256x128xf32, #tpu.memory_space<vmem>>, vector<256x128xf32>,
    %c0_124 = arith.constant 0 : index
    %c0_125 = arith.constant 0 : index
    %c0_126 = arith.constant 0 : index
    %90 = vector.load %arg5[%c0_124, %c0_125, %c0_126] : memref<18x18x128xf32, #tpu.memory_space<vmem>>, vector<16x16x128xf32>
    %91 = vector.shape_cast %90 : vector<16x16x128xf32> to vector<256x128xf32>
    %c0_127 = arith.constant 0 : index
    %c0_128 = arith.constant 0 : index
    %92 = vector.load %arg6[%c0_127, %c0_128] : memref<256x128xf32, #tpu.memory_space<vmem>>, vector<256x128xf32>
    %c1_129 = arith.constant 1 : index
    %c0_130 = arith.constant 0 : index
    %c0_131 = arith.constant 0 : index
    %c0_132 = arith.constant 0 : index
    %93 = vector.load %arg2[%c1_129, %c0_130, %c0_131, %c0_132] : memref<2x9x128x128xf32, #tpu.memory_space<vmem>>, vector<1x1x128x128xf32>
    %94 = vector.shape_cast %93 : vector<1x1x128x128xf32> to vector<128x128xf32>
    %cst_133 = arith.constant dense<0.000000e+00> : vector<256x128xf32>
    %95 = tpu.matmul %91, %94, %cst_133 {dimension_numbers = #tpu.dot_dimension_numbers<[1], [0], [0], [1], [0, 0, 1, 1], [], []>} : vector<256x128xf32>, vector<128x128xf32>, vector<256x128xf32> -> vector<256x128xf32>
    %96 = arith.addf %92, %95 : vector<256x128xf32>
    %c0_134 = arith.constant 0 : index
    %c0_135 = arith.constant 0 : index
    %97 = vector.load %arg6[%c0_134, %c0_135] : memref<256x128xf32, #tpu.memory_space<vmem>>, vector<256x128xf32>
    tpu.vector_store %arg6[%c0_134, %c0_135], %96 {strides = array<i32>} : memref<256x128xf32, #tpu.memory_space<vmem>>, vector<256x128xf32>,
    %c0_136 = arith.constant 0 : index
    %c1_137 = arith.constant 1 : index
    %c0_138 = arith.constant 0 : index
    %98 = vector.load %arg5[%c0_136, %c1_137, %c0_138] : memref<18x18x128xf32, #tpu.memory_space<vmem>>, vector<16x16x128xf32>
    %99 = vector.shape_cast %98 : vector<16x16x128xf32> to vector<256x128xf32>
    %c0_139 = arith.constant 0 : index
    %c0_140 = arith.constant 0 : index
    %100 = vector.load %arg6[%c0_139, %c0_140] : memref<256x128xf32, #tpu.memory_space<vmem>>, vector<256x128xf32>
    %c1_141 = arith.constant 1 : index
    %c1_142 = arith.constant 1 : index
    %c0_143 = arith.constant 0 : index
    %c0_144 = arith.constant 0 : index
    %101 = vector.load %arg2[%c1_141, %c1_142, %c0_143, %c0_144] : memref<2x9x128x128xf32, #tpu.memory_space<vmem>>, vector<1x1x128x128xf32>
    %102 = vector.shape_cast %101 : vector<1x1x128x128xf32> to vector<128x128xf32>
    %cst_145 = arith.constant dense<0.000000e+00> : vector<256x128xf32>
    %103 = tpu.matmul %99, %102, %cst_145 {dimension_numbers = #tpu.dot_dimension_numbers<[1], [0], [0], [1], [0, 0, 1, 1], [], []>} : vector<256x128xf32>, vector<128x128xf32>, vector<256x128xf32> -> vector<256x128xf32>
    %104 = arith.addf %100, %103 : vector<256x128xf32>
    %c0_146 = arith.constant 0 : index
    %c0_147 = arith.constant 0 : index
    %105 = vector.load %arg6[%c0_146, %c0_147] : memref<256x128xf32, #tpu.memory_space<vmem>>, vector<256x128xf32>
    tpu.vector_store %arg6[%c0_146, %c0_147], %104 {strides = array<i32>} : memref<256x128xf32, #tpu.memory_space<vmem>>, vector<256x128xf32>,
    %c0_148 = arith.constant 0 : index
    %c2_149 = arith.constant 2 : index
    %c0_150 = arith.constant 0 : index
    %106 = vector.load %arg5[%c0_148, %c2_149, %c0_150] : memref<18x18x128xf32, #tpu.memory_space<vmem>>, vector<16x16x128xf32>
    %107 = vector.shape_cast %106 : vector<16x16x128xf32> to vector<256x128xf32>
    %c0_151 = arith.constant 0 : index
    %c0_152 = arith.constant 0 : index
    %108 = vector.load %arg6[%c0_151, %c0_152] : memref<256x128xf32, #tpu.memory_space<vmem>>, vector<256x128xf32>
    %c1_153 = arith.constant 1 : index
    %c2_154 = arith.constant 2 : index
    %c0_155 = arith.constant 0 : index
    %c0_156 = arith.constant 0 : index
    %109 = vector.load %arg2[%c1_153, %c2_154, %c0_155, %c0_156] : memref<2x9x128x128xf32, #tpu.memory_space<vmem>>, vector<1x1x128x128xf32>
    %110 = vector.shape_cast %109 : vector<1x1x128x128xf32> to vector<128x128xf32>
    %cst_157 = arith.constant dense<0.000000e+00> : vector<256x128xf32>
    %111 = tpu.matmul %107, %110, %cst_157 {dimension_numbers = #tpu.dot_dimension_numbers<[1], [0], [0], [1], [0, 0, 1, 1], [], []>} : vector<256x128xf32>, vector<128x128xf32>, vector<256x128xf32> -> vector<256x128xf32>
    %112 = arith.addf %108, %111 : vector<256x128xf32>
    %c0_158 = arith.constant 0 : index
    %c0_159 = arith.constant 0 : index
    %113 = vector.load %arg6[%c0_158, %c0_159] : memref<256x128xf32, #tpu.memory_space<vmem>>, vector<256x128xf32>
    tpu.vector_store %arg6[%c0_158, %c0_159], %112 {strides = array<i32>} : memref<256x128xf32, #tpu.memory_space<vmem>>, vector<256x128xf32>,
    %c1_160 = arith.constant 1 : index
    %c0_161 = arith.constant 0 : index
    %c0_162 = arith.constant 0 : index
    %114 = vector.load %arg5[%c1_160, %c0_161, %c0_162] : memref<18x18x128xf32, #tpu.memory_space<vmem>>, vector<16x16x128xf32>
    %115 = vector.shape_cast %114 : vector<16x16x128xf32> to vector<256x128xf32>
    %c0_163 = arith.constant 0 : index
    %c0_164 = arith.constant 0 : index
    %116 = vector.load %arg6[%c0_163, %c0_164] : memref<256x128xf32, #tpu.memory_space<vmem>>, vector<256x128xf32>
    %c1_165 = arith.constant 1 : index
    %c3_166 = arith.constant 3 : index
    %c0_167 = arith.constant 0 : index
    %c0_168 = arith.constant 0 : index
    %117 = vector.load %arg2[%c1_165, %c3_166, %c0_167, %c0_168] : memref<2x9x128x128xf32, #tpu.memory_space<vmem>>, vector<1x1x128x128xf32>
    %118 = vector.shape_cast %117 : vector<1x1x128x128xf32> to vector<128x128xf32>
    %cst_169 = arith.constant dense<0.000000e+00> : vector<256x128xf32>
    %119 = tpu.matmul %115, %118, %cst_169 {dimension_numbers = #tpu.dot_dimension_numbers<[1], [0], [0], [1], [0, 0, 1, 1], [], []>} : vector<256x128xf32>, vector<128x128xf32>, vector<256x128xf32> -> vector<256x128xf32>
    %120 = arith.addf %116, %119 : vector<256x128xf32>
    %c0_170 = arith.constant 0 : index
    %c0_171 = arith.constant 0 : index
    %121 = vector.load %arg6[%c0_170, %c0_171] : memref<256x128xf32, #tpu.memory_space<vmem>>, vector<256x128xf32>
    tpu.vector_store %arg6[%c0_170, %c0_171], %120 {strides = array<i32>} : memref<256x128xf32, #tpu.memory_space<vmem>>, vector<256x128xf32>,
    %c1_172 = arith.constant 1 : index
    %c1_173 = arith.constant 1 : index
    %c0_174 = arith.constant 0 : index
    %122 = vector.load %arg5[%c1_172, %c1_173, %c0_174] : memref<18x18x128xf32, #tpu.memory_space<vmem>>, vector<16x16x128xf32>
    %123 = vector.shape_cast %122 : vector<16x16x128xf32> to vector<256x128xf32>
    %c0_175 = arith.constant 0 : index
    %c0_176 = arith.constant 0 : index
    %124 = vector.load %arg6[%c0_175, %c0_176] : memref<256x128xf32, #tpu.memory_space<vmem>>, vector<256x128xf32>
    %c1_177 = arith.constant 1 : index
    %c4_178 = arith.constant 4 : index
    %c0_179 = arith.constant 0 : index
    %c0_180 = arith.constant 0 : index
    %125 = vector.load %arg2[%c1_177, %c4_178, %c0_179, %c0_180] : memref<2x9x128x128xf32, #tpu.memory_space<vmem>>, vector<1x1x128x128xf32>
    %126 = vector.shape_cast %125 : vector<1x1x128x128xf32> to vector<128x128xf32>
    %cst_181 = arith.constant dense<0.000000e+00> : vector<256x128xf32>
    %127 = tpu.matmul %123, %126, %cst_181 {dimension_numbers = #tpu.dot_dimension_numbers<[1], [0], [0], [1], [0, 0, 1, 1], [], []>} : vector<256x128xf32>, vector<128x128xf32>, vector<256x128xf32> -> vector<256x128xf32>
    %128 = arith.addf %124, %127 : vector<256x128xf32>
    %c0_182 = arith.constant 0 : index
    %c0_183 = arith.constant 0 : index
    %129 = vector.load %arg6[%c0_182, %c0_183] : memref<256x128xf32, #tpu.memory_space<vmem>>, vector<256x128xf32>
    tpu.vector_store %arg6[%c0_182, %c0_183], %128 {strides = array<i32>} : memref<256x128xf32, #tpu.memory_space<vmem>>, vector<256x128xf32>,
    %c1_184 = arith.constant 1 : index
    %c2_185 = arith.constant 2 : index
    %c0_186 = arith.constant 0 : index
    %130 = vector.load %arg5[%c1_184, %c2_185, %c0_186] : memref<18x18x128xf32, #tpu.memory_space<vmem>>, vector<16x16x128xf32>
    %131 = vector.shape_cast %130 : vector<16x16x128xf32> to vector<256x128xf32>
    %c0_187 = arith.constant 0 : index
    %c0_188 = arith.constant 0 : index
    %132 = vector.load %arg6[%c0_187, %c0_188] : memref<256x128xf32, #tpu.memory_space<vmem>>, vector<256x128xf32>
    %c1_189 = arith.constant 1 : index
    %c5_190 = arith.constant 5 : index
    %c0_191 = arith.constant 0 : index
    %c0_192 = arith.constant 0 : index
    %133 = vector.load %arg2[%c1_189, %c5_190, %c0_191, %c0_192] : memref<2x9x128x128xf32, #tpu.memory_space<vmem>>, vector<1x1x128x128xf32>
    %134 = vector.shape_cast %133 : vector<1x1x128x128xf32> to vector<128x128xf32>
    %cst_193 = arith.constant dense<0.000000e+00> : vector<256x128xf32>
    %135 = tpu.matmul %131, %134, %cst_193 {dimension_numbers = #tpu.dot_dimension_numbers<[1], [0], [0], [1], [0, 0, 1, 1], [], []>} : vector<256x128xf32>, vector<128x128xf32>, vector<256x128xf32> -> vector<256x128xf32>
    %136 = arith.addf %132, %135 : vector<256x128xf32>
    %c0_194 = arith.constant 0 : index
    %c0_195 = arith.constant 0 : index
    %137 = vector.load %arg6[%c0_194, %c0_195] : memref<256x128xf32, #tpu.memory_space<vmem>>, vector<256x128xf32>
    tpu.vector_store %arg6[%c0_194, %c0_195], %136 {strides = array<i32>} : memref<256x128xf32, #tpu.memory_space<vmem>>, vector<256x128xf32>,
    %c2_196 = arith.constant 2 : index
    %c0_197 = arith.constant 0 : index
    %c0_198 = arith.constant 0 : index
    %138 = vector.load %arg5[%c2_196, %c0_197, %c0_198] : memref<18x18x128xf32, #tpu.memory_space<vmem>>, vector<16x16x128xf32>
    %139 = vector.shape_cast %138 : vector<16x16x128xf32> to vector<256x128xf32>
    %c0_199 = arith.constant 0 : index
    %c0_200 = arith.constant 0 : index
    %140 = vector.load %arg6[%c0_199, %c0_200] : memref<256x128xf32, #tpu.memory_space<vmem>>, vector<256x128xf32>
    %c1_201 = arith.constant 1 : index
    %c6_202 = arith.constant 6 : index
    %c0_203 = arith.constant 0 : index
    %c0_204 = arith.constant 0 : index
    %141 = vector.load %arg2[%c1_201, %c6_202, %c0_203, %c0_204] : memref<2x9x128x128xf32, #tpu.memory_space<vmem>>, vector<1x1x128x128xf32>
    %142 = vector.shape_cast %141 : vector<1x1x128x128xf32> to vector<128x128xf32>
    %cst_205 = arith.constant dense<0.000000e+00> : vector<256x128xf32>
    %143 = tpu.matmul %139, %142, %cst_205 {dimension_numbers = #tpu.dot_dimension_numbers<[1], [0], [0], [1], [0, 0, 1, 1], [], []>} : vector<256x128xf32>, vector<128x128xf32>, vector<256x128xf32> -> vector<256x128xf32>
    %144 = arith.addf %140, %143 : vector<256x128xf32>
    %c0_206 = arith.constant 0 : index
    %c0_207 = arith.constant 0 : index
    %145 = vector.load %arg6[%c0_206, %c0_207] : memref<256x128xf32, #tpu.memory_space<vmem>>, vector<256x128xf32>
    tpu.vector_store %arg6[%c0_206, %c0_207], %144 {strides = array<i32>} : memref<256x128xf32, #tpu.memory_space<vmem>>, vector<256x128xf32>,
    %c2_208 = arith.constant 2 : index
    %c1_209 = arith.constant 1 : index
    %c0_210 = arith.constant 0 : index
    %146 = vector.load %arg5[%c2_208, %c1_209, %c0_210] : memref<18x18x128xf32, #tpu.memory_space<vmem>>, vector<16x16x128xf32>
    %147 = vector.shape_cast %146 : vector<16x16x128xf32> to vector<256x128xf32>
    %c0_211 = arith.constant 0 : index
    %c0_212 = arith.constant 0 : index
    %148 = vector.load %arg6[%c0_211, %c0_212] : memref<256x128xf32, #tpu.memory_space<vmem>>, vector<256x128xf32>
    %c1_213 = arith.constant 1 : index
    %c7_214 = arith.constant 7 : index
    %c0_215 = arith.constant 0 : index
    %c0_216 = arith.constant 0 : index
    %149 = vector.load %arg2[%c1_213, %c7_214, %c0_215, %c0_216] : memref<2x9x128x128xf32, #tpu.memory_space<vmem>>, vector<1x1x128x128xf32>
    %150 = vector.shape_cast %149 : vector<1x1x128x128xf32> to vector<128x128xf32>
    %cst_217 = arith.constant dense<0.000000e+00> : vector<256x128xf32>
    %151 = tpu.matmul %147, %150, %cst_217 {dimension_numbers = #tpu.dot_dimension_numbers<[1], [0], [0], [1], [0, 0, 1, 1], [], []>} : vector<256x128xf32>, vector<128x128xf32>, vector<256x128xf32> -> vector<256x128xf32>
    %152 = arith.addf %148, %151 : vector<256x128xf32>
    %c0_218 = arith.constant 0 : index
    %c0_219 = arith.constant 0 : index
    %153 = vector.load %arg6[%c0_218, %c0_219] : memref<256x128xf32, #tpu.memory_space<vmem>>, vector<256x128xf32>
    tpu.vector_store %arg6[%c0_218, %c0_219], %152 {strides = array<i32>} : memref<256x128xf32, #tpu.memory_space<vmem>>, vector<256x128xf32>,
    %c2_220 = arith.constant 2 : index
    %c2_221 = arith.constant 2 : index
    %c0_222 = arith.constant 0 : index
    %154 = vector.load %arg5[%c2_220, %c2_221, %c0_222] : memref<18x18x128xf32, #tpu.memory_space<vmem>>, vector<16x16x128xf32>
    %155 = vector.shape_cast %154 : vector<16x16x128xf32> to vector<256x128xf32>
    %c0_223 = arith.constant 0 : index
    %c0_224 = arith.constant 0 : index
    %156 = vector.load %arg6[%c0_223, %c0_224] : memref<256x128xf32, #tpu.memory_space<vmem>>, vector<256x128xf32>
    %c1_225 = arith.constant 1 : index
    %c8_226 = arith.constant 8 : index
    %c0_227 = arith.constant 0 : index
    %c0_228 = arith.constant 0 : index
    %157 = vector.load %arg2[%c1_225, %c8_226, %c0_227, %c0_228] : memref<2x9x128x128xf32, #tpu.memory_space<vmem>>, vector<1x1x128x128xf32>
    %158 = vector.shape_cast %157 : vector<1x1x128x128xf32> to vector<128x128xf32>
    %cst_229 = arith.constant dense<0.000000e+00> : vector<256x128xf32>
    %159 = tpu.matmul %155, %158, %cst_229 {dimension_numbers = #tpu.dot_dimension_numbers<[1], [0], [0], [1], [0, 0, 1, 1], [], []>} : vector<256x128xf32>, vector<128x128xf32>, vector<256x128xf32> -> vector<256x128xf32>
    %160 = arith.addf %156, %159 : vector<256x128xf32>
    %c0_230 = arith.constant 0 : index
    %c0_231 = arith.constant 0 : index
    %161 = vector.load %arg6[%c0_230, %c0_231] : memref<256x128xf32, #tpu.memory_space<vmem>>, vector<256x128xf32>
    tpu.vector_store %arg6[%c0_230, %c0_231], %160 {strides = array<i32>} : memref<256x128xf32, #tpu.memory_space<vmem>>, vector<256x128xf32>,
    %c0_232 = arith.constant 0 : index
    %c0_233 = arith.constant 0 : index
    %162 = vector.load %arg6[%c0_232, %c0_233] : memref<256x128xf32, #tpu.memory_space<vmem>>, vector<256x128xf32>
    %c1_234 = arith.constant 1 : index
    %c0_235 = arith.constant 0 : index
    %c0_236 = arith.constant 0 : index
    %163 = vector.load %arg3[%c1_234, %c0_235, %c0_236] : memref<2x1x128xf32, #tpu.memory_space<vmem>>, vector<1x1x128xf32>
    %164 = vector.shape_cast %163 : vector<1x1x128xf32> to vector<1x128xf32>
    %165 = vector.broadcast %164 : vector<1x128xf32> to vector<256x128xf32>
    %166 = arith.addf %162, %165 : vector<256x128xf32>
    %cst_237 = arith.constant 0.000000e+00 : f32
    %167 = vector.broadcast %cst_237 : f32 to vector<256x128xf32>
    %168 = arith.maximumf %166, %167 : vector<256x128xf32>
    %169 = vector.shape_cast %168 : vector<256x128xf32> to vector<16x16x128xf32>
    %c0_238 = arith.constant 0 : index
    %c0_239 = arith.constant 0 : index
    %c0_240 = arith.constant 0 : index
    %c0_241 = arith.constant 0 : index
    %170 = vector.load %arg4[%c0_238, %c0_239, %c0_240, %c0_241] : memref<1x16x16x128xf32, #tpu.memory_space<vmem>>, vector<1x16x16x128xf32>
    %171 = vector.shape_cast %170 : vector<1x16x16x128xf32> to vector<16x16x128xf32>
    %172 = vector.shape_cast %169 : vector<16x16x128xf32> to vector<1x16x16x128xf32>
    tpu.vector_store %arg4[%c0_238, %c0_239, %c0_240, %c0_241], %172 {strides = array<i32>} : memref<1x16x16x128xf32, #tpu.memory_space<vmem>>, vector<1x16x16x128xf32>,
    return
  }
  func.func @transform_0(%arg0: i32) -> (i32, i32, i32, i32) {
    %c0_i32 = arith.constant 0 : i32
    %c0_i32_0 = arith.constant 0 : i32
    %c0_i32_1 = arith.constant 0 : i32
    %c0_i32_2 = arith.constant 0 : i32
    return %arg0, %c0_i32, %c0_i32_0, %c0_i32_1 : i32, i32, i32, i32
  }
  func.func @transform_1(%arg0: i32) -> (i32, i32, i32, i32) {
    %c0_i32 = arith.constant 0 : i32
    %c0_i32_0 = arith.constant 0 : i32
    %c0_i32_1 = arith.constant 0 : i32
    %c0_i32_2 = arith.constant 0 : i32
    %c0_i32_3 = arith.constant 0 : i32
    return %c0_i32, %c0_i32_0, %c0_i32_1, %c0_i32_2 : i32, i32, i32, i32
  }
  func.func @transform_2(%arg0: i32) -> (i32, i32, i32) {
    %c0_i32 = arith.constant 0 : i32
    %c0_i32_0 = arith.constant 0 : i32
    %c0_i32_1 = arith.constant 0 : i32
    %c0_i32_2 = arith.constant 0 : i32
    return %c0_i32, %c0_i32_0, %c0_i32_1 : i32, i32, i32
  }
  func.func @transform_3(%arg0: i32) -> (i32, i32, i32, i32) {
    %c0_i32 = arith.constant 0 : i32
    %c0_i32_0 = arith.constant 0 : i32
    %c0_i32_1 = arith.constant 0 : i32
    %c0_i32_2 = arith.constant 0 : i32
    return %arg0, %c0_i32, %c0_i32_0, %c0_i32_1 : i32, i32, i32, i32
  }
}

</mosaic_0001>

<bundles_post_ra>
// kernel: coord_n_conv_forward.1
= control target key start
LH: loop header
LB: loop body
LE: loop exit
PB: predicated region body
PF: predicated region fallthrough
CT: control target
= control target key end

     0   :  { %s11061_s12 = smov 0   ;;  %s13065_s0 = inlined_call_operand.vmem [shape: f32[2,16,16,6], index: 0, kind: input, shape index: {}]   ;;  %s13066_s1 = inlined_call_operand.vmem [shape: f32[2,9,128,128], index: 1, kind: input, shape index: {}]   ;;  %s13067_s2 = inlined_call_operand.vmem [shape: f32[2,1,128], index: 2, kind: input, shape index: {}]   ;;  %s13068_s3 = inlined_call_operand.vmem [shape: f32[2,16,16,128], index: 3, kind: output, shape index: {}]  }
   0x1 LB: > { %s7341_s13 = sadd.s32 4294967295, %s11038_s12   ;;  %p7345_p0 = scmp.ge.s32.totalorder %s11038_s12, 1  ;;  %s11038_s12 = sphi %s11061_s12, %s13_s12  }
   0x2   : > { %p137_p1 = scmp.lt.s32.totalorder %s11038_s12, 3 }
   0x4   : > { %p138_p2 = pnand %p7345_p0, %p137_p1 }
   0x6   : > { %141 = sbr.rel (%p138_p2) target bundleno = 1573 (0x625), region = 32 }
   0xd   : > { %v387_v0 = vld [vmem:[%s13066_s1] sm:$0xff]  ;;  %v388_v1 = vld [vmem:[%s13066_s1 + $0x8] sm:$0xff]  ;;  %v389_v2 = vld [vmem:[%s13066_s1 + $0x10] sm:$0xff]  ;;  %p11080_p3 = scmp.lt.s32.totalorder %s7341_s13, 1  ;;  %v11040_v5 = vmov 0.0   ;;  %vm258_vm0 = vcmask 48128  }
   0xe   : > { %v11084_v3 = vpack.c.bf16 %v388_v1, %v387_v0  ;;  %v390_v4 = vld [vmem:[%s13066_s1 + $0x18] sm:$0xff]  ;;  %171 = vst [vmem:[#allocation2] sm:$0xff] %v11040_v5  ;;  %8525 = vmatprep.mubr.f32.mxu0 %v11040_v5  ;;  %172 = vst [vmem:[#allocation2 + $0x8] sm:$0xff] %v11040_v5  ;;  %9245 = vmatprep.mubr.f32.mxu1 %v11040_v5  ;;  %v391_v7 = vld [vmem:[%s13066_s1 + $0x20] sm:$0xff] }
   0xf   : > { %173 = vst [vmem:[#allocation2 + $0x10] sm:$0x3] %v11040_v5  ;;  %174 = vst [vmem:[#allocation2 + $0x18] sm:$0xff] %v11040_v5  ;;  %v9937_v6 = vpack.c.bf16 %v390_v4, %v389_v2  ;;  %v392_v8 = vld [vmem:[%s13066_s1 + $0x28] sm:$0xff]  ;;  %s13268_s13 = smov (!%p11080_p3, %s7341_s13), 1  ;;  %v393_v10 = vld [vmem:[%s13066_s1 + $0x30] sm:$0xff] }
  0x10   : > { %175 = vst [vmem:[#allocation2 + $0x20] sm:$0xff] %v11040_v5  ;;  %176 = vst [vmem:[#allocation2 + $0x28] sm:$0x3] %v11040_v5  ;;  %9934 = vmatprep.subr.bf16.mxu0 %v11084_v3  ;;  %s7627_s27 = sshll.u32 %s13268_s13, 8  ;;  %v9941_v9 = vpack.c.bf16 %v392_v8, %v391_v7  ;;  %v394_v11 = vld [vmem:[%s13066_s1 + $0x38] sm:$0xff]  ;;  %v395_v20 = vld [vmem:[%s13066_s1 + $0x40] sm:$0xff] }
  0x11   : > { %177 = vst [vmem:[#allocation2 + $0x30] sm:$0xff] %v11040_v5  ;;  %178 = vst [vmem:[#allocation2 + $0x38] sm:$0xff] %v11040_v5  ;;  %9936 = vmatpush3.bf16.msra.mxu0 %v11084_v3  ;;  %s11171_s7 = scalar_lea.vmem %s13065_s0, %s7627_s27  ;;  %v9945_v19 = vpack.c.bf16 %v394_v11, %v393_v10  ;;  %v396_v21 = vld [vmem:[%s13066_s1 + $0x48] sm:$0xff]  ;;  %v397_v32 = vld [vmem:[%s13066_s1 + $0x50] sm:$0xff] }
  0x12   : > { %179 = vst [vmem:[#allocation2 + $0x40] sm:$0x3] %v11040_v5  ;;  %180 = vst [vmem:[#allocation2 + $0x48] sm:$0xff] %v11040_v5  ;;  %9938 = vmatprep.subr.bf16.mxu0 %v9937_v6  ;;  %v225_v12 = vld [vmem:[%s11171_s7] sm:$0xff]  ;;  %v226_v13 = vld [vmem:[%s11171_s7 + $0x8] sm:$0xff]  ;;  %v9949_v30 = vpack.c.bf16 %v396_v21, %v395_v20 }
  0x13   : > { %181 = vst [vmem:[#allocation2 + $0x50] sm:$0xff] %v11040_v5  ;;  %182 = vst [vmem:[#allocation2 + $0x58] sm:$0x3] %v11040_v5  ;;  %v227_v14 = vld [vmem:[%s11171_s7 + $0x10] sm:$0xff]  ;;  %v228_v15 = vld [vmem:[%s11171_s7 + $0x18] sm:$0xff] }
  0x14   : > { %183 = vst [vmem:[#allocation2 + $0x60] sm:$0xff] %v11040_v5  ;;  %184 = vst [vmem:[#allocation2 + $0x68] sm:$0xff] %v11040_v5  ;;  %v229_v16 = vld [vmem:[%s11171_s7 + $0x20] sm:$0xff]  ;;  %v230_v17 = vld [vmem:[%s11171_s7 + $0x28] sm:$0xff] }
  0x15   : > { %185 = vst [vmem:[#allocation2 + $0x70] sm:$0x3] %v11040_v5  ;;  %186 = vst [vmem:[#allocation2 + $0x78] sm:$0xff] %v11040_v5  ;;  %9940 = vmatpush3.bf16.msra.mxu0 %v9937_v6  ;;  %v231_v18 = vld [vmem:[%s11171_s7 + $0x30] sm:$0xff]  ;;  %v232_v22 = vld [vmem:[%s11171_s7 + $0x38] sm:$0xff] }
  0x16   : > { %187 = vst [vmem:[#allocation2 + $0x80] sm:$0xff] %v11040_v5  ;;  %188 = vst [vmem:[#allocation2 + $0x88] sm:$0x3] %v11040_v5  ;;  %9942 = vmatprep.subr.bf16.mxu0 %v9941_v9  ;;  %v233_v23 = vld [vmem:[%s11171_s7 + $0x40] sm:$0xff]  ;;  %v234_v24 = vld [vmem:[%s11171_s7 + $0x48] sm:$0xff] }
  0x17   : > { %189 = vst [vmem:[#allocation2 + $0x90] sm:$0xff] %v11040_v5  ;;  %190 = vst [vmem:[#allocation2 + $0x98] sm:$0xff] %v11040_v5  ;;  %v235_v25 = vld [vmem:[%s11171_s7 + $0x50] sm:$0xff]  ;;  %v236_v26 = vld [vmem:[%s11171_s7 + $0x58] sm:$0xff] }
  0x18   : > { %191 = vst [vmem:[#allocation2 + $0xa0] sm:$0x3] %v11040_v5  ;;  %192 = vst [vmem:[#allocation2 + $0xa8] sm:$0xff] %v11040_v5  ;;  %v237_v27 = vld [vmem:[%s11171_s7 + $0x60] sm:$0xff]  ;;  %v238_v28 = vld [vmem:[%s11171_s7 + $0x68] sm:$0xff] }
  0x19   : > { %193 = vst [vmem:[#allocation2 + $0xb0] sm:$0xff] %v11040_v5  ;;  %194 = vst [vmem:[#allocation2 + $0xb8] sm:$0x3] %v11040_v5  ;;  %9944 = vmatpush3.bf16.msra.mxu0 %v9941_v9  ;;  %v239_v29 = vld [vmem:[%s11171_s7 + $0x70] sm:$0xff]  ;;  %v240_v31 = vld [vmem:[%s11171_s7 + $0x78] sm:$0xff] }
  0x1a   : > { %195 = vst [vmem:[#allocation2 + $0xc0] sm:$0xff] %v11040_v5  ;;  %196 = vst [vmem:[#allocation2 + $0xc8] sm:$0xff] %v11040_v5  ;;  %9946 = vmatprep.subr.bf16.mxu0 %v9945_v19  ;;  %v398_v33 = vld [vmem:[%s13066_s1 + $0x58] sm:$0xff]  ;;  %v241_v34 = vld [vmem:[%s11171_s7 + $0x80] sm:$0xff] }
  0x1b   : > { %197 = vst [vmem:[#allocation2 + $0xd0] sm:$0x3] %v11040_v5  ;;  %198 = vst [vmem:[#allocation2 + $0xd8] sm:$0xff] %v11040_v5  ;;  %v242_v35 = vld [vmem:[%s11171_s7 + $0x88] sm:$0xff]  ;;  %v9953_v36 = vpack.c.bf16 %v398_v33, %v397_v32  ;;  %v243_v37 = vld [vmem:[%s11171_s7 + $0x90] sm:$0xff] }
  0x1c   : > { %199 = vst [vmem:[#allocation2 + $0xe0] sm:$0xff] %v11040_v5  ;;  %200 = vst [vmem:[#allocation2 + $0xe8] sm:$0x3] %v11040_v5  ;;  %v244_v38 = vld [vmem:[%s11171_s7 + $0x98] sm:$0xff]  ;;  %v399_v39 = vld [vmem:[%s13066_s1 + $0x60] sm:$0xff] }
  0x1d   : > { %201 = vst [vmem:[#allocation2 + $0xf0] sm:$0xff] %v11040_v5  ;;  %202 = vst [vmem:[#allocation2 + $0xf8] sm:$0xff] %v11040_v5  ;;  %9948 = vmatpush3.bf16.msra.mxu0 %v9945_v19  ;;  %v400_v40 = vld [vmem:[%s13066_s1 + $0x68] sm:$0xff]  ;;  %v401_v42 = vld [vmem:[%s13066_s1 + $0x70] sm:$0xff] }
  0x1e   : > { %203 = vst [vmem:[#allocation2 + $0x100] sm:$0x3] %v11040_v5  ;;  %204 = vst [vmem:[#allocation2 + $0x108] sm:$0xff] %v11040_v5  ;;  %9950 = vmatprep.subr.bf16.mxu0 %v9949_v30  ;;  %v9957_v41 = vpack.c.bf16 %v400_v40, %v399_v39  ;;  %v245_v43 = vld [vmem:[%s11171_s7 + $0xa0] sm:$0xff]  ;;  %v246_v44 = vld [vmem:[%s11171_s7 + $0xa8] sm:$0xff] }
  0x1f   : > { %205 = vst [vmem:[#allocation2 + $0x110] sm:$0xff] %v11040_v5  ;;  %206 = vst [vmem:[#allocation2 + $0x118] sm:$0x3] %v11040_v5  ;;  %v402_v45 = vld [vmem:[%s13066_s1 + $0x78] sm:$0xff]  ;;  %v247_v46 = vld [vmem:[%s11171_s7 + $0xb0] sm:$0xff] }
  0x20   : > { %207 = vst [vmem:[#allocation2 + $0x120] sm:$0xff] %v11040_v5  ;;  %208 = vst [vmem:[#allocation2 + $0x128] sm:$0xff] %v11040_v5  ;;  %v248_v47 = vld [vmem:[%s11171_s7 + $0xb8] sm:$0xff]  ;;  %v249_v48 = vld [vmem:[%s11171_s7 + $0xc0] sm:$0xff]  ;;  %v9961_v51 = vpack.c.bf16 %v402_v45, %v401_v42 }
  0x21   : > { %209 = vst [vmem:[#allocation2 + $0x130] sm:$0x3] %v11040_v5  ;;  %210 = vst [vmem:[#allocation2 + $0x138] sm:$0xff] %v11040_v5  ;;  %9952 = vmatpush3.bf16.msra.mxu0 %v9949_v30  ;;  %v250_v49 = vld [vmem:[%s11171_s7 + $0xc8] sm:$0xff]  ;;  %v251_v50 = vld [vmem:[%s11171_s7 + $0xd0] sm:$0xff] }
  0x22   : > { %211 = vst [vmem:[#allocation2 + $0x140] sm:$0xff] %v11040_v5  ;;  %212 = vst [vmem:[#allocation2 + $0x148] sm:$0x3] %v11040_v5  ;;  %9954 = vmatprep.subr.bf16.mxu0 %v9953_v36  ;;  %v252_v52 = vld [vmem:[%s11171_s7 + $0xd8] sm:$0xff]  ;;  %v7350_v53 = vld [vmem:[%s13066_s1 + $0x80] sm:$0xff] }
  0x23   : > { %213 = vst [vmem:[#allocation2 + $0x150] sm:$0xff] %v11040_v5  ;;  %214 = vst [vmem:[#allocation2 + $0x158] sm:$0xff] %v11040_v5  ;;  %v7351_v54 = vld [vmem:[%s13066_s1 + $0x88] sm:$0xff]  ;;  %v253_v55 = vld [vmem:[%s11171_s7 + $0xe0] sm:$0xff] }
  0x24   : > { %215 = vst [vmem:[#allocation2 + $0x160] sm:$0x3] %v11040_v5  ;;  %216 = vst [vmem:[#allocation2 + $0x168] sm:$0xff] %v11040_v5  ;;  %v254_v56 = vld [vmem:[%s11171_s7 + $0xe8] sm:$0xff]  ;;  %v9965_v57 = vpack.c.bf16 %v7351_v54, %v7350_v53  ;;  %v7352_v58 = vld [vmem:[%s13066_s1 + $0x90] sm:$0xff] }
  0x25   : > { %217 = vst [vmem:[#allocation2 + $0x170] sm:$0xff] %v11040_v5  ;;  %218 = vst [vmem:[#allocation2 + $0x178] sm:$0x3] %v11040_v5  ;;  %9956 = vmatpush3.bf16.msra.mxu0 %v9953_v36  ;;  %v7353_v59 = vld [vmem:[%s13066_s1 + $0x98] sm:$0xff]  ;;  %v7354_v62 = vld [vmem:[%s13066_s1 + $0xa0] sm:$0xff] }
  0x26   : > { %219 = vst [vmem:[#allocation2 + $0x180] sm:$0xff] %v11040_v5  ;;  %220 = vst [vmem:[#allocation2 + $0x188] sm:$0xff] %v11040_v5  ;;  %9958 = vmatprep.subr.bf16.mxu0 %v9957_v41  ;;  %v9969_v61 = vpack.c.bf16 %v7353_v59, %v7352_v58  ;;  %v7355_v63 = vld [vmem:[%s13066_s1 + $0xa8] sm:$0xff]  ;;  %v7356_v3 = vld [vmem:[%s13066_s1 + $0xb0] sm:$0xff] }
  0x27   : > { %221 = vst [vmem:[#allocation2 + $0x190] sm:$0x3] %v11040_v5  ;;  %222 = vst [vmem:[#allocation2 + $0x198] sm:$0xff] %v11040_v5  ;;  %v9973_v2 = vpack.c.bf16 %v7355_v63, %v7354_v62  ;;  %v7357_v4 = vld [vmem:[%s13066_s1 + $0xb8] sm:$0xff]  ;;  %v7358_v8 = vld [vmem:[%s13066_s1 + $0xc0] sm:$0xff] }
  0x28   : > { %223 = vst [vmem:[#allocation2 + $0x1a0] sm:$0xff] %v11040_v5  ;;  %224 = vst [vmem:[#allocation2 + $0x1a8] sm:$0x3] %v11040_v5  ;;  %v9977_v7 = vpack.c.bf16 %v7357_v4, %v7356_v3  ;;  %v7359_v9 = vld [vmem:[%s13066_s1 + $0xc8] sm:$0xff]  ;;  %v7370_v54 = vld [vmem:[%s13066_s1 + $0x120] sm:$0xff] }
  0x29   : > { %259 = vst.msk [vmem:[#allocation2 + $0x19] sm:$0xff] %vm258_vm0, %v225_v12  ;;  %260 = vst.msk [vmem:[#allocation2 + $0x21] sm:$0xff] %vm258_vm0, %v226_v13  ;;  %9960 = vmatpush3.bf16.msra.mxu0 %v9957_v41  ;;  %v9981_v12 = vpack.c.bf16 %v7359_v9, %v7358_v8  ;;  %v7360_v13 = vld [vmem:[%s13066_s1 + $0xd0] sm:$0xff]  ;;  %v7363_v19 = vld [vmem:[%s13066_s1 + $0xe8] sm:$0xff] }
  0x2a   : > { %261 = vst.msk [vmem:[#allocation2 + $0x31] sm:$0xff] %vm258_vm0, %v227_v14  ;;  %262 = vst.msk [vmem:[#allocation2 + $0x39] sm:$0xff] %vm258_vm0, %v228_v15  ;;  %9962 = vmatprep.subr.bf16.mxu0 %v9961_v51  ;;  %v7361_v14 = vld [vmem:[%s13066_s1 + $0xd8] sm:$0xff]  ;;  %v7372_v59 = vld [vmem:[%s13066_s1 + $0x130] sm:$0xff] }
  0x2b   : > { %263 = vst.msk [vmem:[#allocation2 + $0x49] sm:$0xff] %vm258_vm0, %v229_v16  ;;  %264 = vst.msk [vmem:[#allocation2 + $0x51] sm:$0xff] %vm258_vm0, %v230_v17  ;;  %v9985_v17 = vpack.c.bf16 %v7361_v14, %v7360_v13  ;;  %v7374_v3 = vld [vmem:[%s13066_s1 + $0x140] sm:$0xff]  ;;  %v7375_v4 = vld [vmem:[%s13066_s1 + $0x148] sm:$0xff] }
  0x2c   : > { %265 = vst.msk [vmem:[#allocation2 + $0x61] sm:$0xff] %vm258_vm0, %v231_v18  ;;  %266 = vst.msk [vmem:[#allocation2 + $0x69] sm:$0xff] %vm258_vm0, %v232_v22  ;;  %v7362_v18 = vld [vmem:[%s13066_s1 + $0xe0] sm:$0xff]  ;;  %v10013_v9 = vpack.c.bf16 %v7375_v4, %v7374_v3  ;;  %v7377_v13 = vld [vmem:[%s13066_s1 + $0x158] sm:$0xff] }
  0x2d   : > { %267 = vst.msk [vmem:[#allocation2 + $0x79] sm:$0xff] %vm258_vm0, %v233_v23  ;;  %268 = vst.msk [vmem:[#allocation2 + $0x81] sm:$0xff] %vm258_vm0, %v234_v24  ;;  %9964 = vmatpush3.bf16.msra.mxu0 %v9961_v51  ;;  %v9989_v22 = vpack.c.bf16 %v7363_v19, %v7362_v18  ;;  %v7364_v23 = vld [vmem:[%s13066_s1 + $0xf0] sm:$0xff]  ;;  %v7365_v24 = vld [vmem:[%s13066_s1 + $0xf8] sm:$0xff] }
  0x2e   : > { %269 = vst.msk [vmem:[#allocation2 + $0x91] sm:$0xff] %vm258_vm0, %v235_v25  ;;  %270 = vst.msk [vmem:[#allocation2 + $0x99] sm:$0xff] %vm258_vm0, %v236_v26  ;;  %9966 = vmatprep.subr.bf16.mxu0 %v9965_v57  ;;  %v693_v51 = vld [vmem:[#allocation2 + $0x9] sm:$0xff]  ;;  %v7378_v19 = vld [vmem:[%s13066_s1 + $0x160] sm:$0xff] }
  0x2f   : > { %271 = vst.msk [vmem:[#allocation2 + $0xa9] sm:$0xff] %vm258_vm0, %v237_v27  ;;  %272 = vst.msk [vmem:[#allocation2 + $0xb1] sm:$0xff] %vm258_vm0, %v238_v28  ;;  %v9993_v27 = vpack.c.bf16 %v7365_v24, %v7364_v23  ;;  %v7366_v28 = vld [vmem:[%s13066_s1 + $0x100] sm:$0xff] }
  0x30   : > { %273 = vst.msk [vmem:[#allocation2 + $0xc1] sm:$0xff] %vm258_vm0, %v239_v29  ;;  %274 = vst.msk [vmem:[#allocation2 + $0xc9] sm:$0xff] %vm258_vm0, %v240_v31  ;;  %v11269_v60 = vld [vmem:[#allocation2 + $0x18] sm:$0xff]  ;;  %8526 = vmatmul.mubr.f32.vlgmr.msra.gmra.mrb[0].mxu0 %v11040_v5  ;;  %v11279_v0 = vld [vmem:[#allocation2 + $0x20] sm:$0xff] }
  0x31   : > { %275 = vst.msk [vmem:[#allocation2 + $0xd9] sm:$0xff] %vm258_vm0, %v241_v34  ;;  %276 = vst.msk [vmem:[#allocation2 + $0xe1] sm:$0xff] %vm258_vm0, %v242_v35  ;;  %9968 = vmatpush3.bf16.msra.mxu0 %v9965_v57  ;;  %8528 = vmatprep.mubr.f32.mxu0 %v11269_v60  ;;  %v11281_v1 = vld [vmem:[#allocation2 + $0x30] sm:$0xff]  ;;  %v11291_v5 = vld [vmem:[#allocation2 + $0x38] sm:$0xff] }
  0x32   : > { %277 = vst.msk [vmem:[#allocation2 + $0xf1] sm:$0xff] %vm258_vm0, %v243_v37  ;;  %278 = vst.msk [vmem:[#allocation2 + $0xf9] sm:$0xff] %vm258_vm0, %v244_v38  ;;  %9970 = vmatprep.subr.bf16.mxu0 %v9969_v61  ;;  %v11293_v6 = vld [vmem:[#allocation2 + $0x48] sm:$0xff]  ;;  %v11303_v10 = vld [vmem:[#allocation2 + $0x50] sm:$0xff] }
  0x33   : > { %279 = vst.msk [vmem:[#allocation2 + $0x109] sm:$0xff] %vm258_vm0, %v245_v43  ;;  %280 = vst.msk [vmem:[#allocation2 + $0x111] sm:$0xff] %vm258_vm0, %v246_v44  ;;  %v11305_v11 = vld [vmem:[#allocation2 + $0x60] sm:$0xff]  ;;  %v11315_v15 = vld [vmem:[#allocation2 + $0x68] sm:$0xff] }
  0x34   : > { %281 = vst.msk [vmem:[#allocation2 + $0x121] sm:$0xff] %vm258_vm0, %v247_v46  ;;  %282 = vst.msk [vmem:[#allocation2 + $0x129] sm:$0xff] %vm258_vm0, %v248_v47  ;;  %8529 = vmatmul.mubr.f32.gmra.mrb[2].mxu0 %v11279_v0  ;;  %v11317_v16 = vld [vmem:[#allocation2 + $0x78] sm:$0xff]  ;;  %v11327_v20 = vld [vmem:[#allocation2 + $0x80] sm:$0xff] }
  0x35   : > { %283 = vst.msk [vmem:[#allocation2 + $0x139] sm:$0xff] %vm258_vm0, %v249_v48  ;;  %284 = vst.msk [vmem:[#allocation2 + $0x141] sm:$0xff] %vm258_vm0, %v250_v49  ;;  %8531 = vmatprep.mubr.f32.mxu0 %v11281_v1  ;;  %9972 = vmatpush3.bf16.msra.mxu0 %v9969_v61  ;;  %v11329_v21 = vld [vmem:[#allocation2 + $0x90] sm:$0xff]  ;;  %v11339_v25 = vld [vmem:[#allocation2 + $0x98] sm:$0xff] }
  0x36   : > { %285 = vst.msk [vmem:[#allocation2 + $0x151] sm:$0xff] %vm258_vm0, %v251_v50  ;;  %286 = vst.msk [vmem:[#allocation2 + $0x159] sm:$0xff] %vm258_vm0, %v252_v52  ;;  %9974 = vmatprep.subr.bf16.mxu0 %v9973_v2  ;;  %v11341_v26 = vld [vmem:[#allocation2 + $0xa8] sm:$0xff]  ;;  %v11351_v30 = vld [vmem:[#allocation2 + $0xb0] sm:$0xff] }
  0x37   : > { %287 = vst.msk [vmem:[#allocation2 + $0x169] sm:$0xff] %vm258_vm0, %v253_v55  ;;  %288 = vst.msk [vmem:[#allocation2 + $0x171] sm:$0xff] %vm258_vm0, %v254_v56  ;;  %v7367_v29 = vld [vmem:[%s13066_s1 + $0x108] sm:$0xff]  ;;  %v11353_v31 = vld [vmem:[#allocation2 + $0xc0] sm:$0xff] }
  0x38   : > { %8532 = vmatmul.mubr.f32.gmra.mrb[4].mxu0 %v11291_v5  ;;  %v9997_v32 = vpack.c.bf16 %v7367_v29, %v7366_v28  ;;  %v11357_v33 = vld [vmem:[#allocation2 + $0xc8] sm:$0xff]  ;;  %v11359_v34 = vld [vmem:[#allocation2 + $0xd8] sm:$0xff]  ;;  %v11363_v35 = vld [vmem:[#allocation2 + $0xe0] sm:$0xff] }
  0x39   : > { %8534 = vmatprep.mubr.f32.mxu0 %v11293_v6  ;;  %9976 = vmatpush3.bf16.msra.mxu0 %v9973_v2  ;;  %v11365_v36 = vld [vmem:[#allocation2 + $0xf0] sm:$0xff]  ;;  %v11369_v37 = vld [vmem:[#allocation2 + $0xf8] sm:$0xff]  ;;  %v692_v48 = vld [vmem:[#allocation2 + $0x1] sm:$0xff] }
  0x3a   : > { %9978 = vmatprep.subr.bf16.mxu0 %v9977_v7  ;;  %v11371_v38 = vld [vmem:[#allocation2 + $0x108] sm:$0xff]  ;;  %v11375_v39 = vld [vmem:[#allocation2 + $0x110] sm:$0xff]  ;;  %v7369_v50 = vld [vmem:[%s13066_s1 + $0x118] sm:$0xff] }
  0x3b   : > { %v11377_v40 = vld [vmem:[#allocation2 + $0x120] sm:$0xff]  ;;  %v11381_v41 = vld [vmem:[#allocation2 + $0x128] sm:$0xff]  ;;  %v7368_v49 = vld [vmem:[%s13066_s1 + $0x110] sm:$0xff] }
  0x3c   : > { %8535 = vmatmul.mubr.f32.gmra.mrb[6].mxu0 %v11303_v10  ;;  %v11383_v42 = vld [vmem:[#allocation2 + $0x138] sm:$0xff]  ;;  %v11387_v43 = vld [vmem:[#allocation2 + $0x140] sm:$0xff]  ;;  %v10001_v53 = vpack.c.bf16 %v7369_v50, %v7368_v49  ;;  %v7371_v55 = vld [vmem:[%s13066_s1 + $0x128] sm:$0xff] }
  0x3d   : > { %8537 = vmatprep.mubr.f32.mxu0 %v11305_v11  ;;  %9980 = vmatpush3.bf16.msra.mxu0 %v9977_v7  ;;  %v11389_v44 = vld [vmem:[#allocation2 + $0x150] sm:$0xff]  ;;  %v11393_v45 = vld [vmem:[#allocation2 + $0x158] sm:$0xff]  ;;  %v11417_v56 = vld [vmem:[#allocation2 + $0x21] sm:$0xff]  ;;  %v10005_v58 = vpack.c.bf16 %v7371_v55, %v7370_v54 }
  0x3e   : > { %9982 = vmatprep.subr.bf16.mxu0 %v9981_v12  ;;  %v11395_v46 = vld [vmem:[#allocation2 + $0x168] sm:$0xff]  ;;  %v11399_v47 = vld [vmem:[#allocation2 + $0x170] sm:$0xff]  ;;  %v11408_v52 = vld [vmem:[#allocation2 + $0x19] sm:$0xff] }
  0x3f   : > { %v11419_v57 = vld [vmem:[#allocation2 + $0x31] sm:$0xff]  ;;  %v11429_v62 = vld [vmem:[#allocation2 + $0x39] sm:$0xff]  ;;  %v11431_v63 = vld [vmem:[#allocation2 + $0x49] sm:$0xff] }
  0x40   : > { %8538 = vmatmul.mubr.f32.gmra.mrb[8].mxu0 %v11315_v15  ;;  %v7373_v61 = vld [vmem:[%s13066_s1 + $0x138] sm:$0xff]  ;;  %v11443_v8 = vld [vmem:[#allocation2 + $0x61] sm:$0xff]  ;;  %v11453_v14 = vld [vmem:[#allocation2 + $0x69] sm:$0xff] }
  0x41   : > { %8540 = vmatprep.mubr.f32.mxu0 %v11317_v16  ;;  %9984 = vmatpush3.bf16.msra.mxu0 %v9981_v12  ;;  %v10009_v2 = vpack.c.bf16 %v7373_v61, %v7372_v59  ;;  %v11441_v7 = vld [vmem:[#allocation2 + $0x51] sm:$0xff]  ;;  %v11465_v23 = vld [vmem:[#allocation2 + $0x81] sm:$0xff]  ;;  %v11497_v59 = vld [vmem:[#allocation2 + $0xd9] sm:$0xff] }
  0x42   : > { %9986 = vmatprep.subr.bf16.mxu0 %v9985_v17  ;;  %v7376_v12 = vld [vmem:[%s13066_s1 + $0x150] sm:$0xff]  ;;  %v7381_v29 = vld [vmem:[%s13066_s1 + $0x178] sm:$0xff]  ;;  %v7382_v50 = vld [vmem:[%s13066_s1 + $0x180] sm:$0xff] }
  0x43   : > { %v10017_v18 = vpack.c.bf16 %v7377_v13, %v7376_v12  ;;  %v11467_v24 = vld [vmem:[#allocation2 + $0x91] sm:$0xff]  ;;  %v11491_v54 = vld [vmem:[#allocation2 + $0xc1] sm:$0xff]  ;;  %v11507_v3 = vld [vmem:[#allocation2 + $0xf9] sm:$0xff] }
  0x44   : > { %8541 = vmatmul.mubr.f32.gmra.mrb[10].mxu0 %v11327_v20  ;;  %v7380_v28 = vld [vmem:[%s13066_s1 + $0x170] sm:$0xff]  ;;  %v11501_v61 = vld [vmem:[#allocation2 + $0xe1] sm:$0xff] }
  0x45   : > { %8543 = vmatprep.mubr.f32.mxu0 %v11329_v21  ;;  %9988 = vmatpush3.bf16.msra.mxu0 %v9985_v17  ;;  %v11455_v17 = vld [vmem:[#allocation2 + $0x79] sm:$0xff]  ;;  %v10025_v49 = vpack.c.bf16 %v7381_v29, %v7380_v28  ;;  %v11509_v4 = vld [vmem:[#allocation2 + $0x109] sm:$0xff]  ;;  %v11515_v12 = vld [vmem:[#allocation2 + $0x121] sm:$0xff] }
  0x46   : > { %9990 = vmatprep.subr.bf16.mxu0 %v9989_v22  ;;  %v11519_v13 = vld [vmem:[#allocation2 + $0x129] sm:$0xff]  ;;  %v256_v28 = vld [vmem:[%s11171_s7 + $0xf8] sm:$0xff] }
  0x47   : > { %13140 = vst [vmem:[#allocation4_spill] sm:$0xff] %v11519_v13  ;;  %290 = vst.msk [vmem:[#allocation2 + $0x189] sm:$0xff] %vm258_vm0, %v256_v28  ;;  %v11535_v29 = vld [vmem:[#allocation2 + $0x159] sm:$0xff] }
  0x48   : > { %8544 = vmatmul.mubr.f32.gmra.mrb[12].mxu0 %v11339_v25  ;;  %13144 = vst [vmem:[#allocation8_spill] sm:$0xff] %v11535_v29  ;;  %v7385_v28 = vld [vmem:[%s13066_s1 + $0x198] sm:$0xff] }
  0x49   : > { %8546 = vmatprep.mubr.f32.mxu0 %v11341_v26  ;;  %9992 = vmatpush3.bf16.msra.mxu0 %v9989_v22  ;;  %v7379_v22 = vld [vmem:[%s13066_s1 + $0x168] sm:$0xff] }
  0x4a   : > { %9994 = vmatprep.subr.bf16.mxu0 %v9993_v27 }
  0x4c   : > { %8547 = vmatmul.mubr.f32.gmra.mrb[14].mxu0 %v11351_v30 }
  0x4d   : > { %8549 = vmatprep.mubr.f32.mxu0 %v11353_v31  ;;  %9996 = vmatpush3.bf16.msra.mxu0 %v9993_v27  ;;  %v10021_v27 = vpack.c.bf16 %v7379_v22, %v7378_v19  ;;  %v11525_v19 = vld [vmem:[#allocation2 + $0x141] sm:$0xff]  ;;  %v11527_v22 = vld [vmem:[#allocation2 + $0x151] sm:$0xff] }
  0x4e   : > { %9998 = vmatprep.subr.bf16.mxu0 %v9997_v32  ;;  %13142 = vst [vmem:[#allocation6_spill] sm:$0xff] %v11525_v19  ;;  %13143 = vst [vmem:[#allocation7_spill] sm:$0xff] %v11527_v22 }
  0x50   : > { %8550 = vmatmul.mubr.f32.gmra.mrb[16].mxu0 %v11357_v33 }
  0x51   : > { %8552 = vmatprep.mubr.f32.mxu0 %v11359_v34 }
  0x54   : > { %8553 = vmatmul.mubr.f32.gmra.mrb[18].mxu0 %v11363_v35 }
  0x55   : > { %8555 = vmatprep.mubr.f32.mxu0 %v11365_v36 }
  0x58   : > { %8556 = vmatmul.mubr.f32.gmra.mrb[20].mxu0 %v11369_v37 }
  0x59   : > { %8558 = vmatprep.mubr.f32.mxu0 %v11371_v38 }
  0x5c   : > { %8559 = vmatmul.mubr.f32.gmra.mrb[22].mxu0 %v11375_v39 }
  0x5d   : > { %8561 = vmatprep.mubr.f32.mxu0 %v11377_v40 }
  0x60   : > { %8562 = vmatmul.mubr.f32.gmra.mrb[24].mxu0 %v11381_v41 }
  0x61   : > { %8564 = vmatprep.mubr.f32.mxu0 %v11383_v42 }
  0x64   : > { %8565 = vmatmul.mubr.f32.gmra.mrb[26].mxu0 %v11387_v43 }
  0x65   : > { %8567 = vmatprep.mubr.f32.mxu0 %v11389_v44 }
  0x68   : > { %8568 = vmatmul.mubr.f32.gmra.mrb[28].mxu0 %v11393_v45 }
  0x69   : > { %8570 = vmatprep.mubr.f32.mxu0 %v11395_v46 }
  0x6c   : > { %8571 = vmatmul.mubr.f32.gmra.mrb[30].mxu0 %v11399_v47 }
  0x6d   : > { %8605 = vmatprep.mubr.f32.mxu0 %v692_v48  ;;  %v11479_v48 = vld [vmem:[#allocation2 + $0xa9] sm:$0xff] }
  0x70   : > { %8606 = vmatmul.mubr.f32.vlgmr.msra.gmra.mrb[0].mxu0 %v693_v51  ;;  %v7383_v51 = vld [vmem:[%s13066_s1 + $0x188] sm:$0xff] }
  0x71   : > { %10000 = vmatpush3.bf16.msra.mxu0 %v9997_v32  ;;  %8608 = vmatprep.mubr.f32.mxu0 %v11408_v52  ;;  %v11477_v32 = vld [vmem:[#allocation2 + $0x99] sm:$0xff]  ;;  %v10029_v55 = vpack.c.bf16 %v7383_v51, %v7382_v50  ;;  %v11541_v50 = vld [vmem:[#allocation2 + $0x171] sm:$0xff]  ;;  %v1062_v51 = vld [vmem:[#allocation2 + $0x2] sm:$0xff] }
  0x72   : > { %10002 = vmatprep.subr.bf16.mxu0 %v10001_v53  ;;  %13146 = vst [vmem:[#allocation10_spill] sm:$0xff] %v11541_v50 }
  0x74   : > { %8609 = vmatmul.mubr.f32.gmra.mrb[2].mxu0 %v11417_v56 }
  0x75   : > { %8611 = vmatprep.mubr.f32.mxu0 %v11419_v57  ;;  %10004 = vmatpush3.bf16.msra.mxu0 %v10001_v53  ;;  %v11489_v53 = vld [vmem:[#allocation2 + $0xb1] sm:$0xff] }
  0x76   : > { %10006 = vmatprep.subr.bf16.mxu0 %v10005_v58 }
  0x78   : > { %8612 = vmatmul.mubr.f32.gmra.mrb[4].mxu0 %v11429_v62 }
  0x79   : > { %8614 = vmatprep.mubr.f32.mxu0 %v11431_v63  ;;  %10008 = vmatpush3.bf16.msra.mxu0 %v10005_v58  ;;  %v11495_v58 = vld [vmem:[#allocation2 + $0xc9] sm:$0xff] }
  0x7a   : > { %10010 = vmatprep.subr.bf16.mxu0 %v10009_v2 }
  0x7c   : > { %8615 = vmatmul.mubr.f32.gmra.mrb[6].mxu0 %v11441_v7 }
  0x7d   : > { %8617 = vmatprep.mubr.f32.mxu0 %v11443_v8  ;;  %10012 = vmatpush3.bf16.msra.mxu0 %v10009_v2  ;;  %v11503_v2 = vld [vmem:[#allocation2 + $0xf1] sm:$0xff] }
  0x7e   : > { %10014 = vmatprep.subr.bf16.mxu0 %v10013_v9 }
  0x80   : > { %8618 = vmatmul.mubr.f32.gmra.mrb[8].mxu0 %v11453_v14 }
  0x81   : > { %8620 = vmatprep.mubr.f32.mxu0 %v11455_v17  ;;  %10016 = vmatpush3.bf16.msra.mxu0 %v10013_v9  ;;  %v11513_v9 = vld [vmem:[#allocation2 + $0x111] sm:$0xff] }
  0x82   : > { %10018 = vmatprep.subr.bf16.mxu0 %v10017_v18 }
  0x84   : > { %8621 = vmatmul.mubr.f32.gmra.mrb[10].mxu0 %v11465_v23 }
  0x85   : > { %8623 = vmatprep.mubr.f32.mxu0 %v11467_v24  ;;  %10020 = vmatpush3.bf16.msra.mxu0 %v10017_v18  ;;  %v11521_v18 = vld [vmem:[#allocation2 + $0x139] sm:$0xff] }
  0x86   : > { %10022 = vmatprep.subr.bf16.mxu0 %v10021_v27  ;;  %13141 = vst [vmem:[#allocation5_spill] sm:$0xff] %v11521_v18 }
  0x88   : > { %8624 = vmatmul.mubr.f32.gmra.mrb[12].mxu0 %v11477_v32 }
  0x89   : > { %8626 = vmatprep.mubr.f32.mxu0 %v11479_v48  ;;  %10024 = vmatpush3.bf16.msra.mxu0 %v10021_v27  ;;  %v255_v27 = vld [vmem:[%s11171_s7 + $0xf0] sm:$0xff]  ;;  %s12997_s7 = scalar_lea.vmem %s13068_s3, %s7627_s27 }
  0x8a   : > { %10026 = vmatprep.subr.bf16.mxu0 %v10025_v49  ;;  %289 = vst.msk [vmem:[#allocation2 + $0x181] sm:$0xff] %vm258_vm0, %v255_v27  ;;  %v7384_v27 = vld [vmem:[%s13066_s1 + $0x190] sm:$0xff] }
  0x8c   : > { %8627 = vmatmul.mubr.f32.gmra.mrb[14].mxu0 %v11489_v53 }
  0x8d   : > { %8629 = vmatprep.mubr.f32.mxu0 %v11491_v54  ;;  %10028 = vmatpush3.bf16.msra.mxu0 %v10025_v49  ;;  %v11537_v49 = vld [vmem:[#allocation2 + $0x169] sm:$0xff] }
  0x8e   : > { %10030 = vmatprep.subr.bf16.mxu0 %v10029_v55  ;;  %13145 = vst [vmem:[#allocation9_spill] sm:$0xff] %v11537_v49 }
  0x90   : > { %8630 = vmatmul.mubr.f32.gmra.mrb[16].mxu0 %v11495_v58 }
  0x91   : > { %8632 = vmatprep.mubr.f32.mxu0 %v11497_v59 }
  0x94   : > { %8633 = vmatmul.mubr.f32.gmra.mrb[18].mxu0 %v11501_v61 }
  0x95   : > { %8635 = vmatprep.mubr.f32.mxu0 %v11503_v2 }
  0x98   : > { %8636 = vmatmul.mubr.f32.gmra.mrb[20].mxu0 %v11507_v3 }
  0x99   : > { %8638 = vmatprep.mubr.f32.mxu0 %v11509_v4 }
  0x9c   : > { %8639 = vmatmul.mubr.f32.gmra.mrb[22].mxu0 %v11513_v9 }
  0x9d   : > { %8641 = vmatprep.mubr.f32.mxu0 %v11515_v12 }
  0xa0   : > { %8642 = vmatmul.mubr.f32.gmra.mrb[24].mxu0 %v11519_v13  ;;  %v11559_v13 = vld [vmem:[#allocation2 + $0x22] sm:$0xff] }
  0xa1   : > { %8644 = vmatprep.mubr.f32.mxu0 %v11521_v18  ;;  %v7387_v18 = vld [vmem:[%s13066_s1 + $0x1a8] sm:$0xff]  ;;  %13148 = vst [vmem:[#allocation12_spill] sm:$0xff] %v11559_v13 }
  0xa4   : > { %8645 = vmatmul.mubr.f32.gmra.mrb[26].mxu0 %v11525_v19  ;;  %v11550_v19 = vld [vmem:[#allocation2 + $0x1a] sm:$0xff] }
  0xa5   : > { %8647 = vmatprep.mubr.f32.mxu0 %v11527_v22  ;;  %v1063_v22 = vld [vmem:[#allocation2 + $0xa] sm:$0xff]  ;;  %13147 = vst [vmem:[#allocation11_spill] sm:$0xff] %v11550_v19 }
  0xa8   : > { %8648 = vmatmul.mubr.f32.gmra.mrb[28].mxu0 %v11535_v29  ;;  %v10033_v29 = vpack.c.bf16 %v7385_v28, %v7384_v27  ;;  %v7388_v27 = vld [vmem:[%s13066_s1 + $0x1b0] sm:$0xff]  ;;  %v7389_v28 = vld [vmem:[%s13066_s1 + $0x1b8] sm:$0xff] }
  0xa9   : > { %8650 = vmatprep.mubr.f32.mxu0 %v11537_v49  ;;  %v7386_v49 = vld [vmem:[%s13066_s1 + $0x1a0] sm:$0xff] }
  0xac   : > { %8651 = vmatmul.mubr.f32.gmra.mrb[30].mxu0 %v11541_v50  ;;  %v11561_v50 = vld [vmem:[#allocation2 + $0x32] sm:$0xff] }
  0xad   : > { %8685 = vmatprep.mubr.f32.mxu0 %v1062_v51  ;;  %13149 = vst [vmem:[#allocation13_spill] sm:$0xff] %v11561_v50  ;;  %v10037_v51 = vpack.c.bf16 %v7387_v18, %v7386_v49  ;;  %v7390_v18 = vld [vmem:[%s13066_s1 + $0x1c0] sm:$0xff]  ;;  %v7391_v49 = vld [vmem:[%s13066_s1 + $0x1c8] sm:$0xff] }
  0xb0   : > { %8686 = vmatmul.mubr.f32.vlgmr.msra.gmra.mrb[0].mxu0 %v1063_v22  ;;  %v11573_v22 = vld [vmem:[#allocation2 + $0x4a] sm:$0xff] }
  0xb1   : > { %10032 = vmatpush3.bf16.msra.mxu0 %v10029_v55  ;;  %8688 = vmatprep.mubr.f32.mxu0 %v11550_v19  ;;  %v11571_v55 = vld [vmem:[#allocation2 + $0x3a] sm:$0xff]  ;;  %13151 = vst [vmem:[#allocation15_spill] sm:$0xff] %v11573_v22  ;;  %v10041_v19 = vpack.c.bf16 %v7389_v28, %v7388_v27  ;;  %v7392_v27 = vld [vmem:[%s13066_s1 + $0x1d0] sm:$0xff] }
  0xb2   : > { %10034 = vmatprep.subr.bf16.mxu0 %v10033_v29  ;;  %13150 = vst [vmem:[#allocation14_spill] sm:$0xff] %v11571_v55  ;;  %v7393_v28 = vld [vmem:[%s13066_s1 + $0x1d8] sm:$0xff] }
  0xb4   : > { %8689 = vmatmul.mubr.f32.gmra.mrb[2].mxu0 %v11559_v13  ;;  %v10045_v13 = vpack.c.bf16 %v7391_v49, %v7390_v18  ;;  %v7394_v18 = vld [vmem:[%s13066_s1 + $0x1e0] sm:$0xff]  ;;  %v7395_v49 = vld [vmem:[%s13066_s1 + $0x1e8] sm:$0xff] }
  0xb5   : > { %8691 = vmatprep.mubr.f32.mxu0 %v11561_v50  ;;  %10036 = vmatpush3.bf16.msra.mxu0 %v10033_v29  ;;  %v11583_v50 = vld [vmem:[#allocation2 + $0x52] sm:$0xff]  ;;  %v11585_v29 = vld [vmem:[#allocation2 + $0x62] sm:$0xff] }
  0xb6   : > { %10038 = vmatprep.subr.bf16.mxu0 %v10037_v51  ;;  %13152 = vst [vmem:[#allocation16_spill] sm:$0xff] %v11583_v50  ;;  %13153 = vst [vmem:[#allocation17_spill] sm:$0xff] %v11585_v29 }
  0xb8   : > { %8692 = vmatmul.mubr.f32.gmra.mrb[4].mxu0 %v11571_v55  ;;  %v10049_v55 = vpack.c.bf16 %v7393_v28, %v7392_v27  ;;  %v7396_v27 = vld [vmem:[%s13066_s1 + $0x1f0] sm:$0xff]  ;;  %v7397_v28 = vld [vmem:[%s13066_s1 + $0x1f8] sm:$0xff] }
  0xb9   : > { %8694 = vmatprep.mubr.f32.mxu0 %v11573_v22  ;;  %10040 = vmatpush3.bf16.msra.mxu0 %v10037_v51  ;;  %v11595_v22 = vld [vmem:[#allocation2 + $0x6a] sm:$0xff]  ;;  %v11597_v51 = vld [vmem:[#allocation2 + $0x7a] sm:$0xff] }
  0xba   : > { %10042 = vmatprep.subr.bf16.mxu0 %v10041_v19  ;;  %13154 = vst [vmem:[#allocation18_spill] sm:$0xff] %v11595_v22  ;;  %13155 = vst [vmem:[#allocation19_spill] sm:$0xff] %v11597_v51 }
  0xbc   : > { %8695 = vmatmul.mubr.f32.gmra.mrb[6].mxu0 %v11583_v50  ;;  %v10053_v50 = vpack.c.bf16 %v7395_v49, %v7394_v18  ;;  %v7398_v18 = vld [vmem:[%s13066_s1 + $0x200] sm:$0xff]  ;;  %v7399_v49 = vld [vmem:[%s13066_s1 + $0x208] sm:$0xff] }
  0xbd   : > { %8697 = vmatprep.mubr.f32.mxu0 %v11585_v29  ;;  %10044 = vmatpush3.bf16.msra.mxu0 %v10041_v19  ;;  %v11607_v29 = vld [vmem:[#allocation2 + $0x82] sm:$0xff]  ;;  %v11609_v19 = vld [vmem:[#allocation2 + $0x92] sm:$0xff] }
  0xbe   : > { %10046 = vmatprep.subr.bf16.mxu0 %v10045_v13  ;;  %13156 = vst [vmem:[#allocation20_spill] sm:$0xff] %v11607_v29  ;;  %13157 = vst [vmem:[#allocation21_spill] sm:$0xff] %v11609_v19 }
  0xc0   : > { %8698 = vmatmul.mubr.f32.gmra.mrb[8].mxu0 %v11595_v22  ;;  %v10057_v22 = vpack.c.bf16 %v7397_v28, %v7396_v27  ;;  %v11637_v27 = vld [vmem:[#allocation2 + $0xca] sm:$0xff]  ;;  %v11639_v28 = vld [vmem:[#allocation2 + $0xda] sm:$0xff] }
  0xc1   : > { %8700 = vmatprep.mubr.f32.mxu0 %v11597_v51  ;;  %10048 = vmatpush3.bf16.msra.mxu0 %v10045_v13  ;;  %v11619_v51 = vld [vmem:[#allocation2 + $0x9a] sm:$0xff]  ;;  %v11621_v13 = vld [vmem:[#allocation2 + $0xaa] sm:$0xff]  ;;  %13159 = vst [vmem:[#allocation23_spill] sm:$0xff] %v11637_v27  ;;  %13160 = vst [vmem:[#allocation24_spill] sm:$0xff] %v11639_v28 }
  0xc2   : > { %10050 = vmatprep.subr.bf16.mxu0 %v10049_v55  ;;  %13158 = vst [vmem:[#allocation22_spill] sm:$0xff] %v11621_v13 }
  0xc4   : > { %8701 = vmatmul.mubr.f32.gmra.mrb[10].mxu0 %v11607_v29  ;;  %v10061_v29 = vpack.c.bf16 %v7399_v49, %v7398_v18  ;;  %v11649_v18 = vld [vmem:[#allocation2 + $0xfa] sm:$0xff]  ;;  %v11651_v49 = vld [vmem:[#allocation2 + $0x10a] sm:$0xff] }
  0xc5   : > { %8703 = vmatprep.mubr.f32.mxu0 %v11609_v19  ;;  %10052 = vmatpush3.bf16.msra.mxu0 %v10049_v55  ;;  %v11631_v19 = vld [vmem:[#allocation2 + $0xb2] sm:$0xff]  ;;  %v11633_v55 = vld [vmem:[#allocation2 + $0xc2] sm:$0xff]  ;;  %13163 = vst [vmem:[#allocation27_spill] sm:$0xff] %v11649_v18  ;;  %13164 = vst [vmem:[#allocation28_spill] sm:$0xff] %v11651_v49 }
  0xc6   : > { %10054 = vmatprep.subr.bf16.mxu0 %v10053_v50 }
  0xc8   : > { %8704 = vmatmul.mubr.f32.gmra.mrb[12].mxu0 %v11619_v51 }
  0xc9   : > { %8706 = vmatprep.mubr.f32.mxu0 %v11621_v13  ;;  %10056 = vmatpush3.bf16.msra.mxu0 %v10053_v50  ;;  %v11643_v13 = vld [vmem:[#allocation2 + $0xe2] sm:$0xff]  ;;  %v11645_v50 = vld [vmem:[#allocation2 + $0xf2] sm:$0xff] }
  0xca   : > { %10058 = vmatprep.subr.bf16.mxu0 %v10057_v22  ;;  %13161 = vst [vmem:[#allocation25_spill] sm:$0xff] %v11643_v13  ;;  %13162 = vst [vmem:[#allocation26_spill] sm:$0xff] %v11645_v50 }
  0xcc   : > { %8707 = vmatmul.mubr.f32.gmra.mrb[14].mxu0 %v11631_v19 }
  0xcd   : > { %8709 = vmatprep.mubr.f32.mxu0 %v11633_v55  ;;  %10060 = vmatpush3.bf16.msra.mxu0 %v10057_v22  ;;  %v11655_v22 = vld [vmem:[#allocation2 + $0x112] sm:$0xff] }
  0xce   : > { %10062 = vmatprep.subr.bf16.mxu0 %v10061_v29  ;;  %13165 = vst [vmem:[#allocation29_spill] sm:$0xff] %v11655_v22 }
  0xd0   : > { %8710 = vmatmul.mubr.f32.gmra.mrb[16].mxu0 %v11637_v27  ;;  %v11657_v27 = vld [vmem:[#allocation2 + $0x122] sm:$0xff] }
  0xd1   : > { %8712 = vmatprep.mubr.f32.mxu0 %v11639_v28  ;;  %13166 = vst [vmem:[#allocation30_spill] sm:$0xff] %v11657_v27  ;;  %v11661_v28 = vld [vmem:[#allocation2 + $0x12a] sm:$0xff] }
  0xd2   : > { %13167 = vst [vmem:[#allocation31_spill] sm:$0xff] %v11661_v28 }
  0xd4   : > { %8713 = vmatmul.mubr.f32.gmra.mrb[18].mxu0 %v11643_v13  ;;  %v11663_v13 = vld [vmem:[#allocation2 + $0x13a] sm:$0xff] }
  0xd5   : > { %8715 = vmatprep.mubr.f32.mxu0 %v11645_v50  ;;  %13168 = vst [vmem:[#allocation32_spill] sm:$0xff] %v11663_v13  ;;  %v11667_v50 = vld [vmem:[#allocation2 + $0x142] sm:$0xff] }
  0xd6   : > { %13169 = vst [vmem:[#allocation33_spill] sm:$0xff] %v11667_v50 }
  0xd8   : > { %8716 = vmatmul.mubr.f32.gmra.mrb[20].mxu0 %v11649_v18  ;;  %v11669_v18 = vld [vmem:[#allocation2 + $0x152] sm:$0xff] }
  0xd9   : > { %8718 = vmatprep.mubr.f32.mxu0 %v11651_v49  ;;  %13170 = vst [vmem:[#allocation34_spill] sm:$0xff] %v11669_v18  ;;  %v11673_v49 = vld [vmem:[#allocation2 + $0x15a] sm:$0xff] }
  0xda   : > { %13171 = vst [vmem:[#allocation35_spill] sm:$0xff] %v11673_v49 }
  0xdc   : > { %8719 = vmatmul.mubr.f32.gmra.mrb[22].mxu0 %v11655_v22  ;;  %v11675_v22 = vld [vmem:[#allocation2 + $0x16a] sm:$0xff] }
  0xdd   : > { %8721 = vmatprep.mubr.f32.mxu0 %v11657_v27  ;;  %13172 = vst [vmem:[#allocation36_spill] sm:$0xff] %v11675_v22  ;;  %v11679_v27 = vld [vmem:[#allocation2 + $0x172] sm:$0xff] }
  0xe0   : > { %8722 = vmatmul.mubr.f32.gmra.mrb[24].mxu0 %v11661_v28 }
  0xe1   : > { %8724 = vmatprep.mubr.f32.mxu0 %v11663_v13  ;;  %v7400_v13 = vld [vmem:[%s13066_s1 + $0x210] sm:$0xff] }
  0xe4   : > { %8725 = vmatmul.mubr.f32.gmra.mrb[26].mxu0 %v11667_v50  ;;  %v7401_v50 = vld [vmem:[%s13066_s1 + $0x218] sm:$0xff] }
  0xe5   : > { %8727 = vmatprep.mubr.f32.mxu0 %v11669_v18  ;;  %v10065_v18 = vpack.c.bf16 %v7401_v50, %v7400_v13  ;;  %v7405_v13 = vld [vmem:[%s13066_s1 + $0x238] sm:$0xff] }
  0xe6   : > { %v7409_v50 = vld [vmem:[%s13066_s1 + $0x258] sm:$0xff] }
  0xe8   : > { %8728 = vmatmul.mubr.f32.gmra.mrb[28].mxu0 %v11673_v49  ;;  %v7402_v49 = vld [vmem:[%s13066_s1 + $0x220] sm:$0xff] }
  0xe9   : > { %8730 = vmatprep.mubr.f32.mxu0 %v11675_v22  ;;  %v7403_v22 = vld [vmem:[%s13066_s1 + $0x228] sm:$0xff] }
  0xea   : > { %v10069_v28 = vpack.c.bf16 %v7403_v22, %v7402_v49  ;;  %v7415_v49 = vld [vmem:[%s13066_s1 + $0x288] sm:$0xff]  ;;  %v13181_v22 = vld [vmem:[#allocation12_spill] sm:$0xff] }
  0xec   : > { %8731 = vmatmul.mubr.f32.gmra.mrb[30].mxu0 %v11679_v27 }
  0xed   : > { %8765 = vmatprep.mubr.f32.mxu0 %v11269_v60  ;;  %v7404_v60 = vld [vmem:[%s13066_s1 + $0x230] sm:$0xff] }
  0xf0   : > { %8766 = vmatmul.mubr.f32.vlgmr.msra.gmra.mrb[0].mxu0 %v11279_v0  ;;  %v10073_v0 = vpack.c.bf16 %v7405_v13, %v7404_v60  ;;  %v13182_v60 = vld [vmem:[#allocation13_spill] sm:$0xff] }
  0xf1   : > { %10064 = vmatpush3.bf16.msra.mxu0 %v10061_v29  ;;  %8768 = vmatprep.mubr.f32.mxu0 %v11281_v1  ;;  %v7406_v1 = vld [vmem:[%s13066_s1 + $0x240] sm:$0xff]  ;;  %v7407_v29 = vld [vmem:[%s13066_s1 + $0x248] sm:$0xff] }
  0xf2   : > { %10066 = vmatprep.subr.bf16.mxu0 %v10065_v18 }
  0xf4   : > { %8769 = vmatmul.mubr.f32.gmra.mrb[2].mxu0 %v11291_v5  ;;  %v10077_v5 = vpack.c.bf16 %v7407_v29, %v7406_v1  ;;  %v7437_v1 = vld [vmem:[%s13066_s1 + $0x338] sm:$0xff]  ;;  %v13183_v29 = vld [vmem:[#allocation14_spill] sm:$0xff] }
  0xf5   : > { %8771 = vmatprep.mubr.f32.mxu0 %v11293_v6  ;;  %10068 = vmatpush3.bf16.msra.mxu0 %v10065_v18  ;;  %v7408_v6 = vld [vmem:[%s13066_s1 + $0x250] sm:$0xff]  ;;  %v7413_v18 = vld [vmem:[%s13066_s1 + $0x278] sm:$0xff] }
  0xf6   : > { %10070 = vmatprep.subr.bf16.mxu0 %v10069_v28 }
  0xf8   : > { %8772 = vmatmul.mubr.f32.gmra.mrb[4].mxu0 %v11303_v10  ;;  %v10081_v10 = vpack.c.bf16 %v7409_v50, %v7408_v6  ;;  %v7438_v50 = vld [vmem:[%s13066_s1 + $0x340] sm:$0xff] }
  0xf9   : > { %8774 = vmatprep.mubr.f32.mxu0 %v11305_v11  ;;  %10072 = vmatpush3.bf16.msra.mxu0 %v10069_v28  ;;  %v7410_v11 = vld [vmem:[%s13066_s1 + $0x260] sm:$0xff]  ;;  %v7411_v28 = vld [vmem:[%s13066_s1 + $0x268] sm:$0xff] }
  0xfa   : > { %10074 = vmatprep.subr.bf16.mxu0 %v10073_v0 }
  0xfc   : > { %8775 = vmatmul.mubr.f32.gmra.mrb[6].mxu0 %v11315_v15  ;;  %v10085_v15 = vpack.c.bf16 %v7411_v28, %v7410_v11  ;;  %v13185_v11 = vld [vmem:[#allocation16_spill] sm:$0xff]  ;;  %v13186_v28 = vld [vmem:[#allocation17_spill] sm:$0xff] }
  0xfd   : > { %8777 = vmatprep.mubr.f32.mxu0 %v11317_v16  ;;  %10076 = vmatpush3.bf16.msra.mxu0 %v10073_v0  ;;  %v7412_v16 = vld [vmem:[%s13066_s1 + $0x270] sm:$0xff] }
  0xfe   : > { %10078 = vmatprep.subr.bf16.mxu0 %v10077_v5  ;;  %v7436_v0 = vld [vmem:[%s13066_s1 + $0x330] sm:$0xff] }
  0xff   : > { %v10137_v6 = vpack.c.bf16 %v7437_v1, %v7436_v0  ;;  %v7455_v0 = vld [vmem:[%s13066_s1 + $0x3c8] sm:$0xff]  ;;  %v2550_v1 = vld [vmem:[#allocation2 + $0x80] sm:$0xff] }
 0x100   : > { %8778 = vmatmul.mubr.f32.gmra.mrb[8].mxu0 %v11327_v20  ;;  %v10089_v20 = vpack.c.bf16 %v7413_v18, %v7412_v16  ;;  %v7440_v16 = vld [vmem:[%s13066_s1 + $0x350] sm:$0xff]  ;;  %v7441_v18 = vld [vmem:[%s13066_s1 + $0x358] sm:$0xff] }
 0x101   : > { %8780 = vmatprep.mubr.f32.mxu0 %v11329_v21  ;;  %10080 = vmatpush3.bf16.msra.mxu0 %v10077_v5  ;;  %v7414_v21 = vld [vmem:[%s13066_s1 + $0x280] sm:$0xff]  ;;  %v13184_v5 = vld [vmem:[#allocation15_spill] sm:$0xff] }
 0x102   : > { %10082 = vmatprep.subr.bf16.mxu0 %v10081_v10 }
 0x104   : > { %8781 = vmatmul.mubr.f32.gmra.mrb[10].mxu0 %v11339_v25  ;;  %v10093_v25 = vpack.c.bf16 %v7415_v49, %v7414_v21  ;;  %v13188_v21 = vld [vmem:[#allocation19_spill] sm:$0xff]  ;;  %v10145_v49 = vpack.c.bf16 %v7441_v18, %v7440_v16  ;;  %v2554_v18 = vld [vmem:[#allocation2 + $0xb0] sm:$0xff] }
 0x105   : > { %8783 = vmatprep.mubr.f32.mxu0 %v11341_v26  ;;  %10084 = vmatpush3.bf16.msra.mxu0 %v10081_v10  ;;  %v11759_v26 = vld [vmem:[#allocation2 + $0x180] sm:$0xff]  ;;  %v7439_v10 = vld [vmem:[%s13066_s1 + $0x348] sm:$0xff] }
 0x106   : > { %10086 = vmatprep.subr.bf16.mxu0 %v10085_v15  ;;  %v7459_v16 = vld [vmem:[%s13066_s1 + $0x3e8] sm:$0xff] }
 0x108   : > { %8784 = vmatmul.mubr.f32.gmra.mrb[12].mxu0 %v11351_v30  ;;  %v11763_v30 = vld [vmem:[#allocation2 + $0x188] sm:$0xff] }
 0x109   : > { %8786 = vmatprep.mubr.f32.mxu0 %v11353_v31  ;;  %10088 = vmatpush3.bf16.msra.mxu0 %v10085_v15  ;;  %v7416_v31 = vld [vmem:[%s13066_s1 + $0x290] sm:$0xff]  ;;  %v10141_v15 = vpack.c.bf16 %v7439_v10, %v7438_v50  ;;  %v7457_v50 = vld [vmem:[%s13066_s1 + $0x3d8] sm:$0xff] }
 0x10a   : > { %10090 = vmatprep.subr.bf16.mxu0 %v10089_v20  ;;  %v2552_v10 = vld [vmem:[#allocation2 + $0x98] sm:$0xff] }
 0x10c   : > { %8787 = vmatmul.mubr.f32.gmra.mrb[14].mxu0 %v11357_v33  ;;  %v7417_v33 = vld [vmem:[%s13066_s1 + $0x298] sm:$0xff] }
 0x10d   : > { %8789 = vmatprep.mubr.f32.mxu0 %v11359_v34  ;;  %10092 = vmatpush3.bf16.msra.mxu0 %v10089_v20  ;;  %v10097_v34 = vpack.c.bf16 %v7417_v33, %v7416_v31  ;;  %v13187_v20 = vld [vmem:[#allocation18_spill] sm:$0xff]  ;;  %v7443_v31 = vld [vmem:[%s13066_s1 + $0x368] sm:$0xff]  ;;  %v13189_v33 = vld [vmem:[#allocation20_spill] sm:$0xff] }
 0x10e   : > { %10094 = vmatprep.subr.bf16.mxu0 %v10093_v25 }
 0x110   : > { %8790 = vmatmul.mubr.f32.gmra.mrb[16].mxu0 %v11363_v35  ;;  %v7418_v35 = vld [vmem:[%s13066_s1 + $0x2a0] sm:$0xff] }
 0x111   : > { %8792 = vmatprep.mubr.f32.mxu0 %v11365_v36  ;;  %v7419_v36 = vld [vmem:[%s13066_s1 + $0x2a8] sm:$0xff] }
 0x114   : > { %8793 = vmatmul.mubr.f32.gmra.mrb[18].mxu0 %v11369_v37  ;;  %v10101_v37 = vpack.c.bf16 %v7419_v36, %v7418_v35  ;;  %v7444_v36 = vld [vmem:[%s13066_s1 + $0x370] sm:$0xff] }
 0x115   : > { %8795 = vmatprep.mubr.f32.mxu0 %v11371_v38  ;;  %v7420_v38 = vld [vmem:[%s13066_s1 + $0x2b0] sm:$0xff] }
 0x118   : > { %8796 = vmatmul.mubr.f32.gmra.mrb[20].mxu0 %v11375_v39  ;;  %v7421_v39 = vld [vmem:[%s13066_s1 + $0x2b8] sm:$0xff] }
 0x119   : > { %8798 = vmatprep.mubr.f32.mxu0 %v11377_v40  ;;  %v10105_v40 = vpack.c.bf16 %v7421_v39, %v7420_v38  ;;  %v13191_v38 = vld [vmem:[#allocation22_spill] sm:$0xff] }
 0x11c   : > { %8799 = vmatmul.mubr.f32.gmra.mrb[22].mxu0 %v11381_v41  ;;  %v7422_v41 = vld [vmem:[%s13066_s1 + $0x2c0] sm:$0xff] }
 0x11d   : > { %8801 = vmatprep.mubr.f32.mxu0 %v11383_v42  ;;  %v7423_v42 = vld [vmem:[%s13066_s1 + $0x2c8] sm:$0xff] }
 0x120   : > { %8802 = vmatmul.mubr.f32.gmra.mrb[24].mxu0 %v11387_v43  ;;  %v10109_v43 = vpack.c.bf16 %v7423_v42, %v7422_v41  ;;  %v7447_v41 = vld [vmem:[%s13066_s1 + $0x388] sm:$0xff] }
 0x121   : > { %8804 = vmatprep.mubr.f32.mxu0 %v11389_v44  ;;  %v7424_v44 = vld [vmem:[%s13066_s1 + $0x2d0] sm:$0xff]  ;;  %v13192_v42 = vld [vmem:[#allocation23_spill] sm:$0xff] }
 0x124   : > { %8805 = vmatmul.mubr.f32.gmra.mrb[26].mxu0 %v11393_v45  ;;  %v7425_v45 = vld [vmem:[%s13066_s1 + $0x2d8] sm:$0xff] }
 0x125   : > { %8807 = vmatprep.mubr.f32.mxu0 %v11395_v46  ;;  %v10113_v46 = vpack.c.bf16 %v7425_v45, %v7424_v44  ;;  %v13194_v44 = vld [vmem:[#allocation25_spill] sm:$0xff]  ;;  %v13195_v45 = vld [vmem:[#allocation26_spill] sm:$0xff] }
 0x128   : > { %8808 = vmatmul.mubr.f32.gmra.mrb[28].mxu0 %v11399_v47  ;;  %v7426_v47 = vld [vmem:[%s13066_s1 + $0x2e0] sm:$0xff] }
 0x129   : > { %8810 = vmatprep.mubr.f32.mxu0 %v11759_v26 }
 0x12c   : > { %8811 = vmatmul.mubr.f32.gmra.mrb[30].mxu0 %v11763_v30 }
 0x12d   : > { %8845 = vmatprep.mubr.f32.mxu0 %v11408_v52  ;;  %v7427_v52 = vld [vmem:[%s13066_s1 + $0x2e8] sm:$0xff] }
 0x130   : > { %8846 = vmatmul.mubr.f32.vlgmr.msra.gmra.mrb[0].mxu0 %v11417_v56  ;;  %v10117_v56 = vpack.c.bf16 %v7427_v52, %v7426_v47  ;;  %v13197_v47 = vld [vmem:[#allocation28_spill] sm:$0xff]  ;;  %v13200_v52 = vld [vmem:[#allocation31_spill] sm:$0xff] }
 0x131   : > { %10096 = vmatpush3.bf16.msra.mxu0 %v10093_v25  ;;  %8848 = vmatprep.mubr.f32.mxu0 %v11419_v57  ;;  %v7428_v57 = vld [vmem:[%s13066_s1 + $0x2f0] sm:$0xff]  ;;  %v7442_v25 = vld [vmem:[%s13066_s1 + $0x360] sm:$0xff] }
 0x132   : > { %10098 = vmatprep.subr.bf16.mxu0 %v10097_v34  ;;  %v10149_v35 = vpack.c.bf16 %v7443_v31, %v7442_v25  ;;  %v7461_v25 = vld [vmem:[%s13066_s1 + $0x3f8] sm:$0xff]  ;;  %v2556_v31 = vld [vmem:[#allocation2 + $0xc8] sm:$0xff] }
 0x134   : > { %8849 = vmatmul.mubr.f32.gmra.mrb[2].mxu0 %v11429_v62  ;;  %v7429_v62 = vld [vmem:[%s13066_s1 + $0x2f8] sm:$0xff] }
 0x135   : > { %8851 = vmatprep.mubr.f32.mxu0 %v11431_v63  ;;  %10100 = vmatpush3.bf16.msra.mxu0 %v10097_v34  ;;  %v10121_v63 = vpack.c.bf16 %v7429_v62, %v7428_v57  ;;  %v13190_v34 = vld [vmem:[#allocation21_spill] sm:$0xff]  ;;  %v13203_v62 = vld [vmem:[#allocation34_spill] sm:$0xff] }
 0x136   : > { %10102 = vmatprep.subr.bf16.mxu0 %v10101_v37  ;;  %v13202_v57 = vld [vmem:[#allocation33_spill] sm:$0xff] }
 0x138   : > { %8852 = vmatmul.mubr.f32.gmra.mrb[4].mxu0 %v11441_v7  ;;  %v7430_v7 = vld [vmem:[%s13066_s1 + $0x300] sm:$0xff] }
 0x139   : > { %8854 = vmatprep.mubr.f32.mxu0 %v11443_v8  ;;  %10104 = vmatpush3.bf16.msra.mxu0 %v10101_v37  ;;  %v7431_v8 = vld [vmem:[%s13066_s1 + $0x308] sm:$0xff]  ;;  %v7445_v37 = vld [vmem:[%s13066_s1 + $0x378] sm:$0xff] }
 0x13a   : > { %10106 = vmatprep.subr.bf16.mxu0 %v10105_v40  ;;  %v10153_v39 = vpack.c.bf16 %v7445_v37, %v7444_v36  ;;  %v7463_v36 = vld [vmem:[%s13066_s1 + $0x408] sm:$0xff]  ;;  %v2558_v37 = vld [vmem:[#allocation2 + $0xe0] sm:$0xff] }
 0x13c   : > { %8855 = vmatmul.mubr.f32.gmra.mrb[6].mxu0 %v11453_v14  ;;  %v10125_v14 = vpack.c.bf16 %v7431_v8, %v7430_v7  ;;  %v13205_v7 = vld [vmem:[#allocation36_spill] sm:$0xff]  ;;  %v11927_v8 = vld [vmem:[#allocation2 + $0x182] sm:$0xff] }
 0x13d   : > { %8857 = vmatprep.mubr.f32.mxu0 %v11455_v17  ;;  %10108 = vmatpush3.bf16.msra.mxu0 %v10105_v40  ;;  %v13173_v17 = vld [vmem:[#allocation4_spill] sm:$0xff]  ;;  %v7446_v40 = vld [vmem:[%s13066_s1 + $0x380] sm:$0xff] }
 0x13e   : > { %10110 = vmatprep.subr.bf16.mxu0 %v10109_v43 }
 0x140   : > { %8858 = vmatmul.mubr.f32.gmra.mrb[8].mxu0 %v11465_v23  ;;  %v13174_v23 = vld [vmem:[#allocation5_spill] sm:$0xff] }
 0x141   : > { %8860 = vmatprep.mubr.f32.mxu0 %v11467_v24  ;;  %10112 = vmatpush3.bf16.msra.mxu0 %v10109_v43  ;;  %v13175_v24 = vld [vmem:[#allocation6_spill] sm:$0xff]  ;;  %v13193_v43 = vld [vmem:[#allocation24_spill] sm:$0xff] }
 0x142   : > { %10114 = vmatprep.subr.bf16.mxu0 %v10113_v46 }
 0x144   : > { %8861 = vmatmul.mubr.f32.gmra.mrb[10].mxu0 %v11477_v32  ;;  %v13176_v32 = vld [vmem:[#allocation7_spill] sm:$0xff] }
 0x145   : > { %8863 = vmatprep.mubr.f32.mxu0 %v11479_v48  ;;  %10116 = vmatpush3.bf16.msra.mxu0 %v10113_v46  ;;  %v13177_v48 = vld [vmem:[#allocation8_spill] sm:$0xff]  ;;  %v13196_v46 = vld [vmem:[#allocation27_spill] sm:$0xff] }
 0x146   : > { %10118 = vmatprep.subr.bf16.mxu0 %v10117_v56 }
 0x148   : > { %8864 = vmatmul.mubr.f32.gmra.mrb[12].mxu0 %v11489_v53  ;;  %v13178_v53 = vld [vmem:[#allocation9_spill] sm:$0xff] }
 0x149   : > { %8866 = vmatprep.mubr.f32.mxu0 %v11491_v54  ;;  %10120 = vmatpush3.bf16.msra.mxu0 %v10117_v56  ;;  %v11843_v54 = vld [vmem:[#allocation2 + $0x181] sm:$0xff]  ;;  %v13201_v56 = vld [vmem:[#allocation32_spill] sm:$0xff] }
 0x14a   : > { %10122 = vmatprep.subr.bf16.mxu0 %v10121_v63 }
 0x14c   : > { %8867 = vmatmul.mubr.f32.gmra.mrb[14].mxu0 %v11495_v58  ;;  %v13179_v58 = vld [vmem:[#allocation10_spill] sm:$0xff] }
 0x14d   : > { %8869 = vmatprep.mubr.f32.mxu0 %v11497_v59  ;;  %10124 = vmatpush3.bf16.msra.mxu0 %v10121_v63  ;;  %v11847_v59 = vld [vmem:[#allocation2 + $0x189] sm:$0xff] }
 0x14e   : > { %10126 = vmatprep.subr.bf16.mxu0 %v10125_v14  ;;  %v13204_v63 = vld [vmem:[#allocation35_spill] sm:$0xff] }
 0x150   : > { %8870 = vmatmul.mubr.f32.gmra.mrb[16].mxu0 %v11501_v61  ;;  %v7432_v61 = vld [vmem:[%s13066_s1 + $0x310] sm:$0xff] }
 0x151   : > { %8872 = vmatprep.mubr.f32.mxu0 %v11503_v2  ;;  %v7433_v2 = vld [vmem:[%s13066_s1 + $0x318] sm:$0xff] }
 0x154   : > { %8873 = vmatmul.mubr.f32.gmra.mrb[18].mxu0 %v11507_v3  ;;  %v13180_v3 = vld [vmem:[#allocation11_spill] sm:$0xff] }
 0x155   : > { %8875 = vmatprep.mubr.f32.mxu0 %v11509_v4  ;;  %v10129_v4 = vpack.c.bf16 %v7433_v2, %v7432_v61  ;;  %v2546_v61 = vld [vmem:[#allocation2 + $0x50] sm:$0xff]  ;;  %v2547_v2 = vld [vmem:[#allocation2 + $0x60] sm:$0xff] }
 0x158   : > { %8876 = vmatmul.mubr.f32.gmra.mrb[20].mxu0 %v11513_v9  ;;  %v7434_v9 = vld [vmem:[%s13066_s1 + $0x320] sm:$0xff] }
 0x159   : > { %8878 = vmatprep.mubr.f32.mxu0 %v11515_v12  ;;  %v7435_v12 = vld [vmem:[%s13066_s1 + $0x328] sm:$0xff] }
 0x15a   : > { %v10133_v13 = vpack.c.bf16 %v7435_v12, %v7434_v9  ;;  %v7453_v9 = vld [vmem:[%s13066_s1 + $0x3b8] sm:$0xff]  ;;  %v2548_v12 = vld [vmem:[#allocation2 + $0x68] sm:$0xff] }
 0x15c   : > { %8879 = vmatmul.mubr.f32.gmra.mrb[22].mxu0 %v13173_v17  ;;  %v2543_v17 = vld [vmem:[#allocation2 + $0x30] sm:$0xff] }
 0x15d   : > { %8881 = vmatprep.mubr.f32.mxu0 %v13174_v23  ;;  %v7448_v23 = vld [vmem:[%s13066_s1 + $0x390] sm:$0xff] }
 0x160   : > { %8882 = vmatmul.mubr.f32.gmra.mrb[24].mxu0 %v13175_v24  ;;  %v7449_v24 = vld [vmem:[%s13066_s1 + $0x398] sm:$0xff] }
 0x161   : > { %8884 = vmatprep.mubr.f32.mxu0 %v13176_v32  ;;  %v2544_v32 = vld [vmem:[#allocation2 + $0x38] sm:$0xff] }
 0x164   : > { %8885 = vmatmul.mubr.f32.gmra.mrb[26].mxu0 %v13177_v48  ;;  %v2545_v48 = vld [vmem:[#allocation2 + $0x48] sm:$0xff] }
 0x165   : > { %8887 = vmatprep.mubr.f32.mxu0 %v13178_v53  ;;  %v10161_v53 = vpack.c.bf16 %v7449_v24, %v7448_v23  ;;  %v7482_v23 = vld [vmem:[%s13066_s1 + $0x498] sm:$0xff]  ;;  %v2915_v24 = vld [vmem:[#allocation2 + $0x49] sm:$0xff] }
 0x168   : > { %8888 = vmatmul.mubr.f32.gmra.mrb[28].mxu0 %v13179_v58  ;;  %v7451_v58 = vld [vmem:[%s13066_s1 + $0x3a8] sm:$0xff] }
 0x169   : > { %8890 = vmatprep.mubr.f32.mxu0 %v11843_v54 }
 0x16c   : > { %8891 = vmatmul.mubr.f32.gmra.mrb[30].mxu0 %v11847_v59 }
 0x16d   : > { %8925 = vmatprep.mubr.f32.mxu0 %v13180_v3 }
 0x170   : > { %8926 = vmatmul.mubr.f32.vlgmr.msra.gmra.mrb[0].mxu0 %v13181_v22  ;;  %v2549_v22 = vld [vmem:[#allocation2 + $0x78] sm:$0xff] }
 0x171   : > { %10128 = vmatpush3.bf16.msra.mxu0 %v10125_v14  ;;  %8928 = vmatprep.mubr.f32.mxu0 %v13182_v60  ;;  %v11931_v14 = vld [vmem:[#allocation2 + $0x18a] sm:$0xff] }
 0x172   : > { %10130 = vmatprep.subr.bf16.mxu0 %v10129_v4 }
 0x174   : > { %8929 = vmatmul.mubr.f32.gmra.mrb[2].mxu0 %v13183_v29  ;;  %v2551_v29 = vld [vmem:[#allocation2 + $0x90] sm:$0xff] }
 0x175   : > { %8931 = vmatprep.mubr.f32.mxu0 %v13184_v5  ;;  %10132 = vmatpush3.bf16.msra.mxu0 %v10129_v4  ;;  %v7452_v4 = vld [vmem:[%s13066_s1 + $0x3b0] sm:$0xff] }
 0x176   : > { %10134 = vmatprep.subr.bf16.mxu0 %v10133_v13  ;;  %v10169_v60 = vpack.c.bf16 %v7453_v9, %v7452_v4  ;;  %v7468_v9 = vld [vmem:[%s13066_s1 + $0x430] sm:$0xff] }
 0x178   : > { %8932 = vmatmul.mubr.f32.gmra.mrb[4].mxu0 %v13185_v11  ;;  %v2553_v11 = vld [vmem:[#allocation2 + $0xa8] sm:$0xff] }
 0x179   : > { %8934 = vmatprep.mubr.f32.mxu0 %v13186_v28  ;;  %10136 = vmatpush3.bf16.msra.mxu0 %v10133_v13  ;;  %v7454_v13 = vld [vmem:[%s13066_s1 + $0x3c0] sm:$0xff] }
 0x17a   : > { %10138 = vmatprep.subr.bf16.mxu0 %v10137_v6  ;;  %v10173_v5 = vpack.c.bf16 %v7455_v0, %v7454_v13  ;;  %v7486_v13 = vld [vmem:[%s13066_s1 + $0x4b8] sm:$0xff]  ;;  %v2918_v0 = vld [vmem:[#allocation2 + $0x69] sm:$0xff] }
 0x17c   : > { %8935 = vmatmul.mubr.f32.gmra.mrb[6].mxu0 %v13187_v20  ;;  %v2555_v20 = vld [vmem:[#allocation2 + $0xc0] sm:$0xff] }
 0x17d   : > { %8937 = vmatprep.mubr.f32.mxu0 %v13188_v21  ;;  %10140 = vmatpush3.bf16.msra.mxu0 %v10137_v6  ;;  %v7456_v6 = vld [vmem:[%s13066_s1 + $0x3d0] sm:$0xff] }
 0x17e   : > { %10142 = vmatprep.subr.bf16.mxu0 %v10141_v15  ;;  %v10177_v28 = vpack.c.bf16 %v7457_v50, %v7456_v6  ;;  %v7471_v50 = vld [vmem:[%s13066_s1 + $0x448] sm:$0xff] }
 0x180   : > { %8938 = vmatmul.mubr.f32.gmra.mrb[8].mxu0 %v13189_v33  ;;  %v2557_v33 = vld [vmem:[#allocation2 + $0xd8] sm:$0xff] }
 0x181   : > { %8940 = vmatprep.mubr.f32.mxu0 %v13190_v34  ;;  %10144 = vmatpush3.bf16.msra.mxu0 %v10141_v15  ;;  %v7458_v15 = vld [vmem:[%s13066_s1 + $0x3e0] sm:$0xff] }
 0x182   : > { %10146 = vmatprep.subr.bf16.mxu0 %v10145_v49  ;;  %v10181_v21 = vpack.c.bf16 %v7459_v16, %v7458_v15  ;;  %v2921_v15 = vld [vmem:[#allocation2 + $0x91] sm:$0xff] }
 0x184   : > { %8941 = vmatmul.mubr.f32.gmra.mrb[10].mxu0 %v11619_v51  ;;  %v10157_v51 = vpack.c.bf16 %v7447_v41, %v7446_v40  ;;  %v2560_v40 = vld [vmem:[#allocation2 + $0xf8] sm:$0xff]  ;;  %v2561_v41 = vld [vmem:[#allocation2 + $0x108] sm:$0xff] }
 0x185   : > { %8943 = vmatprep.mubr.f32.mxu0 %v13191_v38  ;;  %10148 = vmatpush3.bf16.msra.mxu0 %v10145_v49  ;;  %v7460_v49 = vld [vmem:[%s13066_s1 + $0x3f0] sm:$0xff] }
 0x186   : > { %10150 = vmatprep.subr.bf16.mxu0 %v10149_v35  ;;  %v10185_v34 = vpack.c.bf16 %v7461_v25, %v7460_v49  ;;  %v2559_v38 = vld [vmem:[#allocation2 + $0xf0] sm:$0xff]  ;;  %v7490_v25 = vld [vmem:[%s13066_s1 + $0x4d8] sm:$0xff] }
 0x187   : > { %v7489_v49 = vld [vmem:[%s13066_s1 + $0x4d0] sm:$0xff] }
 0x188   : > { %8944 = vmatmul.mubr.f32.gmra.mrb[12].mxu0 %v11631_v19  ;;  %v13198_v19 = vld [vmem:[#allocation29_spill] sm:$0xff] }
 0x189   : > { %8946 = vmatprep.mubr.f32.mxu0 %v11633_v55  ;;  %10152 = vmatpush3.bf16.msra.mxu0 %v10149_v35  ;;  %v13199_v55 = vld [vmem:[#allocation30_spill] sm:$0xff] }
 0x18a   : > { %10154 = vmatprep.subr.bf16.mxu0 %v10153_v39  ;;  %v7462_v35 = vld [vmem:[%s13066_s1 + $0x400] sm:$0xff] }
 0x18c   : > { %8947 = vmatmul.mubr.f32.gmra.mrb[14].mxu0 %v13192_v42  ;;  %v2563_v42 = vld [vmem:[#allocation2 + $0x120] sm:$0xff] }
 0x18d   : > { %8949 = vmatprep.mubr.f32.mxu0 %v13193_v43  ;;  %10156 = vmatpush3.bf16.msra.mxu0 %v10153_v39  ;;  %v10189_v39 = vpack.c.bf16 %v7463_v36, %v7462_v35  ;;  %v2564_v43 = vld [vmem:[#allocation2 + $0x128] sm:$0xff]  ;;  %v10241_v35 = vpack.c.bf16 %v7490_v25, %v7489_v49  ;;  %v7474_v36 = vld [vmem:[%s13066_s1 + $0x460] sm:$0xff] }
 0x18e   : > { %10158 = vmatprep.subr.bf16.mxu0 %v10157_v51  ;;  %v7491_v49 = vld [vmem:[%s13066_s1 + $0x4e0] sm:$0xff]  ;;  %v7492_v25 = vld [vmem:[%s13066_s1 + $0x4e8] sm:$0xff] }
 0x190   : > { %8950 = vmatmul.mubr.f32.gmra.mrb[16].mxu0 %v13194_v44  ;;  %v2565_v44 = vld [vmem:[#allocation2 + $0x138] sm:$0xff] }
 0x191   : > { %8952 = vmatprep.mubr.f32.mxu0 %v13195_v45  ;;  %v2566_v45 = vld [vmem:[#allocation2 + $0x140] sm:$0xff] }
 0x194   : > { %8953 = vmatmul.mubr.f32.gmra.mrb[18].mxu0 %v13196_v46  ;;  %v2567_v46 = vld [vmem:[#allocation2 + $0x150] sm:$0xff] }
 0x195   : > { %8955 = vmatprep.mubr.f32.mxu0 %v13197_v47  ;;  %v2568_v47 = vld [vmem:[#allocation2 + $0x158] sm:$0xff] }
 0x198   : > { %8956 = vmatmul.mubr.f32.gmra.mrb[20].mxu0 %v13198_v19  ;;  %v2569_v19 = vld [vmem:[#allocation2 + $0x168] sm:$0xff] }
 0x199   : > { %8958 = vmatprep.mubr.f32.mxu0 %v13199_v55  ;;  %v2570_v55 = vld [vmem:[#allocation2 + $0x170] sm:$0xff] }
 0x19c   : > { %8959 = vmatmul.mubr.f32.gmra.mrb[22].mxu0 %v13200_v52  ;;  %v11984_v52 = vld [vmem:[#allocation2] sm:$0xff] }
 0x19d   : > { %8961 = vmatprep.mubr.f32.mxu0 %v13201_v56  ;;  %v2913_v56 = vld [vmem:[#allocation2 + $0x31] sm:$0xff] }
 0x1a0   : > { %8962 = vmatmul.mubr.f32.gmra.mrb[24].mxu0 %v13202_v57  ;;  %v7464_v57 = vld [vmem:[%s13066_s1 + $0x410] sm:$0xff] }
 0x1a1   : > { %8964 = vmatprep.mubr.f32.mxu0 %v13203_v62  ;;  %v7465_v62 = vld [vmem:[%s13066_s1 + $0x418] sm:$0xff] }
 0x1a4   : > { %8965 = vmatmul.mubr.f32.gmra.mrb[26].mxu0 %v13204_v63  ;;  %v7481_v63 = vld [vmem:[%s13066_s1 + $0x490] sm:$0xff] }
 0x1a5   : > { %8967 = vmatprep.mubr.f32.mxu0 %v13205_v7  ;;  %v2914_v7 = vld [vmem:[#allocation2 + $0x39] sm:$0xff] }
 0x1a8   : > { %8968 = vmatmul.mubr.f32.gmra.mrb[28].mxu0 %v11679_v27  ;;  %v7450_v27 = vld [vmem:[%s13066_s1 + $0x3a0] sm:$0xff] }
 0x1a9   : > { %8970 = vmatprep.mubr.f32.mxu0 %v11927_v8  ;;  %v10165_v3 = vpack.c.bf16 %v7451_v58, %v7450_v27  ;;  %v7467_v27 = vld [vmem:[%s13066_s1 + $0x428] sm:$0xff]  ;;  %v7483_v58 = vld [vmem:[%s13066_s1 + $0x4a0] sm:$0xff] }
 0x1ac   : > { %8971 = vmatmul.mubr.f32.gmra.mrb[30].mxu0 %v11931_v14 }
 0x1ad   : > { %9005 = vmatprep.mubr.f32.mxu0 %v2543_v17 }
 0x1b0   : > { %9006 = vmatmul.mubr.f32.vlgmr.msra.gmra.mrb[0].mxu0 %v2544_v32  ;;  %v10193_v32 = vpack.c.bf16 %v7465_v62, %v7464_v57  ;;  %v2934_v57 = vld [vmem:[#allocation2 + $0x129] sm:$0xff]  ;;  %v2935_v62 = vld [vmem:[#allocation2 + $0x139] sm:$0xff] }
 0x1b1   : > { %10160 = vmatpush3.bf16.msra.mxu0 %v10157_v51  ;;  %9008 = vmatprep.mubr.f32.mxu0 %v2545_v48  ;;  %v2562_v51 = vld [vmem:[#allocation2 + $0x110] sm:$0xff]  ;;  %v7466_v48 = vld [vmem:[%s13066_s1 + $0x420] sm:$0xff] }
 0x1b2   : > { %10162 = vmatprep.subr.bf16.mxu0 %v10161_v53  ;;  %v10197_v4 = vpack.c.bf16 %v7467_v27, %v7466_v48  ;;  %v3284_v48 = vld [vmem:[#allocation2 + $0x3a] sm:$0xff]  ;;  %v3286_v27 = vld [vmem:[#allocation2 + $0x52] sm:$0xff] }
 0x1b4   : > { %9009 = vmatmul.mubr.f32.gmra.mrb[2].mxu0 %v2546_v61  ;;  %v7484_v61 = vld [vmem:[%s13066_s1 + $0x4a8] sm:$0xff] }
 0x1b5   : > { %9011 = vmatprep.mubr.f32.mxu0 %v2547_v2  ;;  %10164 = vmatpush3.bf16.msra.mxu0 %v10161_v53  ;;  %v10225_v53 = vpack.c.bf16 %v7482_v23, %v7481_v63  ;;  %v2916_v2 = vld [vmem:[#allocation2 + $0x51] sm:$0xff]  ;;  %v2938_v63 = vld [vmem:[#allocation2 + $0x159] sm:$0xff] }
 0x1b6   : > { %10166 = vmatprep.subr.bf16.mxu0 %v10165_v3  ;;  %v2943_v23 = vld [vmem:[#allocation2 + $0x199] sm:$0xff] }
 0x1b8   : > { %9012 = vmatmul.mubr.f32.gmra.mrb[4].mxu0 %v2548_v12  ;;  %v10229_v12 = vpack.c.bf16 %v7484_v61, %v7483_v58  ;;  %v3287_v58 = vld [vmem:[#allocation2 + $0x62] sm:$0xff]  ;;  %v3288_v61 = vld [vmem:[#allocation2 + $0x6a] sm:$0xff] }
 0x1b9   : > { %9014 = vmatprep.mubr.f32.mxu0 %v2549_v22  ;;  %10168 = vmatpush3.bf16.msra.mxu0 %v10165_v3  ;;  %v2917_v3 = vld [vmem:[#allocation2 + $0x61] sm:$0xff]  ;;  %v7469_v22 = vld [vmem:[%s13066_s1 + $0x438] sm:$0xff] }
 0x1ba   : > { %10170 = vmatprep.subr.bf16.mxu0 %v10169_v60 }
 0x1bc   : > { %9015 = vmatmul.mubr.f32.gmra.mrb[6].mxu0 %v2550_v1  ;;  %v2919_v1 = vld [vmem:[#allocation2 + $0x79] sm:$0xff] }
 0x1bd   : > { %9017 = vmatprep.mubr.f32.mxu0 %v2551_v29  ;;  %10172 = vmatpush3.bf16.msra.mxu0 %v10169_v60  ;;  %v7485_v60 = vld [vmem:[%s13066_s1 + $0x4b0] sm:$0xff]  ;;  %v10201_v29 = vpack.c.bf16 %v7469_v22, %v7468_v9 }
 0x1be   : > { %10174 = vmatprep.subr.bf16.mxu0 %v10173_v5  ;;  %v10233_v6 = vpack.c.bf16 %v7486_v13, %v7485_v60  ;;  %v3294_v9 = vld [vmem:[#allocation2 + $0xb2] sm:$0xff]  ;;  %v3296_v22 = vld [vmem:[#allocation2 + $0xca] sm:$0xff]  ;;  %v3297_v60 = vld [vmem:[#allocation2 + $0xda] sm:$0xff] }
 0x1bf   : > { %v3298_v13 = vld [vmem:[#allocation2 + $0xe2] sm:$0xff] }
 0x1c0   : > { %9018 = vmatmul.mubr.f32.gmra.mrb[8].mxu0 %v2552_v10  ;;  %v7487_v10 = vld [vmem:[%s13066_s1 + $0x4c0] sm:$0xff] }
 0x1c1   : > { %9020 = vmatprep.mubr.f32.mxu0 %v2553_v11  ;;  %10176 = vmatpush3.bf16.msra.mxu0 %v10173_v5  ;;  %v7470_v5 = vld [vmem:[%s13066_s1 + $0x440] sm:$0xff]  ;;  %v7488_v11 = vld [vmem:[%s13066_s1 + $0x4c8] sm:$0xff] }
 0x1c2   : > { %10178 = vmatprep.subr.bf16.mxu0 %v10177_v28  ;;  %v10205_v16 = vpack.c.bf16 %v7471_v50, %v7470_v5  ;;  %v3302_v5 = vld [vmem:[#allocation2 + $0x112] sm:$0xff]  ;;  %v3304_v50 = vld [vmem:[#allocation2 + $0x12a] sm:$0xff] }
 0x1c4   : > { %9021 = vmatmul.mubr.f32.gmra.mrb[10].mxu0 %v2554_v18  ;;  %v7472_v18 = vld [vmem:[%s13066_s1 + $0x450] sm:$0xff] }
 0x1c5   : > { %9023 = vmatprep.mubr.f32.mxu0 %v2555_v20  ;;  %10180 = vmatpush3.bf16.msra.mxu0 %v10177_v28  ;;  %v2920_v28 = vld [vmem:[#allocation2 + $0x81] sm:$0xff]  ;;  %v10237_v20 = vpack.c.bf16 %v7488_v11, %v7487_v10 }
 0x1c6   : > { %10182 = vmatprep.subr.bf16.mxu0 %v10181_v21  ;;  %v3305_v10 = vld [vmem:[#allocation2 + $0x13a] sm:$0xff]  ;;  %v3306_v11 = vld [vmem:[#allocation2 + $0x142] sm:$0xff] }
 0x1c8   : > { %9024 = vmatmul.mubr.f32.gmra.mrb[12].mxu0 %v2556_v31  ;;  %v2922_v31 = vld [vmem:[#allocation2 + $0x99] sm:$0xff] }
 0x1c9   : > { %9026 = vmatprep.mubr.f32.mxu0 %v2557_v33  ;;  %10184 = vmatpush3.bf16.msra.mxu0 %v10181_v21  ;;  %v7473_v21 = vld [vmem:[%s13066_s1 + $0x458] sm:$0xff]  ;;  %v2923_v33 = vld [vmem:[#allocation2 + $0xa9] sm:$0xff] }
 0x1ca   : > { %10186 = vmatprep.subr.bf16.mxu0 %v10185_v34 }
 0x1cc   : > { %9027 = vmatmul.mubr.f32.gmra.mrb[14].mxu0 %v2558_v37  ;;  %v7475_v37 = vld [vmem:[%s13066_s1 + $0x468] sm:$0xff] }
 0x1cd   : > { %9029 = vmatprep.mubr.f32.mxu0 %v2559_v38  ;;  %10188 = vmatpush3.bf16.msra.mxu0 %v10185_v34  ;;  %v10209_v34 = vpack.c.bf16 %v7473_v21, %v7472_v18  ;;  %v2924_v38 = vld [vmem:[#allocation2 + $0xb1] sm:$0xff]  ;;  %v3314_v21 = vld [vmem:[#allocation2 + $0x1a2] sm:$0xff] }
 0x1ce   : > { %10190 = vmatprep.subr.bf16.mxu0 %v10189_v39  ;;  %v3310_v18 = vld [vmem:[#allocation2 + $0x172] sm:$0xff] }
 0x1d0   : > { %9030 = vmatmul.mubr.f32.gmra.mrb[16].mxu0 %v2560_v40  ;;  %v10213_v40 = vpack.c.bf16 %v7475_v37, %v7474_v36  ;;  %v7497_v37 = vld [vmem:[%s13066_s1 + $0x510] sm:$0xff] }
 0x1d1   : > { %9032 = vmatprep.mubr.f32.mxu0 %v2561_v41  ;;  %v7476_v41 = vld [vmem:[%s13066_s1 + $0x470] sm:$0xff] }
 0x1d4   : > { %9033 = vmatmul.mubr.f32.gmra.mrb[18].mxu0 %v2562_v51  ;;  %v7477_v51 = vld [vmem:[%s13066_s1 + $0x478] sm:$0xff] }
 0x1d5   : > { %9035 = vmatprep.mubr.f32.mxu0 %v2563_v42  ;;  %v2926_v42 = vld [vmem:[#allocation2 + $0xc9] sm:$0xff] }
 0x1d8   : > { %9036 = vmatmul.mubr.f32.gmra.mrb[20].mxu0 %v2564_v43  ;;  %v2927_v43 = vld [vmem:[#allocation2 + $0xd9] sm:$0xff] }
 0x1d9   : > { %9038 = vmatprep.mubr.f32.mxu0 %v2565_v44  ;;  %v10217_v44 = vpack.c.bf16 %v7477_v51, %v7476_v41  ;;  %v7501_v51 = vld [vmem:[%s13066_s1 + $0x530] sm:$0xff] }
 0x1dc   : > { %9039 = vmatmul.mubr.f32.gmra.mrb[22].mxu0 %v2566_v45  ;;  %v2928_v45 = vld [vmem:[#allocation2 + $0xe1] sm:$0xff] }
 0x1dd   : > { %9041 = vmatprep.mubr.f32.mxu0 %v2567_v46  ;;  %v2929_v46 = vld [vmem:[#allocation2 + $0xf1] sm:$0xff] }
 0x1e0   : > { %9042 = vmatmul.mubr.f32.gmra.mrb[24].mxu0 %v2568_v47  ;;  %v2930_v47 = vld [vmem:[#allocation2 + $0xf9] sm:$0xff] }
 0x1e1   : > { %9044 = vmatprep.mubr.f32.mxu0 %v2569_v19  ;;  %v2931_v19 = vld [vmem:[#allocation2 + $0x109] sm:$0xff] }
 0x1e4   : > { %9045 = vmatmul.mubr.f32.gmra.mrb[26].mxu0 %v2570_v55  ;;  %v2932_v55 = vld [vmem:[#allocation2 + $0x111] sm:$0xff] }
 0x1e5   : > { %9047 = vmatprep.mubr.f32.mxu0 %v11759_v26  ;;  %v7479_v26 = vld [vmem:[%s13066_s1 + $0x480] sm:$0xff] }
 0x1e8   : > { %9048 = vmatmul.mubr.f32.gmra.mrb[28].mxu0 %v11763_v30  ;;  %v7480_v30 = vld [vmem:[%s13066_s1 + $0x488] sm:$0xff] }
 0x1e9   : > { %9050 = vmatprep.mubr.f32.mxu0 %v11984_v52  ;;  %v10221_v17 = vpack.c.bf16 %v7480_v30, %v7479_v26  ;;  %v2936_v26 = vld [vmem:[#allocation2 + $0x141] sm:$0xff]  ;;  %v2937_v30 = vld [vmem:[#allocation2 + $0x151] sm:$0xff] }
 0x1eb   : > { %10222 = vmatprep.subr.bf16.mxu1 %v10221_v17 }
 0x1ec   : > { %9051 = vmatmul.mubr.f32.gmra.mrb[30].mxu0 %v11984_v52  ;;  %10224 = vmatpush3.bf16.msra.mxu1 %v10221_v17  ;;  %v2940_v17 = vld [vmem:[#allocation2 + $0x171] sm:$0xff] }
 0x1ed   : > { %9085 = vmatprep.mubr.f32.mxu0 %v2913_v56  ;;  %10226 = vmatprep.subr.bf16.mxu1 %v10225_v53  ;;  %v2933_v56 = vld [vmem:[#allocation2 + $0x121] sm:$0xff] }
 0x1f0   : > { %9086 = vmatmul.mubr.f32.vlgmr.msra.gmra.mrb[0].mxu0 %v2914_v7  ;;  %10228 = vmatpush3.bf16.msra.mxu1 %v10225_v53  ;;  %v2939_v7 = vld [vmem:[#allocation2 + $0x169] sm:$0xff] }
 0x1f1   : > { %10192 = vmatpush3.bf16.msra.mxu0 %v10189_v39  ;;  %9088 = vmatprep.mubr.f32.mxu0 %v2915_v24  ;;  %v2925_v39 = vld [vmem:[#allocation2 + $0xc1] sm:$0xff]  ;;  %v3285_v53 = vld [vmem:[#allocation2 + $0x4a] sm:$0xff] }
 0x1f2   : > { %10194 = vmatprep.subr.bf16.mxu0 %v10193_v32  ;;  %10230 = vmatprep.subr.bf16.mxu1 %v10229_v12  ;;  %v2944_v24 = vld [vmem:[#allocation2 + $0x1a1] sm:$0xff] }
 0x1f4   : > { %9089 = vmatmul.mubr.f32.gmra.mrb[2].mxu0 %v2916_v2  ;;  %10232 = vmatpush3.bf16.msra.mxu1 %v10229_v12  ;;  %v3289_v2 = vld [vmem:[#allocation2 + $0x7a] sm:$0xff]  ;;  %v3295_v12 = vld [vmem:[#allocation2 + $0xc2] sm:$0xff] }
 0x1f5   : > { %9091 = vmatprep.mubr.f32.mxu0 %v2917_v3  ;;  %10196 = vmatpush3.bf16.msra.mxu0 %v10193_v32  ;;  %v3283_v32 = vld [vmem:[#allocation2 + $0x32] sm:$0xff] }
 0x1f6   : > { %10198 = vmatprep.subr.bf16.mxu0 %v10197_v4  ;;  %10234 = vmatprep.subr.bf16.mxu1 %v10233_v6  ;;  %v3291_v3 = vld [vmem:[#allocation2 + $0x92] sm:$0xff] }
 0x1f8   : > { %9092 = vmatmul.mubr.f32.gmra.mrb[4].mxu0 %v2918_v0  ;;  %10236 = vmatpush3.bf16.msra.mxu1 %v10233_v6  ;;  %v3299_v0 = vld [vmem:[#allocation2 + $0xf2] sm:$0xff]  ;;  %v3303_v6 = vld [vmem:[#allocation2 + $0x122] sm:$0xff] }
 0x1f9   : > { %9094 = vmatprep.mubr.f32.mxu0 %v2919_v1  ;;  %10200 = vmatpush3.bf16.msra.mxu0 %v10197_v4  ;;  %v3293_v4 = vld [vmem:[#allocation2 + $0xaa] sm:$0xff]  ;;  %v3300_v1 = vld [vmem:[#allocation2 + $0xfa] sm:$0xff] }
 0x1fa   : > { %10202 = vmatprep.subr.bf16.mxu0 %v10201_v29  ;;  %10238 = vmatprep.subr.bf16.mxu1 %v10237_v20 }
 0x1fc   : > { %9095 = vmatmul.mubr.f32.gmra.mrb[6].mxu0 %v2920_v28  ;;  %10240 = vmatpush3.bf16.msra.mxu1 %v10237_v20  ;;  %v3307_v28 = vld [vmem:[#allocation2 + $0x152] sm:$0xff]  ;;  %v3313_v20 = vld [vmem:[#allocation2 + $0x19a] sm:$0xff] }
 0x1fd   : > { %9097 = vmatprep.mubr.f32.mxu0 %v2921_v15  ;;  %10204 = vmatpush3.bf16.msra.mxu0 %v10201_v29  ;;  %v3301_v29 = vld [vmem:[#allocation2 + $0x10a] sm:$0xff]  ;;  %v3308_v15 = vld [vmem:[#allocation2 + $0x15a] sm:$0xff] }
 0x1fe   : > { %10206 = vmatprep.subr.bf16.mxu0 %v10205_v16  ;;  %10242 = vmatprep.subr.bf16.mxu1 %v10241_v35 }
 0x200   : > { %9098 = vmatmul.mubr.f32.gmra.mrb[8].mxu0 %v2922_v31  ;;  %10244 = vmatpush3.bf16.msra.mxu1 %v10241_v35  ;;  %v10245_v31 = vpack.c.bf16 %v7492_v25, %v7491_v49  ;;  %v7496_v35 = vld [vmem:[%s13066_s1 + $0x508] sm:$0xff] }
 0x201   : > { %9100 = vmatprep.mubr.f32.mxu0 %v2923_v33  ;;  %10208 = vmatpush3.bf16.msra.mxu0 %v10205_v16  ;;  %v3309_v16 = vld [vmem:[#allocation2 + $0x16a] sm:$0xff] }
 0x202   : > { %10210 = vmatprep.subr.bf16.mxu0 %v10209_v34  ;;  %10246 = vmatprep.subr.bf16.mxu1 %v10245_v31 }
 0x204   : > { %9101 = vmatmul.mubr.f32.gmra.mrb[10].mxu0 %v2924_v38  ;;  %10248 = vmatpush3.bf16.msra.mxu1 %v10245_v31  ;;  %v7498_v38 = vld [vmem:[%s13066_s1 + $0x518] sm:$0xff] }
 0x205   : > { %9103 = vmatprep.mubr.f32.mxu0 %v2925_v39  ;;  %10212 = vmatpush3.bf16.msra.mxu0 %v10209_v34  ;;  %v7495_v34 = vld [vmem:[%s13066_s1 + $0x500] sm:$0xff] }
 0x206   : > { %10214 = vmatprep.subr.bf16.mxu0 %v10213_v40  ;;  %v10253_v36 = vpack.c.bf16 %v7496_v35, %v7495_v34  ;;  %v7499_v39 = vld [vmem:[%s13066_s1 + $0x520] sm:$0xff] }
 0x208   : > { %9104 = vmatmul.mubr.f32.gmra.mrb[12].mxu0 %v2926_v42  ;;  %v7502_v42 = vld [vmem:[%s13066_s1 + $0x538] sm:$0xff] }
 0x209   : > { %9106 = vmatprep.mubr.f32.mxu0 %v2927_v43  ;;  %10216 = vmatpush3.bf16.msra.mxu0 %v10213_v40  ;;  %v7500_v40 = vld [vmem:[%s13066_s1 + $0x528] sm:$0xff]  ;;  %v10265_v43 = vpack.c.bf16 %v7502_v42, %v7501_v51 }
 0x20a   : > { %10218 = vmatprep.subr.bf16.mxu0 %v10217_v44  ;;  %v10261_v41 = vpack.c.bf16 %v7500_v40, %v7499_v39 }
 0x20c   : > { %9107 = vmatmul.mubr.f32.gmra.mrb[14].mxu0 %v2928_v45  ;;  %v7504_v45 = vld [vmem:[%s13066_s1 + $0x548] sm:$0xff] }
 0x20d   : > { %9109 = vmatprep.mubr.f32.mxu0 %v2929_v46  ;;  %10220 = vmatpush3.bf16.msra.mxu0 %v10217_v44  ;;  %v7503_v44 = vld [vmem:[%s13066_s1 + $0x540] sm:$0xff] }
 0x20e   : > { %v10269_v46 = vpack.c.bf16 %v7504_v45, %v7503_v44 }
 0x210   : > { %9110 = vmatmul.mubr.f32.gmra.mrb[16].mxu0 %v2930_v47  ;;  %v7505_v47 = vld [vmem:[%s13066_s1 + $0x550] sm:$0xff] }
 0x211   : > { %9112 = vmatprep.mubr.f32.mxu0 %v2931_v19  ;;  %v7506_v19 = vld [vmem:[%s13066_s1 + $0x558] sm:$0xff] }
 0x214   : > { %9113 = vmatmul.mubr.f32.gmra.mrb[18].mxu0 %v2932_v55  ;;  %v10273_v55 = vpack.c.bf16 %v7506_v19, %v7505_v47 }
 0x215   : > { %9115 = vmatprep.mubr.f32.mxu0 %v2933_v56  ;;  %v7507_v56 = vld [vmem:[%s13066_s1 + $0x560] sm:$0xff] }
 0x218   : > { %9116 = vmatmul.mubr.f32.gmra.mrb[20].mxu0 %v2934_v57  ;;  %v7508_v57 = vld [vmem:[%s13066_s1 + $0x568] sm:$0xff] }
 0x219   : > { %9118 = vmatprep.mubr.f32.mxu0 %v2935_v62  ;;  %v10277_v62 = vpack.c.bf16 %v7508_v57, %v7507_v56 }
 0x21c   : > { %9119 = vmatmul.mubr.f32.gmra.mrb[22].mxu0 %v2936_v26  ;;  %v7509_v26 = vld [vmem:[%s13066_s1 + $0x570] sm:$0xff] }
 0x21d   : > { %9121 = vmatprep.mubr.f32.mxu0 %v2937_v30  ;;  %v7510_v30 = vld [vmem:[%s13066_s1 + $0x578] sm:$0xff] }
 0x220   : > { %9122 = vmatmul.mubr.f32.gmra.mrb[24].mxu0 %v2938_v63  ;;  %v10281_v63 = vpack.c.bf16 %v7510_v30, %v7509_v26 }
 0x221   : > { %9124 = vmatprep.mubr.f32.mxu0 %v2939_v7  ;;  %v7511_v7 = vld [vmem:[%s13066_s1 + $0x580] sm:$0xff] }
 0x224   : > { %9125 = vmatmul.mubr.f32.gmra.mrb[26].mxu0 %v2940_v17  ;;  %v7512_v17 = vld [vmem:[%s13066_s1 + $0x588] sm:$0xff] }
 0x225   : > { %9127 = vmatprep.mubr.f32.mxu0 %v11843_v54  ;;  %v3290_v54 = vld [vmem:[#allocation2 + $0x82] sm:$0xff] }
 0x228   : > { %9128 = vmatmul.mubr.f32.gmra.mrb[28].mxu0 %v11847_v59  ;;  %v3292_v59 = vld [vmem:[#allocation2 + $0x9a] sm:$0xff] }
 0x229   : > { %9130 = vmatprep.mubr.f32.mxu0 %v2943_v23  ;;  %v12137_v23 = vpack.c.bf16 %v7512_v17, %v7511_v7 }
 0x22c   : > { %9131 = vmatmul.mubr.f32.gmra.mrb[30].mxu0 %v2944_v24  ;;  %v12143_v24 = vld [vmem:[%s13067_s2] ss:$0 sm:$0xff] }
 0x22d   : > { %9165 = vmatprep.mubr.f32.mxu0 %v3283_v32 }
 0x230   : > { %9166 = vmatmul.mubr.f32.vlgmr.msra.gmra.mrb[0].mxu0 %v3284_v48 }
 0x231   : > { %9168 = vmatprep.mubr.f32.mxu0 %v3285_v53 }
 0x234   : > { %9169 = vmatmul.mubr.f32.gmra.mrb[2].mxu0 %v3286_v27 }
 0x235   : > { %9171 = vmatprep.mubr.f32.mxu0 %v3287_v58 }
 0x238   : > { %9172 = vmatmul.mubr.f32.gmra.mrb[4].mxu0 %v3288_v61 }
 0x239   : > { %9174 = vmatprep.mubr.f32.mxu0 %v3289_v2 }
 0x23c   : > { %9175 = vmatmul.mubr.f32.gmra.mrb[6].mxu0 %v3290_v54 }
 0x23d   : > { %9177 = vmatprep.mubr.f32.mxu0 %v3291_v3 }
 0x240   : > { %9178 = vmatmul.mubr.f32.gmra.mrb[8].mxu0 %v3292_v59 }
 0x241   : > { %9180 = vmatprep.mubr.f32.mxu0 %v3293_v4 }
 0x244   : > { %9181 = vmatmul.mubr.f32.gmra.mrb[10].mxu0 %v3294_v9 }
 0x245   : > { %9183 = vmatprep.mubr.f32.mxu0 %v3295_v12 }
 0x248   : > { %9184 = vmatmul.mubr.f32.gmra.mrb[12].mxu0 %v3296_v22 }
 0x249   : > { %9186 = vmatprep.mubr.f32.mxu0 %v3297_v60 }
 0x24c   : > { %9187 = vmatmul.mubr.f32.gmra.mrb[14].mxu0 %v3298_v13 }
 0x24d   : > { %9189 = vmatprep.mubr.f32.mxu0 %v3299_v0 }
 0x250   : > { %9190 = vmatmul.mubr.f32.gmra.mrb[16].mxu0 %v3300_v1 }
 0x251   : > { %9192 = vmatprep.mubr.f32.mxu0 %v3301_v29 }
 0x254   : > { %9193 = vmatmul.mubr.f32.gmra.mrb[18].mxu0 %v3302_v5 }
 0x255   : > { %9195 = vmatprep.mubr.f32.mxu0 %v3303_v6 }
 0x258   : > { %9196 = vmatmul.mubr.f32.gmra.mrb[20].mxu0 %v3304_v50 }
 0x259   : > { %9198 = vmatprep.mubr.f32.mxu0 %v3305_v10 }
 0x25c   : > { %9199 = vmatmul.mubr.f32.gmra.mrb[22].mxu0 %v3306_v11 }
 0x25d   : > { %9201 = vmatprep.mubr.f32.mxu0 %v3307_v28 }
 0x260   : > { %9202 = vmatmul.mubr.f32.gmra.mrb[24].mxu0 %v3308_v15 }
 0x261   : > { %9204 = vmatprep.mubr.f32.mxu0 %v3309_v16 }
 0x264   : > { %9205 = vmatmul.mubr.f32.gmra.mrb[26].mxu0 %v3310_v18 }
 0x265   : > { %9207 = vmatprep.mubr.f32.mxu0 %v11927_v8  ;;  %v7493_v8 = vld [vmem:[%s13066_s1 + $0x4f0] sm:$0xff] }
 0x268   : > { %9208 = vmatmul.mubr.f32.gmra.mrb[28].mxu0 %v11931_v14  ;;  %v7494_v14 = vld [vmem:[%s13066_s1 + $0x4f8] sm:$0xff] }
 0x269   : > { %9210 = vmatprep.mubr.f32.mxu0 %v3313_v20  ;;  %v10249_v33 = vpack.c.bf16 %v7494_v14, %v7493_v8 }
 0x26b   : > { %10250 = vmatprep.subr.bf16.mxu1 %v10249_v33 }
 0x26c   : > { %9211 = vmatmul.mubr.f32.gmra.mrb[30].mxu0 %v3314_v21  ;;  %10252 = vmatpush3.bf16.msra.mxu1 %v10249_v33 }
 0x26d   : > { %10254 = vmatprep.subr.bf16.mxu1 %v10253_v36 }
 0x26f   : > { %9246 = vmatmul.mubr.f32.vlgmr.msra.gmra.mrb[0].mxu1 %v11984_v52  ;;  %v10257_v52 = vpack.c.bf16 %v7498_v38, %v7497_v37 }
 0x270   : > { %10256 = vmatpush3.bf16.msra.mxu1 %v10253_v36 }
 0x271   : > { %10258 = vmatprep.subr.bf16.mxu1 %v10257_v52 }
 0x274   : > { %10260 = vmatpush3.bf16.msra.mxu1 %v10257_v52 }
 0x275   : > { %10262 = vmatprep.subr.bf16.mxu1 %v10261_v41 }
 0x278   : > { %10264 = vmatpush3.bf16.msra.mxu1 %v10261_v41 }
 0x279   : > { %10266 = vmatprep.subr.bf16.mxu1 %v10265_v43 }
 0x27c   : > { %10268 = vmatpush3.bf16.msra.mxu1 %v10265_v43 }
 0x27d   : > { %10270 = vmatprep.subr.bf16.mxu1 %v10269_v46 }
 0x280   : > { %10272 = vmatpush3.bf16.msra.mxu1 %v10269_v46 }
 0x281   : > { %10274 = vmatprep.subr.bf16.mxu1 %v10273_v55 }
 0x284   : > { %10276 = vmatpush3.bf16.msra.mxu1 %v10273_v55 }
 0x285   : > { %10278 = vmatprep.subr.bf16.mxu1 %v10277_v62 }
 0x288   : > { %10280 = vmatpush3.bf16.msra.mxu1 %v10277_v62 }
 0x289   : > { %10282 = vmatprep.subr.bf16.mxu1 %v10281_v63 }
 0x28c   : > { %10284 = vmatpush3.bf16.msra.mxu1 %v10281_v63 }
 0x28d   : > { %10286 = vmatprep.subr.bf16.mxu1 %v12137_v23 }
 0x303   : > { %v9167_v32 = vpop.f32.mrb[0].mxu0 }
 0x304   : > { %v12146_v48 = vadd.f32 %v9167_v32, %v12143_v24  ;;  %v3430_v53 = vpop.f32.mrb[1].mxu0 }
 0x305   : > { %v12149_v27 = vadd.f32 %v12143_v24, %v3430_v53 }
 0x306   : > { %v13111_v58 = vmax.f32 %v12146_v48, 0.0 }
 0x307   : > { %v13112_v61 = vmax.f32 %v12149_v27, 0.0  ;;  %v9170_v2 = vpop.f32.mrb[2].mxu0 }
 0x308   : > { %3757 = vst [vmem:[#allocation2 + $0x21] sm:$0xff] %v13111_v58  ;;  %v12156_v54 = vadd.f32 %v9170_v2, %v12143_v24  ;;  %v3440_v3 = vpop.f32.mrb[3].mxu0 }
 0x309   : > { %3756 = vst [vmem:[#allocation2 + $0x19] sm:$0xff] %v13112_v61  ;;  %v12161_v59 = vadd.f32 %v12143_v24, %v3440_v3 }
 0x30a   : > { %v13109_v4 = vmax.f32 %v12156_v54, 0.0 }
 0x30b   : > { %v13110_v9 = vmax.f32 %v12161_v59, 0.0  ;;  %v9173_v12 = vpop.f32.mrb[4].mxu0 }
 0x30c   : > { %3759 = vst [vmem:[#allocation2 + $0x39] sm:$0xff] %v13109_v4  ;;  %v12168_v22 = vadd.f32 %v9173_v12, %v12143_v24  ;;  %v3450_v60 = vpop.f32.mrb[5].mxu0 }
 0x30d   : > { %3758 = vst [vmem:[#allocation2 + $0x31] sm:$0xff] %v13110_v9  ;;  %v12173_v13 = vadd.f32 %v12143_v24, %v3450_v60 }
 0x30e   : > { %v13107_v0 = vmax.f32 %v12168_v22, 0.0 }
 0x30f   : > { %v13108_v1 = vmax.f32 %v12173_v13, 0.0  ;;  %v9176_v29 = vpop.f32.mrb[6].mxu0 }
 0x310   : > { %3761 = vst [vmem:[#allocation2 + $0x51] sm:$0xff] %v13107_v0  ;;  %v12180_v5 = vadd.f32 %v9176_v29, %v12143_v24  ;;  %v3460_v6 = vpop.f32.mrb[7].mxu0  ;;  %v12182_v50 = vld [vmem:[#allocation2 + $0x18] sm:$0xff]  ;;  %v12184_v10 = vld [vmem:[#allocation2 + $0x20] sm:$0xff] }
 0x311   : > { %3760 = vst [vmem:[#allocation2 + $0x49] sm:$0xff] %v13108_v1  ;;  %v12189_v11 = vadd.f32 %v12143_v24, %v3460_v6  ;;  %9248 = vmatprep.mubr.f32.mxu1 %v12182_v50 }
 0x312   : > { %v13105_v28 = vmax.f32 %v12180_v5, 0.0  ;;  %9249 = vmatmul.mubr.f32.gmra.mrb[2].mxu1 %v12184_v10 }
 0x313   : > { %v13106_v15 = vmax.f32 %v12189_v11, 0.0  ;;  %v9179_v16 = vpop.f32.mrb[8].mxu0 }
 0x314   : > { %3763 = vst [vmem:[#allocation2 + $0x69] sm:$0xff] %v13105_v28  ;;  %v12198_v18 = vadd.f32 %v9179_v16, %v12143_v24  ;;  %v3470_v20 = vpop.f32.mrb[9].mxu0  ;;  %v12200_v21 = vld [vmem:[#allocation2 + $0x30] sm:$0xff]  ;;  %v12202_v49 = vld [vmem:[#allocation2 + $0x38] sm:$0xff] }
 0x315   : > { %3762 = vst [vmem:[#allocation2 + $0x61] sm:$0xff] %v13106_v15  ;;  %v12207_v25 = vadd.f32 %v12143_v24, %v3470_v20  ;;  %9251 = vmatprep.mubr.f32.mxu1 %v12200_v21 }
 0x316   : > { %v13103_v31 = vmax.f32 %v12198_v18, 0.0  ;;  %9252 = vmatmul.mubr.f32.gmra.mrb[4].mxu1 %v12202_v49 }
 0x317   : > { %v13104_v8 = vmax.f32 %v12207_v25, 0.0  ;;  %v9182_v14 = vpop.f32.mrb[10].mxu0 }
 0x318   : > { %3765 = vst [vmem:[#allocation2 + $0x81] sm:$0xff] %v13103_v31  ;;  %v12216_v33 = vadd.f32 %v9182_v14, %v12143_v24  ;;  %v3480_v34 = vpop.f32.mrb[11].mxu0  ;;  %v12218_v35 = vld [vmem:[#allocation2 + $0x48] sm:$0xff]  ;;  %v12220_v36 = vld [vmem:[#allocation2 + $0x50] sm:$0xff] }
 0x319   : > { %3764 = vst [vmem:[#allocation2 + $0x79] sm:$0xff] %v13104_v8  ;;  %v3702_v37 = vadd.f32 %v12143_v24, %v3480_v34  ;;  %9254 = vmatprep.mubr.f32.mxu1 %v12218_v35 }
 0x31a   : > { %v13102_v38 = vmax.f32 %v12216_v33, 0.0  ;;  %9255 = vmatmul.mubr.f32.gmra.mrb[6].mxu1 %v12220_v36 }
 0x31b   : > { %v12228_v52 = vmax.f32 %v3702_v37, 0.0  ;;  %v9185_v39 = vpop.f32.mrb[12].mxu0 }
 0x31c   : > { %3767 = vst [vmem:[#allocation2 + $0x99] sm:$0xff] %v13102_v38  ;;  %v3705_v40 = vadd.f32 %v9185_v39, %v12143_v24  ;;  %v3490_v41 = vpop.f32.mrb[13].mxu0  ;;  %v12233_v51 = vld [vmem:[#allocation2 + $0x60] sm:$0xff]  ;;  %v12235_v42 = vld [vmem:[#allocation2 + $0x68] sm:$0xff] }
 0x31d   : > { %3766 = vst [vmem:[#allocation2 + $0x91] sm:$0xff] %v12228_v52  ;;  %v3704_v43 = vadd.f32 %v12143_v24, %v3490_v41  ;;  %9257 = vmatprep.mubr.f32.mxu1 %v12233_v51 }
 0x31e   : > { %v12240_v44 = vmax.f32 %v3705_v40, 0.0  ;;  %9258 = vmatmul.mubr.f32.gmra.mrb[8].mxu1 %v12235_v42 }
 0x31f   : > { %v12243_v45 = vmax.f32 %v3704_v43, 0.0  ;;  %v9188_v46 = vpop.f32.mrb[14].mxu0 }
 0x320   : > { %3769 = vst [vmem:[#allocation2 + $0xb1] sm:$0xff] %v12240_v44  ;;  %v3707_v47 = vadd.f32 %v9188_v46, %v12143_v24  ;;  %v3500_v19 = vpop.f32.mrb[15].mxu0  ;;  %v12247_v55 = vld [vmem:[#allocation2 + $0x78] sm:$0xff]  ;;  %v12249_v56 = vld [vmem:[#allocation2 + $0x80] sm:$0xff] }
 0x321   : > { %3768 = vst [vmem:[#allocation2 + $0xa9] sm:$0xff] %v12243_v45  ;;  %v3706_v57 = vadd.f32 %v12143_v24, %v3500_v19  ;;  %9260 = vmatprep.mubr.f32.mxu1 %v12247_v55 }
 0x322   : > { %v12254_v62 = vmax.f32 %v3707_v47, 0.0  ;;  %9261 = vmatmul.mubr.f32.gmra.mrb[10].mxu1 %v12249_v56 }
 0x323   : > { %v12257_v26 = vmax.f32 %v3706_v57, 0.0  ;;  %v9191_v30 = vpop.f32.mrb[16].mxu0 }
 0x324   : > { %3771 = vst [vmem:[#allocation2 + $0xc9] sm:$0xff] %v12254_v62  ;;  %v3709_v63 = vadd.f32 %v9191_v30, %v12143_v24  ;;  %v3510_v7 = vpop.f32.mrb[17].mxu0  ;;  %v12261_v17 = vld [vmem:[#allocation2 + $0x90] sm:$0xff]  ;;  %v12263_v32 = vld [vmem:[#allocation2 + $0x98] sm:$0xff] }
 0x325   : > { %3770 = vst [vmem:[#allocation2 + $0xc1] sm:$0xff] %v12257_v26  ;;  %v3708_v53 = vadd.f32 %v12143_v24, %v3510_v7  ;;  %9263 = vmatprep.mubr.f32.mxu1 %v12261_v17 }
 0x326   : > { %v12268_v2 = vmax.f32 %v3709_v63, 0.0  ;;  %9264 = vmatmul.mubr.f32.gmra.mrb[12].mxu1 %v12263_v32 }
 0x327   : > { %v12271_v3 = vmax.f32 %v3708_v53, 0.0  ;;  %v9194_v12 = vpop.f32.mrb[18].mxu0 }
 0x328   : > { %3773 = vst [vmem:[#allocation2 + $0xe1] sm:$0xff] %v12268_v2  ;;  %v3711_v60 = vadd.f32 %v9194_v12, %v12143_v24  ;;  %v3520_v29 = vpop.f32.mrb[19].mxu0  ;;  %v12275_v6 = vld [vmem:[#allocation2 + $0xa8] sm:$0xff]  ;;  %v12277_v16 = vld [vmem:[#allocation2 + $0xb0] sm:$0xff] }
 0x329   : > { %3772 = vst [vmem:[#allocation2 + $0xd9] sm:$0xff] %v12271_v3  ;;  %v3710_v20 = vadd.f32 %v12143_v24, %v3520_v29  ;;  %9266 = vmatprep.mubr.f32.mxu1 %v12275_v6 }
 0x32a   : > { %v12282_v14 = vmax.f32 %v3711_v60, 0.0  ;;  %9267 = vmatmul.mubr.f32.gmra.mrb[14].mxu1 %v12277_v16 }
 0x32b   : > { %v12285_v34 = vmax.f32 %v3710_v20, 0.0  ;;  %v9197_v37 = vpop.f32.mrb[20].mxu0 }
 0x32c   : > { %3775 = vst [vmem:[#allocation2 + $0xf9] sm:$0xff] %v12282_v14  ;;  %v3713_v39 = vadd.f32 %v9197_v37, %v12143_v24  ;;  %v3530_v40 = vpop.f32.mrb[21].mxu0  ;;  %v12289_v41 = vld [vmem:[#allocation2 + $0xc0] sm:$0xff]  ;;  %v12291_v43 = vld [vmem:[#allocation2 + $0xc8] sm:$0xff] }
 0x32d   : > { %3774 = vst [vmem:[#allocation2 + $0xf1] sm:$0xff] %v12285_v34  ;;  %v3712_v46 = vadd.f32 %v12143_v24, %v3530_v40  ;;  %9269 = vmatprep.mubr.f32.mxu1 %v12289_v41 }
 0x32e   : > { %v12296_v47 = vmax.f32 %v3713_v39, 0.0  ;;  %9270 = vmatmul.mubr.f32.gmra.mrb[16].mxu1 %v12291_v43 }
 0x32f   : > { %v12299_v19 = vmax.f32 %v3712_v46, 0.0  ;;  %v9200_v57 = vpop.f32.mrb[22].mxu0 }
 0x330   : > { %3777 = vst [vmem:[#allocation2 + $0x111] sm:$0xff] %v12296_v47  ;;  %v3715_v30 = vadd.f32 %v9200_v57, %v12143_v24  ;;  %v3540_v63 = vpop.f32.mrb[23].mxu0  ;;  %v12303_v7 = vld [vmem:[#allocation2 + $0xd8] sm:$0xff]  ;;  %v12305_v53 = vld [vmem:[#allocation2 + $0xe0] sm:$0xff] }
 0x331   : > { %3776 = vst [vmem:[#allocation2 + $0x109] sm:$0xff] %v12299_v19  ;;  %v3714_v12 = vadd.f32 %v12143_v24, %v3540_v63  ;;  %9272 = vmatprep.mubr.f32.mxu1 %v12303_v7 }
 0x332   : > { %v12310_v60 = vmax.f32 %v3715_v30, 0.0  ;;  %9273 = vmatmul.mubr.f32.gmra.mrb[18].mxu1 %v12305_v53 }
 0x333   : > { %v12313_v29 = vmax.f32 %v3714_v12, 0.0  ;;  %v9203_v20 = vpop.f32.mrb[24].mxu0 }
 0x334   : > { %3779 = vst [vmem:[#allocation2 + $0x129] sm:$0xff] %v12310_v60  ;;  %v3717_v37 = vadd.f32 %v9203_v20, %v12143_v24  ;;  %v3550_v39 = vpop.f32.mrb[25].mxu0  ;;  %v12317_v40 = vld [vmem:[#allocation2 + $0xf0] sm:$0xff]  ;;  %v12319_v46 = vld [vmem:[#allocation2 + $0xf8] sm:$0xff] }
 0x335   : > { %3778 = vst [vmem:[#allocation2 + $0x121] sm:$0xff] %v12313_v29  ;;  %v3716_v57 = vadd.f32 %v12143_v24, %v3550_v39  ;;  %9275 = vmatprep.mubr.f32.mxu1 %v12317_v40 }
 0x336   : > { %v12324_v30 = vmax.f32 %v3717_v37, 0.0  ;;  %9276 = vmatmul.mubr.f32.gmra.mrb[20].mxu1 %v12319_v46 }
 0x337   : > { %v12327_v63 = vmax.f32 %v3716_v57, 0.0  ;;  %v9206_v12 = vpop.f32.mrb[26].mxu0 }
 0x338   : > { %3781 = vst [vmem:[#allocation2 + $0x141] sm:$0xff] %v12324_v30  ;;  %v3719_v20 = vadd.f32 %v9206_v12, %v12143_v24  ;;  %v3560_v38 = vpop.f32.mrb[27].mxu0  ;;  %v12331_v31 = vld [vmem:[#allocation2 + $0x108] sm:$0xff]  ;;  %v12333_v8 = vld [vmem:[#allocation2 + $0x110] sm:$0xff] }
 0x339   : > { %3780 = vst [vmem:[#allocation2 + $0x139] sm:$0xff] %v12327_v63  ;;  %v3718_v39 = vadd.f32 %v12143_v24, %v3560_v38  ;;  %9278 = vmatprep.mubr.f32.mxu1 %v12331_v31 }
 0x33a   : > { %v12338_v37 = vmax.f32 %v3719_v20, 0.0  ;;  %9279 = vmatmul.mubr.f32.gmra.mrb[22].mxu1 %v12333_v8 }
 0x33b   : > { %v12341_v57 = vmax.f32 %v3718_v39, 0.0  ;;  %v9209_v28 = vpop.f32.mrb[28].mxu0 }
 0x33c   : > { %3783 = vst [vmem:[#allocation2 + $0x159] sm:$0xff] %v12338_v37  ;;  %v3721_v12 = vadd.f32 %v9209_v28, %v12143_v24  ;;  %v3570_v15 = vpop.f32.mrb[29].mxu0  ;;  %v12345_v0 = vld [vmem:[#allocation2 + $0x120] sm:$0xff]  ;;  %v12347_v1 = vld [vmem:[#allocation2 + $0x128] sm:$0xff] }
 0x33d   : > { %13206 = vst [vmem:[#allocation4_spill] sm:$0xff] %v12347_v1  ;;  %3782 = vst [vmem:[#allocation2 + $0x151] sm:$0xff] %v12341_v57  ;;  %v3720_v38 = vadd.f32 %v12143_v24, %v3570_v15  ;;  %9281 = vmatprep.mubr.f32.mxu1 %v12345_v0 }
 0x33e   : > { %v12352_v20 = vmax.f32 %v3721_v12, 0.0  ;;  %9282 = vmatmul.mubr.f32.gmra.mrb[24].mxu1 %v12347_v1 }
 0x33f   : > { %v12355_v39 = vmax.f32 %v3720_v38, 0.0  ;;  %v9212_v4 = vpop.f32.mrb[30].mxu0 }
 0x340   : > { %3785 = vst [vmem:[#allocation2 + $0x171] sm:$0xff] %v12352_v20  ;;  %v12359_v28 = vadd.f32 %v9212_v4, %v12143_v24  ;;  %v3580_v9 = vpop.f32.mrb[31].mxu0  ;;  %v12361_v58 = vld [vmem:[#allocation2 + $0x138] sm:$0xff]  ;;  %v12363_v61 = vld [vmem:[#allocation2 + $0x140] sm:$0xff] }
 0x341   : > { %13208 = vst [vmem:[#allocation6_spill] sm:$0xff] %v12361_v58  ;;  %13209 = vst [vmem:[#allocation7_spill] sm:$0xff] %v12363_v61  ;;  %v12367_v15 = vadd.f32 %v12143_v24, %v3580_v9  ;;  %9284 = vmatprep.mubr.f32.mxu1 %v12361_v58 }
 0x342   : > { %13207 = vst [vmem:[#allocation5_spill] sm:$0xff] %v12359_v28  ;;  %3784 = vst [vmem:[#allocation2 + $0x169] sm:$0xff] %v12355_v39  ;;  %v13115_v12 = vmax.f32 %v12359_v28, 0.0  ;;  %9285 = vmatmul.mubr.f32.gmra.mrb[26].mxu1 %v12363_v61  ;;  %v4190_v61 = vld [vmem:[#allocation2 + $0x1] sm:$0xff]  ;;  %v7514_v28 = vld [vmem:[%s13066_s1 + $0x598] sm:$0xff] }
 0x343   : > { %13210 = vst [vmem:[#allocation8_spill] sm:$0xff] %v12367_v15  ;;  %v13117_v38 = vmax.f32 %v12367_v15, 0.0 }
 0x344   : > { %3787 = vst [vmem:[#allocation2 + $0x189] sm:$0xff] %v13115_v12  ;;  %v12375_v4 = vld [vmem:[#allocation2 + $0x150] sm:$0xff]  ;;  %v12377_v1 = vld [vmem:[#allocation2 + $0x158] sm:$0xff] }
 0x345   : > { %13211 = vst [vmem:[#allocation9_spill] sm:$0xff] %v12375_v4  ;;  %13212 = vst [vmem:[#allocation10_spill] sm:$0xff] %v12377_v1  ;;  %9287 = vmatprep.mubr.f32.mxu1 %v12375_v4  ;;  %v7513_v12 = vld [vmem:[%s13066_s1 + $0x590] sm:$0xff]  ;;  %v13214_v4 = vmax.f32 %v12149_v27, 0.0 }
 0x346   : > { %3786 = vst [vmem:[#allocation2 + $0x181] sm:$0xff] %v13117_v38  ;;  %9288 = vmatmul.mubr.f32.gmra.mrb[28].mxu1 %v12377_v1  ;;  %v4191_v38 = vld [vmem:[#allocation2 + $0x9] sm:$0xff]  ;;  %v10289_v15 = vpack.c.bf16 %v7514_v28, %v7513_v12  ;;  %v7515_v1 = vld [vmem:[%s13066_s1 + $0x5a0] sm:$0xff]  ;;  %v7518_v28 = vld [vmem:[%s13066_s1 + $0x5b8] sm:$0xff]  ;;  %v13215_v12 = vmax.f32 %v12146_v48, 0.0  ;;  %v13218_v48 = vmax.f32 %v12173_v13, 0.0 }
 0x349   : > { %v12383_v24 = vld [vmem:[#allocation2 + $0x168] sm:$0xff]  ;;  %v12385_v9 = vld [vmem:[#allocation2 + $0x170] sm:$0xff] }
 0x34a   : > { %13213 = vst [vmem:[#allocation11_spill] sm:$0xff] %v12383_v24  ;;  %9290 = vmatprep.mubr.f32.mxu1 %v12383_v24  ;;  %v7516_v24 = vld [vmem:[%s13066_s1 + $0x5a8] sm:$0xff] }
 0x34b   : > { %9291 = vmatmul.mubr.f32.gmra.mrb[30].mxu1 %v12385_v9  ;;  %v10293_v58 = vpack.c.bf16 %v7516_v24, %v7515_v1  ;;  %v7520_v1 = vld [vmem:[%s13066_s1 + $0x5c8] sm:$0xff]  ;;  %v7522_v24 = vld [vmem:[%s13066_s1 + $0x5d8] sm:$0xff] }
 0x34c   : > { %9325 = vmatprep.mubr.f32.mxu1 %v4190_v61  ;;  %v7517_v61 = vld [vmem:[%s13066_s1 + $0x5b0] sm:$0xff] }
 0x34d   : > { %v10297_v27 = vpack.c.bf16 %v7518_v28, %v7517_v61  ;;  %v13219_v61 = vmax.f32 %v12168_v22, 0.0  ;;  %v7524_v28 = vld [vmem:[%s13066_s1 + $0x5e8] sm:$0xff]  ;;  %v13222_v22 = vmax.f32 %v12207_v25, 0.0  ;;  %v7527_v25 = vld [vmem:[%s13066_s1 + $0x600] sm:$0xff] }
 0x34f   : > { %9326 = vmatmul.mubr.f32.vlgmr.msra.gmra.mrb[0].mxu1 %v4191_v38  ;;  %v13216_v38 = vmax.f32 %v12161_v59, 0.0 }
 0x350   : > { %9328 = vmatprep.mubr.f32.mxu1 %v13214_v4  ;;  %10288 = vmatpush3.bf16.msra.mxu1 %v12137_v23  ;;  %v7519_v23 = vld [vmem:[%s13066_s1 + $0x5c0] sm:$0xff]  ;;  %v13217_v4 = vmax.f32 %v12156_v54, 0.0  ;;  %v13220_v54 = vmax.f32 %v12189_v11, 0.0 }
 0x351   : > { %10290 = vmatprep.subr.bf16.mxu1 %v10289_v15  ;;  %v10301_v59 = vpack.c.bf16 %v7520_v1, %v7519_v23  ;;  %v13223_v23 = vmax.f32 %v12198_v18, 0.0  ;;  %v7528_v1 = vld [vmem:[%s13066_s1 + $0x608] sm:$0xff] }
 0x352   : > { %v10317_v18 = vpack.c.bf16 %v7528_v1, %v7527_v25  ;;  %v12515_v25 = vld [vmem:[#allocation2 + $0x4a] sm:$0xff] }
 0x353   : > { %9329 = vmatmul.mubr.f32.gmra.mrb[2].mxu1 %v13215_v12  ;;  %v13221_v12 = vmax.f32 %v12180_v5, 0.0 }
 0x354   : > { %9331 = vmatprep.mubr.f32.mxu1 %v13216_v38  ;;  %10292 = vmatpush3.bf16.msra.mxu1 %v10289_v15  ;;  %v7521_v15 = vld [vmem:[%s13066_s1 + $0x5d0] sm:$0xff] }
 0x355   : > { %10294 = vmatprep.subr.bf16.mxu1 %v10293_v58  ;;  %v10305_v13 = vpack.c.bf16 %v7522_v24, %v7521_v15  ;;  %v7525_v38 = vld [vmem:[%s13066_s1 + $0x5f0] sm:$0xff] }
 0x356   : > { %v4561_v15 = vld [vmem:[#allocation2 + $0xa] sm:$0xff] }
 0x357   : > { %9332 = vmatmul.mubr.f32.gmra.mrb[4].mxu1 %v13217_v4  ;;  %v13224_v4 = vmax.f32 %v12216_v33, 0.0  ;;  %v4560_v33 = vld [vmem:[#allocation2 + $0x2] sm:$0xff] }
 0x358   : > { %9334 = vmatprep.mubr.f32.mxu1 %v13218_v48  ;;  %10296 = vmatpush3.bf16.msra.mxu1 %v10293_v58  ;;  %v7523_v58 = vld [vmem:[%s13066_s1 + $0x5e0] sm:$0xff]  ;;  %v7529_v48 = vld [vmem:[%s13066_s1 + $0x610] sm:$0xff] }
 0x359   : > { %10298 = vmatprep.subr.bf16.mxu1 %v10297_v27  ;;  %v10309_v11 = vpack.c.bf16 %v7524_v28, %v7523_v58  ;;  %v12494_v28 = vld [vmem:[#allocation2 + $0x22] sm:$0xff] }
 0x35b   : > { %9335 = vmatmul.mubr.f32.gmra.mrb[6].mxu1 %v13219_v61  ;;  %v7531_v61 = vld [vmem:[%s13066_s1 + $0x620] sm:$0xff] }
 0x35c   : > { %9337 = vmatprep.mubr.f32.mxu1 %v13220_v54  ;;  %10300 = vmatpush3.bf16.msra.mxu1 %v10297_v27  ;;  %v7526_v27 = vld [vmem:[%s13066_s1 + $0x5f8] sm:$0xff]  ;;  %v7532_v54 = vld [vmem:[%s13066_s1 + $0x628] sm:$0xff] }
 0x35d   : > { %10302 = vmatprep.subr.bf16.mxu1 %v10301_v59  ;;  %v10313_v5 = vpack.c.bf16 %v7526_v27, %v7525_v38  ;;  %v10325_v58 = vpack.c.bf16 %v7532_v54, %v7531_v61  ;;  %v12506_v27 = vld [vmem:[#allocation2 + $0x3a] sm:$0xff]  ;;  %v7540_v61 = vld [vmem:[%s13066_s1 + $0x668] sm:$0xff] }
 0x35e   : > { %v12539_v54 = vld [vmem:[#allocation2 + $0x7a] sm:$0xff] }
 0x35f   : > { %9338 = vmatmul.mubr.f32.gmra.mrb[8].mxu1 %v13221_v12  ;;  %v7533_v12 = vld [vmem:[%s13066_s1 + $0x630] sm:$0xff] }
 0x360   : > { %9340 = vmatprep.mubr.f32.mxu1 %v13222_v22  ;;  %10304 = vmatpush3.bf16.msra.mxu1 %v10301_v59  ;;  %v7530_v59 = vld [vmem:[%s13066_s1 + $0x618] sm:$0xff] }
 0x361   : > { %10306 = vmatprep.subr.bf16.mxu1 %v10305_v13  ;;  %v10321_v24 = vpack.c.bf16 %v7530_v59, %v7529_v48  ;;  %v7534_v22 = vld [vmem:[%s13066_s1 + $0x638] sm:$0xff]  ;;  %v12527_v48 = vld [vmem:[#allocation2 + $0x62] sm:$0xff] }
 0x362   : > { %v10329_v38 = vpack.c.bf16 %v7534_v22, %v7533_v12  ;;  %v12542_v12 = vld [vmem:[#allocation2 + $0x82] sm:$0xff]  ;;  %v7541_v22 = vld [vmem:[%s13066_s1 + $0x670] sm:$0xff] }
 0x363   : > { %9341 = vmatmul.mubr.f32.gmra.mrb[10].mxu1 %v13223_v23  ;;  %v7535_v23 = vld [vmem:[%s13066_s1 + $0x640] sm:$0xff] }
 0x364   : > { %9343 = vmatprep.mubr.f32.mxu1 %v12228_v52  ;;  %10308 = vmatpush3.bf16.msra.mxu1 %v10305_v13  ;;  %v12491_v13 = vld [vmem:[#allocation2 + $0x1a] sm:$0xff] }
 0x365   : > { %10310 = vmatprep.subr.bf16.mxu1 %v10309_v11 }
 0x367   : > { %9344 = vmatmul.mubr.f32.gmra.mrb[12].mxu1 %v13224_v4  ;;  %v12518_v4 = vld [vmem:[#allocation2 + $0x52] sm:$0xff] }
 0x368   : > { %9346 = vmatprep.mubr.f32.mxu1 %v12243_v45  ;;  %10312 = vmatpush3.bf16.msra.mxu1 %v10309_v11  ;;  %v12503_v11 = vld [vmem:[#allocation2 + $0x32] sm:$0xff] }
 0x369   : > { %10314 = vmatprep.subr.bf16.mxu1 %v10313_v5 }
 0x36b   : > { %9347 = vmatmul.mubr.f32.gmra.mrb[14].mxu1 %v12240_v44 }
 0x36c   : > { %9349 = vmatprep.mubr.f32.mxu1 %v12257_v26  ;;  %10316 = vmatpush3.bf16.msra.mxu1 %v10313_v5  ;;  %v7536_v5 = vld [vmem:[%s13066_s1 + $0x648] sm:$0xff] }
 0x36d   : > { %10318 = vmatprep.subr.bf16.mxu1 %v10317_v18  ;;  %v10333_v1 = vpack.c.bf16 %v7536_v5, %v7535_v23  ;;  %v12551_v23 = vld [vmem:[#allocation2 + $0x92] sm:$0xff] }
 0x36f   : > { %9350 = vmatmul.mubr.f32.gmra.mrb[16].mxu1 %v12254_v62 }
 0x370   : > { %9352 = vmatprep.mubr.f32.mxu1 %v12271_v3 }
 0x373   : > { %9353 = vmatmul.mubr.f32.gmra.mrb[18].mxu1 %v12268_v2 }
 0x374   : > { %9355 = vmatprep.mubr.f32.mxu1 %v12285_v34 }
 0x377   : > { %9356 = vmatmul.mubr.f32.gmra.mrb[20].mxu1 %v12282_v14 }
 0x378   : > { %9358 = vmatprep.mubr.f32.mxu1 %v12299_v19 }
 0x37b   : > { %9359 = vmatmul.mubr.f32.gmra.mrb[22].mxu1 %v12296_v47 }
 0x37c   : > { %9361 = vmatprep.mubr.f32.mxu1 %v12313_v29 }
 0x37f   : > { %9362 = vmatmul.mubr.f32.gmra.mrb[24].mxu1 %v12310_v60 }
 0x380   : > { %9364 = vmatprep.mubr.f32.mxu1 %v12327_v63 }
 0x383   : > { %9365 = vmatmul.mubr.f32.gmra.mrb[26].mxu1 %v12324_v30 }
 0x384   : > { %9367 = vmatprep.mubr.f32.mxu1 %v12341_v57 }
 0x387   : > { %9368 = vmatmul.mubr.f32.gmra.mrb[28].mxu1 %v12338_v37 }
 0x388   : > { %9370 = vmatprep.mubr.f32.mxu1 %v12355_v39 }
 0x38b   : > { %9371 = vmatmul.mubr.f32.gmra.mrb[30].mxu1 %v12352_v20 }
 0x38c   : > { %9405 = vmatprep.mubr.f32.mxu1 %v4560_v33  ;;  %v7538_v33 = vld [vmem:[%s13066_s1 + $0x658] sm:$0xff] }
 0x38f   : > { %9406 = vmatmul.mubr.f32.vlgmr.msra.gmra.mrb[0].mxu1 %v4561_v15  ;;  %v12530_v15 = vld [vmem:[#allocation2 + $0x6a] sm:$0xff] }
 0x390   : > { %9408 = vmatprep.mubr.f32.mxu1 %v12491_v13  ;;  %10320 = vmatpush3.bf16.msra.mxu1 %v10317_v18  ;;  %v7537_v18 = vld [vmem:[%s13066_s1 + $0x650] sm:$0xff] }
 0x391   : > { %10322 = vmatprep.subr.bf16.mxu1 %v10321_v24  ;;  %v10337_v59 = vpack.c.bf16 %v7538_v33, %v7537_v18  ;;  %v7543_v18 = vld [vmem:[%s13066_s1 + $0x680] sm:$0xff]  ;;  %v7544_v33 = vld [vmem:[%s13066_s1 + $0x688] sm:$0xff] }
 0x393   : > { %9409 = vmatmul.mubr.f32.gmra.mrb[2].mxu1 %v12494_v28 }
 0x394   : > { %9411 = vmatprep.mubr.f32.mxu1 %v12503_v11  ;;  %10324 = vmatpush3.bf16.msra.mxu1 %v10321_v24  ;;  %v7539_v24 = vld [vmem:[%s13066_s1 + $0x660] sm:$0xff] }
 0x395   : > { %10326 = vmatprep.subr.bf16.mxu1 %v10325_v58 }
 0x397   : > { %9412 = vmatmul.mubr.f32.gmra.mrb[4].mxu1 %v12506_v27 }
 0x398   : > { %9414 = vmatprep.mubr.f32.mxu1 %v12515_v25  ;;  %10328 = vmatpush3.bf16.msra.mxu1 %v10325_v58  ;;  %v10341_v58 = vpack.c.bf16 %v7540_v61, %v7539_v24  ;;  %v12563_v24 = vld [vmem:[#allocation2 + $0xaa] sm:$0xff]  ;;  %v12566_v61 = vld [vmem:[#allocation2 + $0xb2] sm:$0xff] }
 0x399   : > { %10330 = vmatprep.subr.bf16.mxu1 %v10329_v38 }
 0x39b   : > { %9415 = vmatmul.mubr.f32.gmra.mrb[6].mxu1 %v12518_v4 }
 0x39c   : > { %9417 = vmatprep.mubr.f32.mxu1 %v12527_v48  ;;  %10332 = vmatpush3.bf16.msra.mxu1 %v10329_v38  ;;  %v7542_v38 = vld [vmem:[%s13066_s1 + $0x678] sm:$0xff] }
 0x39d   : > { %10334 = vmatprep.subr.bf16.mxu1 %v10333_v1  ;;  %v10345_v5 = vpack.c.bf16 %v7542_v38, %v7541_v22  ;;  %v12569_v22 = vld [vmem:[#allocation2 + $0xc2] sm:$0xff]  ;;  %v12572_v38 = vld [vmem:[#allocation2 + $0xca] sm:$0xff] }
 0x39e   : > { %13226 = vst [vmem:[#allocation13_spill] sm:$0xff] %v12569_v22  ;;  %13227 = vst [vmem:[#allocation14_spill] sm:$0xff] %v12572_v38 }
 0x39f   : > { %9418 = vmatmul.mubr.f32.gmra.mrb[8].mxu1 %v12530_v15 }
 0x3a0   : > { %9420 = vmatprep.mubr.f32.mxu1 %v12539_v54  ;;  %10336 = vmatpush3.bf16.msra.mxu1 %v10333_v1  ;;  %v12554_v1 = vld [vmem:[#allocation2 + $0x9a] sm:$0xff] }
 0x3a1   : > { %10338 = vmatprep.subr.bf16.mxu1 %v10337_v59  ;;  %13225 = vst [vmem:[#allocation12_spill] sm:$0xff] %v12554_v1 }
 0x3a3   : > { %9421 = vmatmul.mubr.f32.gmra.mrb[10].mxu1 %v12542_v12 }
 0x3a4   : > { %9423 = vmatprep.mubr.f32.mxu1 %v12551_v23  ;;  %10340 = vmatpush3.bf16.msra.mxu1 %v10337_v59  ;;  %v10349_v59 = vpack.c.bf16 %v7544_v33, %v7543_v18  ;;  %v12581_v18 = vld [vmem:[#allocation2 + $0xf2] sm:$0xff]  ;;  %v12584_v33 = vld [vmem:[#allocation2 + $0xfa] sm:$0xff] }
 0x3a5   : > { %10342 = vmatprep.subr.bf16.mxu1 %v10341_v58  ;;  %13230 = vst [vmem:[#allocation17_spill] sm:$0xff] %v12581_v18  ;;  %13231 = vst [vmem:[#allocation18_spill] sm:$0xff] %v12584_v33 }
 0x3a7   : > { %9424 = vmatmul.mubr.f32.gmra.mrb[12].mxu1 %v12554_v1  ;;  %v12575_v1 = vld [vmem:[#allocation2 + $0xda] sm:$0xff] }
 0x3a8   : > { %9426 = vmatprep.mubr.f32.mxu1 %v12563_v24  ;;  %10344 = vmatpush3.bf16.msra.mxu1 %v10341_v58  ;;  %13228 = vst [vmem:[#allocation15_spill] sm:$0xff] %v12575_v1  ;;  %v12578_v58 = vld [vmem:[#allocation2 + $0xe2] sm:$0xff] }
 0x3a9   : > { %10346 = vmatprep.subr.bf16.mxu1 %v10345_v5  ;;  %13229 = vst [vmem:[#allocation16_spill] sm:$0xff] %v12578_v58 }
 0x3ab   : > { %9427 = vmatmul.mubr.f32.gmra.mrb[14].mxu1 %v12566_v61 }
 0x3ac   : > { %9429 = vmatprep.mubr.f32.mxu1 %v12569_v22  ;;  %10348 = vmatpush3.bf16.msra.mxu1 %v10345_v5  ;;  %v12587_v5 = vld [vmem:[#allocation2 + $0x10a] sm:$0xff] }
 0x3ad   : > { %10350 = vmatprep.subr.bf16.mxu1 %v10349_v59  ;;  %13232 = vst [vmem:[#allocation19_spill] sm:$0xff] %v12587_v5 }
 0x3af   : > { %9430 = vmatmul.mubr.f32.gmra.mrb[16].mxu1 %v12572_v38  ;;  %v12590_v38 = vld [vmem:[#allocation2 + $0x112] sm:$0xff] }
 0x3b0   : > { %9432 = vmatprep.mubr.f32.mxu1 %v12575_v1  ;;  %13233 = vst [vmem:[#allocation20_spill] sm:$0xff] %v12590_v38  ;;  %v12593_v1 = vld [vmem:[#allocation2 + $0x122] sm:$0xff] }
 0x3b1   : > { %13234 = vst [vmem:[#allocation21_spill] sm:$0xff] %v12593_v1 }
 0x3b3   : > { %9433 = vmatmul.mubr.f32.gmra.mrb[18].mxu1 %v12578_v58  ;;  %v12596_v58 = vld [vmem:[#allocation2 + $0x12a] sm:$0xff] }
 0x3b4   : > { %9435 = vmatprep.mubr.f32.mxu1 %v12581_v18  ;;  %13235 = vst [vmem:[#allocation22_spill] sm:$0xff] %v12596_v58  ;;  %v12599_v18 = vld [vmem:[#allocation2 + $0x13a] sm:$0xff] }
 0x3b5   : > { %13236 = vst [vmem:[#allocation23_spill] sm:$0xff] %v12599_v18 }
 0x3b7   : > { %9436 = vmatmul.mubr.f32.gmra.mrb[20].mxu1 %v12584_v33  ;;  %v12602_v33 = vld [vmem:[#allocation2 + $0x142] sm:$0xff] }
 0x3b8   : > { %9438 = vmatprep.mubr.f32.mxu1 %v12587_v5  ;;  %13237 = vst [vmem:[#allocation24_spill] sm:$0xff] %v12602_v33  ;;  %v12605_v5 = vld [vmem:[#allocation2 + $0x152] sm:$0xff] }
 0x3b9   : > { %13238 = vst [vmem:[#allocation25_spill] sm:$0xff] %v12605_v5 }
 0x3bb   : > { %9439 = vmatmul.mubr.f32.gmra.mrb[22].mxu1 %v12590_v38  ;;  %v12608_v38 = vld [vmem:[#allocation2 + $0x15a] sm:$0xff] }
 0x3bc   : > { %9441 = vmatprep.mubr.f32.mxu1 %v12593_v1  ;;  %13239 = vst [vmem:[#allocation26_spill] sm:$0xff] %v12608_v38  ;;  %v12611_v1 = vld [vmem:[#allocation2 + $0x16a] sm:$0xff] }
 0x3bd   : > { %13240 = vst [vmem:[#allocation27_spill] sm:$0xff] %v12611_v1 }
 0x3bf   : > { %9442 = vmatmul.mubr.f32.gmra.mrb[24].mxu1 %v12596_v58  ;;  %v12614_v58 = vld [vmem:[#allocation2 + $0x172] sm:$0xff] }
 0x3c0   : > { %9444 = vmatprep.mubr.f32.mxu1 %v12599_v18  ;;  %v7545_v18 = vld [vmem:[%s13066_s1 + $0x690] sm:$0xff] }
 0x3c3   : > { %9445 = vmatmul.mubr.f32.gmra.mrb[26].mxu1 %v12602_v33  ;;  %v7546_v33 = vld [vmem:[%s13066_s1 + $0x698] sm:$0xff] }
 0x3c4   : > { %9447 = vmatprep.mubr.f32.mxu1 %v12605_v5  ;;  %v10353_v5 = vpack.c.bf16 %v7546_v33, %v7545_v18  ;;  %v7550_v18 = vld [vmem:[%s13066_s1 + $0x6b8] sm:$0xff]  ;;  %v7560_v33 = vld [vmem:[%s13066_s1 + $0x708] sm:$0xff] }
 0x3c7   : > { %9448 = vmatmul.mubr.f32.gmra.mrb[28].mxu1 %v12608_v38  ;;  %v7547_v38 = vld [vmem:[%s13066_s1 + $0x6a0] sm:$0xff] }
 0x3c8   : > { %9450 = vmatprep.mubr.f32.mxu1 %v12611_v1  ;;  %v7548_v1 = vld [vmem:[%s13066_s1 + $0x6a8] sm:$0xff] }
 0x3c9   : > { %v10357_v22 = vpack.c.bf16 %v7548_v1, %v7547_v38  ;;  %v7552_v1 = vld [vmem:[%s13066_s1 + $0x6c8] sm:$0xff]  ;;  %v7558_v38 = vld [vmem:[%s13066_s1 + $0x6f8] sm:$0xff] }
 0x3cb   : > { %9451 = vmatmul.mubr.f32.gmra.mrb[30].mxu1 %v12614_v58 }
 0x3cc   : > { %9485 = vmatprep.mubr.f32.mxu1 %v12182_v50  ;;  %v7549_v50 = vld [vmem:[%s13066_s1 + $0x6b0] sm:$0xff] }
 0x3cf   : > { %9486 = vmatmul.mubr.f32.vlgmr.msra.gmra.mrb[0].mxu1 %v12184_v10  ;;  %v10361_v10 = vpack.c.bf16 %v7550_v18, %v7549_v50  ;;  %v7563_v50 = vld [vmem:[%s13066_s1 + $0x720] sm:$0xff]  ;;  %v7564_v18 = vld [vmem:[%s13066_s1 + $0x728] sm:$0xff] }
 0x3d0   : > { %9488 = vmatprep.mubr.f32.mxu1 %v12200_v21  ;;  %10352 = vmatpush3.bf16.msra.mxu1 %v10349_v59  ;;  %v7551_v21 = vld [vmem:[%s13066_s1 + $0x6c0] sm:$0xff]  ;;  %v7554_v59 = vld [vmem:[%s13066_s1 + $0x6d8] sm:$0xff] }
 0x3d1   : > { %10354 = vmatprep.subr.bf16.mxu1 %v10353_v5 }
 0x3d3   : > { %9489 = vmatmul.mubr.f32.gmra.mrb[2].mxu1 %v12202_v49  ;;  %v10365_v49 = vpack.c.bf16 %v7552_v1, %v7551_v21  ;;  %v10389_v21 = vpack.c.bf16 %v7564_v18, %v7563_v50  ;;  %v12716_v1 = vld [vmem:[#allocation2 + $0x39] sm:$0xff] }
 0x3d4   : > { %9491 = vmatprep.mubr.f32.mxu1 %v12218_v35  ;;  %10356 = vmatpush3.bf16.msra.mxu1 %v10353_v5  ;;  %v7553_v35 = vld [vmem:[%s13066_s1 + $0x6d0] sm:$0xff]  ;;  %v13253_v18 = vld [vmem:[#allocation14_spill] sm:$0xff] }
 0x3d5   : > { %10358 = vmatprep.subr.bf16.mxu1 %v10357_v22 }
 0x3d7   : > { %9492 = vmatmul.mubr.f32.gmra.mrb[4].mxu1 %v12220_v36  ;;  %v10369_v36 = vpack.c.bf16 %v7554_v59, %v7553_v35  ;;  %v7566_v35 = vld [vmem:[%s13066_s1 + $0x738] sm:$0xff]  ;;  %v12725_v59 = vld [vmem:[#allocation2 + $0x49] sm:$0xff] }
 0x3d8   : > { %9494 = vmatprep.mubr.f32.mxu1 %v12233_v51  ;;  %10360 = vmatpush3.bf16.msra.mxu1 %v10357_v22  ;;  %v7555_v51 = vld [vmem:[%s13066_s1 + $0x6e0] sm:$0xff]  ;;  %v7556_v22 = vld [vmem:[%s13066_s1 + $0x6e8] sm:$0xff] }
 0x3d9   : > { %10362 = vmatprep.subr.bf16.mxu1 %v10361_v10 }
 0x3db   : > { %9495 = vmatmul.mubr.f32.gmra.mrb[6].mxu1 %v12235_v42  ;;  %v10373_v42 = vpack.c.bf16 %v7556_v22, %v7555_v51  ;;  %v12728_v51 = vld [vmem:[#allocation2 + $0x51] sm:$0xff]  ;;  %v7567_v22 = vld [vmem:[%s13066_s1 + $0x740] sm:$0xff] }
 0x3dc   : > { %9497 = vmatprep.mubr.f32.mxu1 %v12247_v55  ;;  %10364 = vmatpush3.bf16.msra.mxu1 %v10361_v10  ;;  %v7557_v55 = vld [vmem:[%s13066_s1 + $0x6f0] sm:$0xff] }
 0x3dd   : > { %10366 = vmatprep.subr.bf16.mxu1 %v10365_v49  ;;  %v12713_v10 = vld [vmem:[#allocation2 + $0x31] sm:$0xff] }
 0x3df   : > { %9498 = vmatmul.mubr.f32.gmra.mrb[8].mxu1 %v12249_v56  ;;  %v10377_v56 = vpack.c.bf16 %v7558_v38, %v7557_v55  ;;  %v12737_v55 = vld [vmem:[#allocation2 + $0x61] sm:$0xff] }
 0x3e0   : > { %9500 = vmatprep.mubr.f32.mxu1 %v12261_v17  ;;  %10368 = vmatpush3.bf16.msra.mxu1 %v10365_v49  ;;  %v7559_v17 = vld [vmem:[%s13066_s1 + $0x700] sm:$0xff]  ;;  %v7565_v49 = vld [vmem:[%s13066_s1 + $0x730] sm:$0xff] }
 0x3e1   : > { %10370 = vmatprep.subr.bf16.mxu1 %v10369_v36 }
 0x3e3   : > { %9501 = vmatmul.mubr.f32.gmra.mrb[10].mxu1 %v12263_v32  ;;  %v10381_v32 = vpack.c.bf16 %v7560_v33, %v7559_v17  ;;  %v7569_v17 = vld [vmem:[%s13066_s1 + $0x750] sm:$0xff]  ;;  %v7570_v33 = vld [vmem:[%s13066_s1 + $0x758] sm:$0xff] }
 0x3e4   : > { %9503 = vmatprep.mubr.f32.mxu1 %v12275_v6  ;;  %10372 = vmatpush3.bf16.msra.mxu1 %v10369_v36  ;;  %v13241_v6 = vld [vmem:[#allocation4_spill] sm:$0xff]  ;;  %v10393_v36 = vpack.c.bf16 %v7566_v35, %v7565_v49  ;;  %v13256_v49 = vld [vmem:[#allocation17_spill] sm:$0xff]  ;;  %v13257_v35 = vld [vmem:[#allocation18_spill] sm:$0xff] }
 0x3e5   : > { %10374 = vmatprep.subr.bf16.mxu1 %v10373_v42 }
 0x3e7   : > { %9504 = vmatmul.mubr.f32.gmra.mrb[12].mxu1 %v12277_v16  ;;  %v13242_v16 = vld [vmem:[#allocation6_spill] sm:$0xff] }
 0x3e8   : > { %9506 = vmatprep.mubr.f32.mxu1 %v12289_v41  ;;  %10376 = vmatpush3.bf16.msra.mxu1 %v10373_v42  ;;  %v13243_v41 = vld [vmem:[#allocation7_spill] sm:$0xff] }
 0x3e9   : > { %10378 = vmatprep.subr.bf16.mxu1 %v10377_v56  ;;  %v7568_v42 = vld [vmem:[%s13066_s1 + $0x748] sm:$0xff] }
 0x3ea   : > { %v10397_v38 = vpack.c.bf16 %v7568_v42, %v7567_v22  ;;  %v13260_v22 = vld [vmem:[#allocation21_spill] sm:$0xff]  ;;  %v13261_v42 = vld [vmem:[#allocation22_spill] sm:$0xff] }
 0x3eb   : > { %9507 = vmatmul.mubr.f32.gmra.mrb[14].mxu1 %v12291_v43  ;;  %v13244_v43 = vld [vmem:[#allocation9_spill] sm:$0xff] }
 0x3ec   : > { %9509 = vmatprep.mubr.f32.mxu1 %v12303_v7  ;;  %10380 = vmatpush3.bf16.msra.mxu1 %v10377_v56  ;;  %v13245_v7 = vld [vmem:[#allocation10_spill] sm:$0xff]  ;;  %v12740_v56 = vld [vmem:[#allocation2 + $0x69] sm:$0xff] }
 0x3ed   : > { %10382 = vmatprep.subr.bf16.mxu1 %v10381_v32 }
 0x3ef   : > { %9510 = vmatmul.mubr.f32.gmra.mrb[16].mxu1 %v12305_v53  ;;  %v13246_v53 = vld [vmem:[#allocation11_spill] sm:$0xff] }
 0x3f0   : > { %9512 = vmatprep.mubr.f32.mxu1 %v12317_v40  ;;  %v12695_v40 = vld [vmem:[#allocation2 + $0x180] sm:$0xff] }
 0x3f3   : > { %9513 = vmatmul.mubr.f32.gmra.mrb[18].mxu1 %v12319_v46  ;;  %v5300_v46 = vld [vmem:[#allocation2 + $0x19] sm:$0xff] }
 0x3f4   : > { %9515 = vmatprep.mubr.f32.mxu1 %v12331_v31  ;;  %v12698_v31 = vld [vmem:[#allocation2 + $0x188] sm:$0xff] }
 0x3f7   : > { %9516 = vmatmul.mubr.f32.gmra.mrb[20].mxu1 %v12333_v8  ;;  %v7562_v8 = vld [vmem:[%s13066_s1 + $0x718] sm:$0xff] }
 0x3f8   : > { %9518 = vmatprep.mubr.f32.mxu1 %v12345_v0  ;;  %v7561_v0 = vld [vmem:[%s13066_s1 + $0x710] sm:$0xff] }
 0x3f9   : > { %v10385_v5 = vpack.c.bf16 %v7562_v8, %v7561_v0  ;;  %v7573_v0 = vld [vmem:[%s13066_s1 + $0x770] sm:$0xff]  ;;  %v7574_v8 = vld [vmem:[%s13066_s1 + $0x778] sm:$0xff] }
 0x3fb   : > { %9519 = vmatmul.mubr.f32.gmra.mrb[22].mxu1 %v13241_v6  ;;  %v10401_v6 = vpack.c.bf16 %v7570_v33, %v7569_v17  ;;  %v13263_v17 = vld [vmem:[#allocation24_spill] sm:$0xff]  ;;  %v13264_v33 = vld [vmem:[#allocation25_spill] sm:$0xff] }
 0x3fc   : > { %9521 = vmatprep.mubr.f32.mxu1 %v13242_v16  ;;  %v12752_v16 = vld [vmem:[#allocation2 + $0x81] sm:$0xff] }
 0x3ff   : > { %9522 = vmatmul.mubr.f32.gmra.mrb[24].mxu1 %v13243_v41  ;;  %v7571_v41 = vld [vmem:[%s13066_s1 + $0x760] sm:$0xff] }
 0x400   : > { %9524 = vmatprep.mubr.f32.mxu1 %v13244_v43  ;;  %v7572_v43 = vld [vmem:[%s13066_s1 + $0x768] sm:$0xff] }
 0x403   : > { %9525 = vmatmul.mubr.f32.gmra.mrb[26].mxu1 %v13245_v7  ;;  %v10405_v7 = vpack.c.bf16 %v7572_v43, %v7571_v41  ;;  %v13266_v41 = vld [vmem:[#allocation27_spill] sm:$0xff] }
 0x404   : > { %9527 = vmatprep.mubr.f32.mxu1 %v13246_v53  ;;  %v12762_v53 = vld [vmem:[#allocation2 + $0x99] sm:$0xff]  ;;  %v12877_v43 = vld [vmem:[#allocation2 + $0x182] sm:$0xff] }
 0x407   : > { %9528 = vmatmul.mubr.f32.gmra.mrb[28].mxu1 %v12385_v9  ;;  %v5301_v9 = vld [vmem:[#allocation2 + $0x21] sm:$0xff] }
 0x408   : > { %9530 = vmatprep.mubr.f32.mxu1 %v12695_v40 }
 0x40b   : > { %9531 = vmatmul.mubr.f32.gmra.mrb[30].mxu1 %v12698_v31 }
 0x40c   : > { %9565 = vmatprep.mubr.f32.mxu1 %v5300_v46  ;;  %v7575_v46 = vld [vmem:[%s13066_s1 + $0x780] sm:$0xff] }
 0x40f   : > { %9566 = vmatmul.mubr.f32.vlgmr.msra.gmra.mrb[0].mxu1 %v5301_v9 }
 0x410   : > { %9568 = vmatprep.mubr.f32.mxu1 %v12713_v10  ;;  %10384 = vmatpush3.bf16.msra.mxu1 %v10381_v32  ;;  %v12749_v32 = vld [vmem:[#allocation2 + $0x79] sm:$0xff] }
 0x411   : > { %10386 = vmatprep.subr.bf16.mxu1 %v10385_v5 }
 0x413   : > { %9569 = vmatmul.mubr.f32.gmra.mrb[2].mxu1 %v12716_v1 }
 0x414   : > { %9571 = vmatprep.mubr.f32.mxu1 %v12725_v59  ;;  %10388 = vmatpush3.bf16.msra.mxu1 %v10385_v5  ;;  %v7576_v5 = vld [vmem:[%s13066_s1 + $0x788] sm:$0xff] }
 0x415   : > { %10390 = vmatprep.subr.bf16.mxu1 %v10389_v21  ;;  %v10413_v9 = vpack.c.bf16 %v7576_v5, %v7575_v46  ;;  %v7595_v5 = vld [vmem:[%s13066_s1 + $0x820] sm:$0xff] }
 0x417   : > { %9572 = vmatmul.mubr.f32.gmra.mrb[4].mxu1 %v12728_v51 }
 0x418   : > { %9574 = vmatprep.mubr.f32.mxu1 %v12737_v55  ;;  %10392 = vmatpush3.bf16.msra.mxu1 %v10389_v21  ;;  %v13255_v21 = vld [vmem:[#allocation16_spill] sm:$0xff] }
 0x419   : > { %10394 = vmatprep.subr.bf16.mxu1 %v10393_v36 }
 0x41b   : > { %9575 = vmatmul.mubr.f32.gmra.mrb[6].mxu1 %v12740_v56 }
 0x41c   : > { %9577 = vmatprep.mubr.f32.mxu1 %v12749_v32  ;;  %10396 = vmatpush3.bf16.msra.mxu1 %v10393_v36  ;;  %v13258_v36 = vld [vmem:[#allocation19_spill] sm:$0xff] }
 0x41d   : > { %10398 = vmatprep.subr.bf16.mxu1 %v10397_v38 }
 0x41f   : > { %9578 = vmatmul.mubr.f32.gmra.mrb[8].mxu1 %v12752_v16 }
 0x420   : > { %9580 = vmatprep.mubr.f32.mxu1 %v12228_v52  ;;  %10400 = vmatpush3.bf16.msra.mxu1 %v10397_v38  ;;  %v10409_v52 = vpack.c.bf16 %v7574_v8, %v7573_v0  ;;  %v13262_v38 = vld [vmem:[#allocation23_spill] sm:$0xff]  ;;  %v7593_v0 = vld [vmem:[%s13066_s1 + $0x810] sm:$0xff]  ;;  %v7594_v8 = vld [vmem:[%s13066_s1 + $0x818] sm:$0xff] }
 0x421   : > { %10402 = vmatprep.subr.bf16.mxu1 %v10401_v6  ;;  %v10449_v46 = vpack.c.bf16 %v7594_v8, %v7593_v0  ;;  %v6067_v0 = vld [vmem:[#allocation2 + $0x170] sm:$0xff]  ;;  %v11031_v8 = vld [vmem:[#allocation2] sm:$0xff] }
 0x423   : > { %9581 = vmatmul.mubr.f32.gmra.mrb[10].mxu1 %v12762_v53 }
 0x424   : > { %9583 = vmatprep.mubr.f32.mxu1 %v12243_v45  ;;  %10404 = vmatpush3.bf16.msra.mxu1 %v10401_v6  ;;  %v13265_v6 = vld [vmem:[#allocation26_spill] sm:$0xff] }
 0x425   : > { %10406 = vmatprep.subr.bf16.mxu1 %v10405_v7 }
 0x427   : > { %9584 = vmatmul.mubr.f32.gmra.mrb[12].mxu1 %v12240_v44  ;;  %v13247_v44 = vld [vmem:[#allocation8_spill] sm:$0xff] }
 0x428   : > { %9586 = vmatprep.mubr.f32.mxu1 %v12257_v26  ;;  %10408 = vmatpush3.bf16.msra.mxu1 %v10405_v7  ;;  %v13248_v45 = vmax.f32 %v13247_v44, 0.0  ;;  %v7578_v26 = vld [vmem:[%s13066_s1 + $0x798] sm:$0xff]  ;;  %v12880_v7 = vld [vmem:[#allocation2 + $0x18a] sm:$0xff] }
 0x429   : > { %10410 = vmatprep.subr.bf16.mxu1 %v10409_v52  ;;  %v6042_v44 = vld [vmem:[#allocation2 + $0x48] sm:$0xff] }
 0x42b   : > { %9587 = vmatmul.mubr.f32.gmra.mrb[14].mxu1 %v12254_v62  ;;  %v7577_v62 = vld [vmem:[%s13066_s1 + $0x790] sm:$0xff] }
 0x42c   : > { %9589 = vmatprep.mubr.f32.mxu1 %v12271_v3  ;;  %10412 = vmatpush3.bf16.msra.mxu1 %v10409_v52  ;;  %v6040_v52 = vld [vmem:[#allocation2 + $0x30] sm:$0xff] }
 0x42d   : > { %10414 = vmatprep.subr.bf16.mxu1 %v10413_v9 }
 0x42f   : > { %9590 = vmatmul.mubr.f32.gmra.mrb[16].mxu1 %v12268_v2  ;;  %v13249_v2 = vld [vmem:[#allocation5_spill] sm:$0xff] }
 0x430   : > { %9592 = vmatprep.mubr.f32.mxu1 %v12285_v34  ;;  %v13250_v3 = vmax.f32 %v13249_v2, 0.0  ;;  %v7579_v34 = vld [vmem:[%s13066_s1 + $0x7a0] sm:$0xff]  ;;  %v7598_v2 = vld [vmem:[%s13066_s1 + $0x838] sm:$0xff] }
 0x433   : > { %9593 = vmatmul.mubr.f32.gmra.mrb[18].mxu1 %v12282_v14  ;;  %v10417_v14 = vpack.c.bf16 %v7578_v26, %v7577_v62  ;;  %v6043_v62 = vld [vmem:[#allocation2 + $0x50] sm:$0xff] }
 0x434   : > { %9595 = vmatprep.mubr.f32.mxu1 %v12299_v19  ;;  %v7597_v26 = vld [vmem:[%s13066_s1 + $0x830] sm:$0xff] }
 0x437   : > { %9596 = vmatmul.mubr.f32.gmra.mrb[20].mxu1 %v12296_v47  ;;  %v7580_v47 = vld [vmem:[%s13066_s1 + $0x7a8] sm:$0xff] }
 0x438   : > { %9598 = vmatprep.mubr.f32.mxu1 %v12313_v29  ;;  %v10421_v19 = vpack.c.bf16 %v7580_v47, %v7579_v34  ;;  %v7582_v29 = vld [vmem:[%s13066_s1 + $0x7b8] sm:$0xff]  ;;  %v6045_v34 = vld [vmem:[#allocation2 + $0x68] sm:$0xff]  ;;  %v7599_v47 = vld [vmem:[%s13066_s1 + $0x840] sm:$0xff] }
 0x43b   : > { %9599 = vmatmul.mubr.f32.gmra.mrb[22].mxu1 %v12310_v60  ;;  %v7581_v60 = vld [vmem:[%s13066_s1 + $0x7b0] sm:$0xff] }
 0x43c   : > { %9601 = vmatprep.mubr.f32.mxu1 %v12327_v63  ;;  %v7583_v63 = vld [vmem:[%s13066_s1 + $0x7c0] sm:$0xff] }
 0x43f   : > { %9602 = vmatmul.mubr.f32.gmra.mrb[24].mxu1 %v12324_v30  ;;  %v10425_v30 = vpack.c.bf16 %v7582_v29, %v7581_v60  ;;  %v6046_v60 = vld [vmem:[#allocation2 + $0x78] sm:$0xff] }
 0x440   : > { %9604 = vmatprep.mubr.f32.mxu1 %v12341_v57 }
 0x443   : > { %9605 = vmatmul.mubr.f32.gmra.mrb[26].mxu1 %v12338_v37  ;;  %v7584_v37 = vld [vmem:[%s13066_s1 + $0x7c8] sm:$0xff] }
 0x444   : > { %9607 = vmatprep.mubr.f32.mxu1 %v12355_v39  ;;  %v10429_v57 = vpack.c.bf16 %v7584_v37, %v7583_v63  ;;  %v7586_v39 = vld [vmem:[%s13066_s1 + $0x7d8] sm:$0xff]  ;;  %v7601_v63 = vld [vmem:[%s13066_s1 + $0x850] sm:$0xff] }
 0x445   : > { %v7602_v37 = vld [vmem:[%s13066_s1 + $0x858] sm:$0xff] }
 0x447   : > { %9608 = vmatmul.mubr.f32.gmra.mrb[28].mxu1 %v12352_v20  ;;  %v7585_v20 = vld [vmem:[%s13066_s1 + $0x7d0] sm:$0xff] }
 0x448   : > { %9610 = vmatprep.mubr.f32.mxu1 %v13248_v45 }
 0x44b   : > { %9611 = vmatmul.mubr.f32.gmra.mrb[30].mxu1 %v13250_v3  ;;  %v6044_v3 = vld [vmem:[#allocation2 + $0x60] sm:$0xff] }
 0x44c   : > { %9645 = vmatprep.mubr.f32.mxu1 %v12491_v13  ;;  %v10433_v13 = vpack.c.bf16 %v7586_v39, %v7585_v20  ;;  %v10465_v20 = vpack.c.bf16 %v7602_v37, %v7601_v63  ;;  %v6049_v39 = vld [vmem:[#allocation2 + $0x98] sm:$0xff]  ;;  %v6428_v37 = vld [vmem:[#allocation2 + $0x109] sm:$0xff] }
 0x44d   : > { %v6427_v63 = vld [vmem:[#allocation2 + $0xf9] sm:$0xff] }
 0x44f   : > { %9646 = vmatmul.mubr.f32.vlgmr.msra.gmra.mrb[0].mxu1 %v12494_v28  ;;  %v7587_v28 = vld [vmem:[%s13066_s1 + $0x7e0] sm:$0xff] }
 0x450   : > { %9648 = vmatprep.mubr.f32.mxu1 %v12503_v11  ;;  %10416 = vmatpush3.bf16.msra.mxu1 %v10413_v9  ;;  %v7588_v11 = vld [vmem:[%s13066_s1 + $0x7e8] sm:$0xff] }
 0x451   : > { %10418 = vmatprep.subr.bf16.mxu1 %v10417_v14  ;;  %v7596_v9 = vld [vmem:[%s13066_s1 + $0x828] sm:$0xff] }
 0x452   : > { %v10453_v45 = vpack.c.bf16 %v7596_v9, %v7595_v5  ;;  %v7614_v9 = vld [vmem:[%s13066_s1 + $0x8b8] sm:$0xff] }
 0x453   : > { %9649 = vmatmul.mubr.f32.gmra.mrb[2].mxu1 %v12506_v27  ;;  %v10437_v27 = vpack.c.bf16 %v7588_v11, %v7587_v28  ;;  %v7604_v28 = vld [vmem:[%s13066_s1 + $0x868] sm:$0xff] }
 0x454   : > { %9651 = vmatprep.mubr.f32.mxu1 %v12515_v25  ;;  %10420 = vmatpush3.bf16.msra.mxu1 %v10417_v14  ;;  %v7589_v25 = vld [vmem:[%s13066_s1 + $0x7f0] sm:$0xff]  ;;  %v10457_v14 = vpack.c.bf16 %v7598_v2, %v7597_v26  ;;  %v6050_v11 = vld [vmem:[#allocation2 + $0xa8] sm:$0xff] }
 0x455   : > { %10422 = vmatprep.subr.bf16.mxu1 %v10421_v19  ;;  %v7620_v26 = vld [vmem:[%s13066_s1 + $0x8e8] sm:$0xff] }
 0x456   : > { %v6420_v2 = vld [vmem:[#allocation2 + $0xa9] sm:$0xff] }
 0x457   : > { %9652 = vmatmul.mubr.f32.gmra.mrb[4].mxu1 %v12518_v4  ;;  %v7590_v4 = vld [vmem:[%s13066_s1 + $0x7f8] sm:$0xff] }
 0x458   : > { %9654 = vmatprep.mubr.f32.mxu1 %v12527_v48  ;;  %10424 = vmatpush3.bf16.msra.mxu1 %v10421_v19  ;;  %v13251_v48 = vld [vmem:[#allocation12_spill] sm:$0xff]  ;;  %v7600_v19 = vld [vmem:[%s13066_s1 + $0x848] sm:$0xff] }
 0x459   : > { %10426 = vmatprep.subr.bf16.mxu1 %v10425_v30  ;;  %v10461_v29 = vpack.c.bf16 %v7600_v19, %v7599_v47  ;;  %v6422_v47 = vld [vmem:[#allocation2 + $0xc1] sm:$0xff]  ;;  %v6423_v19 = vld [vmem:[#allocation2 + $0xc9] sm:$0xff] }
 0x45b   : > { %9655 = vmatmul.mubr.f32.gmra.mrb[6].mxu1 %v12530_v15  ;;  %v10441_v15 = vpack.c.bf16 %v7590_v4, %v7589_v25  ;;  %v6051_v25 = vld [vmem:[#allocation2 + $0xb0] sm:$0xff] }
 0x45c   : > { %9657 = vmatprep.mubr.f32.mxu1 %v12539_v54  ;;  %10428 = vmatpush3.bf16.msra.mxu1 %v10425_v30  ;;  %v7591_v54 = vld [vmem:[%s13066_s1 + $0x800] sm:$0xff]  ;;  %v7605_v4 = vld [vmem:[%s13066_s1 + $0x870] sm:$0xff] }
 0x45d   : > { %10430 = vmatprep.subr.bf16.mxu1 %v10429_v57  ;;  %v6047_v30 = vld [vmem:[#allocation2 + $0x80] sm:$0xff] }
 0x45f   : > { %9658 = vmatmul.mubr.f32.gmra.mrb[8].mxu1 %v12542_v12  ;;  %v7592_v12 = vld [vmem:[%s13066_s1 + $0x808] sm:$0xff] }
 0x460   : > { %9660 = vmatprep.mubr.f32.mxu1 %v12551_v23  ;;  %10432 = vmatpush3.bf16.msra.mxu1 %v10429_v57  ;;  %v13252_v23 = vld [vmem:[#allocation13_spill] sm:$0xff]  ;;  %v10445_v50 = vpack.c.bf16 %v7592_v12, %v7591_v54  ;;  %v6048_v57 = vld [vmem:[#allocation2 + $0x90] sm:$0xff]  ;;  %v6053_v12 = vld [vmem:[#allocation2 + $0xc8] sm:$0xff] }
 0x461   : > { %10434 = vmatprep.subr.bf16.mxu1 %v10433_v13 }
 0x463   : > { %9661 = vmatmul.mubr.f32.gmra.mrb[10].mxu1 %v13251_v48  ;;  %v7606_v48 = vld [vmem:[%s13066_s1 + $0x878] sm:$0xff] }
 0x464   : > { %9663 = vmatprep.mubr.f32.mxu1 %v12563_v24  ;;  %10436 = vmatpush3.bf16.msra.mxu1 %v10433_v13  ;;  %v13254_v24 = vld [vmem:[#allocation15_spill] sm:$0xff]  ;;  %v7603_v13 = vld [vmem:[%s13066_s1 + $0x860] sm:$0xff]  ;;  %v10473_v54 = vpack.c.bf16 %v7606_v48, %v7605_v4  ;;  %v6437_v4 = vld [vmem:[#allocation2 + $0x171] sm:$0xff] }
 0x465   : > { %10438 = vmatprep.subr.bf16.mxu1 %v10437_v27  ;;  %v6438_v48 = vld [vmem:[#allocation2 + $0x181] sm:$0xff] }
 0x467   : > { %9664 = vmatmul.mubr.f32.gmra.mrb[12].mxu1 %v12566_v61  ;;  %v13259_v61 = vld [vmem:[#allocation20_spill] sm:$0xff] }
 0x468   : > { %9666 = vmatprep.mubr.f32.mxu1 %v13252_v23  ;;  %10440 = vmatpush3.bf16.msra.mxu1 %v10437_v27  ;;  %v10469_v27 = vpack.c.bf16 %v7604_v28, %v7603_v13  ;;  %v7607_v23 = vld [vmem:[%s13066_s1 + $0x880] sm:$0xff] }
 0x469   : > { %10442 = vmatprep.subr.bf16.mxu1 %v10441_v15  ;;  %v6432_v13 = vld [vmem:[#allocation2 + $0x139] sm:$0xff]  ;;  %v6433_v28 = vld [vmem:[#allocation2 + $0x141] sm:$0xff] }
 0x46b   : > { %9667 = vmatmul.mubr.f32.gmra.mrb[14].mxu1 %v13253_v18  ;;  %v6054_v18 = vld [vmem:[#allocation2 + $0xd8] sm:$0xff] }
 0x46c   : > { %9669 = vmatprep.mubr.f32.mxu1 %v13254_v24  ;;  %10444 = vmatpush3.bf16.msra.mxu1 %v10441_v15  ;;  %v6052_v15 = vld [vmem:[#allocation2 + $0xc0] sm:$0xff] }
 0x46d   : > { %10446 = vmatprep.subr.bf16.mxu1 %v10445_v50 }
 0x46f   : > { %9670 = vmatmul.mubr.f32.gmra.mrb[16].mxu1 %v13255_v21  ;;  %v6055_v21 = vld [vmem:[#allocation2 + $0xe0] sm:$0xff] }
 0x470   : > { %9672 = vmatprep.mubr.f32.mxu1 %v13256_v49  ;;  %v6056_v49 = vld [vmem:[#allocation2 + $0xf0] sm:$0xff] }
 0x473   : > { %9673 = vmatmul.mubr.f32.gmra.mrb[18].mxu1 %v13257_v35  ;;  %v6057_v35 = vld [vmem:[#allocation2 + $0xf8] sm:$0xff] }
 0x474   : > { %9675 = vmatprep.mubr.f32.mxu1 %v13258_v36  ;;  %v6058_v36 = vld [vmem:[#allocation2 + $0x108] sm:$0xff] }
 0x477   : > { %9676 = vmatmul.mubr.f32.gmra.mrb[20].mxu1 %v13259_v61  ;;  %v6059_v61 = vld [vmem:[#allocation2 + $0x110] sm:$0xff] }
 0x478   : > { %9678 = vmatprep.mubr.f32.mxu1 %v13260_v22  ;;  %v6060_v22 = vld [vmem:[#allocation2 + $0x120] sm:$0xff] }
 0x47b   : > { %9679 = vmatmul.mubr.f32.gmra.mrb[22].mxu1 %v13261_v42  ;;  %v6061_v42 = vld [vmem:[#allocation2 + $0x128] sm:$0xff] }
 0x47c   : > { %9681 = vmatprep.mubr.f32.mxu1 %v13262_v38  ;;  %v6062_v38 = vld [vmem:[#allocation2 + $0x138] sm:$0xff] }
 0x47f   : > { %9682 = vmatmul.mubr.f32.gmra.mrb[24].mxu1 %v13263_v17  ;;  %v6063_v17 = vld [vmem:[#allocation2 + $0x140] sm:$0xff] }
 0x480   : > { %9684 = vmatprep.mubr.f32.mxu1 %v13264_v33  ;;  %v6064_v33 = vld [vmem:[#allocation2 + $0x150] sm:$0xff] }
 0x483   : > { %9685 = vmatmul.mubr.f32.gmra.mrb[26].mxu1 %v13265_v6  ;;  %v6065_v6 = vld [vmem:[#allocation2 + $0x158] sm:$0xff] }
 0x484   : > { %9687 = vmatprep.mubr.f32.mxu1 %v13266_v41  ;;  %v6066_v41 = vld [vmem:[#allocation2 + $0x168] sm:$0xff] }
 0x487   : > { %9688 = vmatmul.mubr.f32.gmra.mrb[28].mxu1 %v12614_v58  ;;  %v6041_v58 = vld [vmem:[#allocation2 + $0x38] sm:$0xff] }
 0x488   : > { %9690 = vmatprep.mubr.f32.mxu1 %v12877_v43 }
 0x48b   : > { %9691 = vmatmul.mubr.f32.gmra.mrb[30].mxu1 %v12880_v7 }
 0x48c   : > { %9725 = vmatprep.mubr.f32.mxu1 %v6040_v52  ;;  %v7609_v52 = vld [vmem:[%s13066_s1 + $0x890] sm:$0xff] }
 0x48f   : > { %9726 = vmatmul.mubr.f32.vlgmr.msra.gmra.mrb[0].mxu1 %v6041_v58 }
 0x490   : > { %9728 = vmatprep.mubr.f32.mxu1 %v6042_v44  ;;  %10448 = vmatpush3.bf16.msra.mxu1 %v10445_v50  ;;  %v7608_v50 = vld [vmem:[%s13066_s1 + $0x888] sm:$0xff] }
 0x491   : > { %10450 = vmatprep.subr.bf16.mxu1 %v10449_v46  ;;  %v10477_v24 = vpack.c.bf16 %v7608_v50, %v7607_v23  ;;  %v7616_v44 = vld [vmem:[%s13066_s1 + $0x8c8] sm:$0xff]  ;;  %v6780_v23 = vld [vmem:[#allocation2 + $0x32] sm:$0xff]  ;;  %v6781_v50 = vld [vmem:[#allocation2 + $0x3a] sm:$0xff] }
 0x493   : > { %9729 = vmatmul.mubr.f32.gmra.mrb[2].mxu1 %v6043_v62  ;;  %v6418_v62 = vld [vmem:[#allocation2 + $0x91] sm:$0xff] }
 0x494   : > { %9731 = vmatprep.mubr.f32.mxu1 %v6044_v3  ;;  %10452 = vmatpush3.bf16.msra.mxu1 %v10449_v46  ;;  %v7610_v46 = vld [vmem:[%s13066_s1 + $0x898] sm:$0xff] }
 0x495   : > { %10454 = vmatprep.subr.bf16.mxu1 %v10453_v45  ;;  %v10481_v58 = vpack.c.bf16 %v7610_v46, %v7609_v52  ;;  %v6421_v3 = vld [vmem:[#allocation2 + $0xb1] sm:$0xff] }
 0x496   : > { %v6798_v52 = vld [vmem:[#allocation2 + $0x10a] sm:$0xff]  ;;  %v6799_v46 = vld [vmem:[#allocation2 + $0x112] sm:$0xff] }
 0x497   : > { %9732 = vmatmul.mubr.f32.gmra.mrb[4].mxu1 %v6045_v34  ;;  %v7622_v34 = vld [vmem:[%s13066_s1 + $0x8f8] sm:$0xff] }
 0x498   : > { %9734 = vmatprep.mubr.f32.mxu1 %v6046_v60  ;;  %10456 = vmatpush3.bf16.msra.mxu1 %v10453_v45  ;;  %v7618_v45 = vld [vmem:[%s13066_s1 + $0x8d8] sm:$0xff] }
 0x499   : > { %10458 = vmatprep.subr.bf16.mxu1 %v10457_v14  ;;  %v6424_v60 = vld [vmem:[#allocation2 + $0xd9] sm:$0xff] }
 0x49b   : > { %9735 = vmatmul.mubr.f32.gmra.mrb[6].mxu1 %v6047_v30  ;;  %v6426_v30 = vld [vmem:[#allocation2 + $0xf1] sm:$0xff] }
 0x49c   : > { %9737 = vmatprep.mubr.f32.mxu1 %v6048_v57  ;;  %10460 = vmatpush3.bf16.msra.mxu1 %v10457_v14  ;;  %v7621_v14 = vld [vmem:[%s13066_s1 + $0x8f0] sm:$0xff] }
 0x49d   : > { %10462 = vmatprep.subr.bf16.mxu1 %v10461_v29  ;;  %v6429_v57 = vld [vmem:[#allocation2 + $0x111] sm:$0xff] }
 0x49f   : > { %9738 = vmatmul.mubr.f32.gmra.mrb[8].mxu1 %v6049_v39  ;;  %v6431_v39 = vld [vmem:[#allocation2 + $0x129] sm:$0xff] }
 0x4a0   : > { %9740 = vmatprep.mubr.f32.mxu1 %v6050_v11  ;;  %10464 = vmatpush3.bf16.msra.mxu1 %v10461_v29  ;;  %v6425_v29 = vld [vmem:[#allocation2 + $0xe1] sm:$0xff]  ;;  %v6434_v11 = vld [vmem:[#allocation2 + $0x151] sm:$0xff] }
 0x4a1   : > { %10466 = vmatprep.subr.bf16.mxu1 %v10465_v20 }
 0x4a3   : > { %9741 = vmatmul.mubr.f32.gmra.mrb[10].mxu1 %v6051_v25  ;;  %v6436_v25 = vld [vmem:[#allocation2 + $0x169] sm:$0xff] }
 0x4a4   : > { %9743 = vmatprep.mubr.f32.mxu1 %v6052_v15  ;;  %10468 = vmatpush3.bf16.msra.mxu1 %v10465_v20  ;;  %v6430_v20 = vld [vmem:[#allocation2 + $0x121] sm:$0xff]  ;;  %v6440_v15 = vld [vmem:[#allocation2 + $0x199] sm:$0xff] }
 0x4a5   : > { %10470 = vmatprep.subr.bf16.mxu1 %v10469_v27 }
 0x4a7   : > { %9744 = vmatmul.mubr.f32.gmra.mrb[12].mxu1 %v6053_v12  ;;  %v6441_v12 = vld [vmem:[#allocation2 + $0x1a1] sm:$0xff] }
 0x4a8   : > { %9746 = vmatprep.mubr.f32.mxu1 %v6054_v18  ;;  %10472 = vmatpush3.bf16.msra.mxu1 %v10469_v27  ;;  %v6435_v27 = vld [vmem:[#allocation2 + $0x159] sm:$0xff]  ;;  %v6782_v18 = vld [vmem:[#allocation2 + $0x4a] sm:$0xff] }
 0x4a9   : > { %10474 = vmatprep.subr.bf16.mxu1 %v10473_v54 }
 0x4ab   : > { %9747 = vmatmul.mubr.f32.gmra.mrb[14].mxu1 %v6055_v21  ;;  %v6784_v21 = vld [vmem:[#allocation2 + $0x62] sm:$0xff] }
 0x4ac   : > { %9749 = vmatprep.mubr.f32.mxu1 %v6056_v49  ;;  %10476 = vmatpush3.bf16.msra.mxu1 %v10473_v54  ;;  %v6439_v54 = vld [vmem:[#allocation2 + $0x189] sm:$0xff] }
 0x4ad   : > { %10478 = vmatprep.subr.bf16.mxu1 %v10477_v24  ;;  %v6785_v49 = vld [vmem:[#allocation2 + $0x6a] sm:$0xff] }
 0x4af   : > { %9750 = vmatmul.mubr.f32.gmra.mrb[16].mxu1 %v6057_v35  ;;  %v6786_v35 = vld [vmem:[#allocation2 + $0x7a] sm:$0xff] }
 0x4b0   : > { %9752 = vmatprep.mubr.f32.mxu1 %v6058_v36  ;;  %v6787_v36 = vld [vmem:[#allocation2 + $0x82] sm:$0xff] }
 0x4b3   : > { %9753 = vmatmul.mubr.f32.gmra.mrb[18].mxu1 %v6059_v61  ;;  %v6788_v61 = vld [vmem:[#allocation2 + $0x92] sm:$0xff] }
 0x4b4   : > { %9755 = vmatprep.mubr.f32.mxu1 %v6060_v22  ;;  %v6789_v22 = vld [vmem:[#allocation2 + $0x9a] sm:$0xff] }
 0x4b7   : > { %9756 = vmatmul.mubr.f32.gmra.mrb[20].mxu1 %v6061_v42  ;;  %v6790_v42 = vld [vmem:[#allocation2 + $0xaa] sm:$0xff] }
 0x4b8   : > { %9758 = vmatprep.mubr.f32.mxu1 %v6062_v38  ;;  %v6791_v38 = vld [vmem:[#allocation2 + $0xb2] sm:$0xff] }
 0x4bb   : > { %9759 = vmatmul.mubr.f32.gmra.mrb[22].mxu1 %v6063_v17  ;;  %v6792_v17 = vld [vmem:[#allocation2 + $0xc2] sm:$0xff] }
 0x4bc   : > { %9761 = vmatprep.mubr.f32.mxu1 %v6064_v33  ;;  %v6793_v33 = vld [vmem:[#allocation2 + $0xca] sm:$0xff] }
 0x4bf   : > { %9762 = vmatmul.mubr.f32.gmra.mrb[24].mxu1 %v6065_v6  ;;  %v6794_v6 = vld [vmem:[#allocation2 + $0xda] sm:$0xff] }
 0x4c0   : > { %9764 = vmatprep.mubr.f32.mxu1 %v6066_v41  ;;  %v6795_v41 = vld [vmem:[#allocation2 + $0xe2] sm:$0xff] }
 0x4c3   : > { %9765 = vmatmul.mubr.f32.gmra.mrb[26].mxu1 %v6067_v0  ;;  %v6796_v0 = vld [vmem:[#allocation2 + $0xf2] sm:$0xff] }
 0x4c4   : > { %9767 = vmatprep.mubr.f32.mxu1 %v12695_v40  ;;  %v7611_v40 = vld [vmem:[%s13066_s1 + $0x8a0] sm:$0xff] }
 0x4c7   : > { %9768 = vmatmul.mubr.f32.gmra.mrb[28].mxu1 %v12698_v31  ;;  %v7612_v31 = vld [vmem:[%s13066_s1 + $0x8a8] sm:$0xff] }
 0x4c8   : > { %9770 = vmatprep.mubr.f32.mxu1 %v11031_v8  ;;  %v10485_v5 = vpack.c.bf16 %v7612_v31, %v7611_v40  ;;  %v6801_v40 = vld [vmem:[#allocation2 + $0x12a] sm:$0xff]  ;;  %v6802_v31 = vld [vmem:[#allocation2 + $0x13a] sm:$0xff] }
 0x4cb   : > { %9771 = vmatmul.mubr.f32.gmra.mrb[30].mxu1 %v11031_v8  ;;  %v6797_v8 = vld [vmem:[#allocation2 + $0xfa] sm:$0xff] }
 0x4cc   : > { %9805 = vmatprep.mubr.f32.mxu1 %v12713_v10  ;;  %v7613_v10 = vld [vmem:[%s13066_s1 + $0x8b0] sm:$0xff] }
 0x4cf   : > { %9806 = vmatmul.mubr.f32.vlgmr.msra.gmra.mrb[0].mxu1 %v12716_v1  ;;  %v10489_v1 = vpack.c.bf16 %v7614_v9, %v7613_v10  ;;  %v6804_v10 = vld [vmem:[#allocation2 + $0x152] sm:$0xff]  ;;  %v6805_v9 = vld [vmem:[#allocation2 + $0x15a] sm:$0xff] }
 0x4d0   : > { %9808 = vmatprep.mubr.f32.mxu1 %v12725_v59  ;;  %10480 = vmatpush3.bf16.msra.mxu1 %v10477_v24  ;;  %v7615_v59 = vld [vmem:[%s13066_s1 + $0x8c0] sm:$0xff]  ;;  %v6783_v24 = vld [vmem:[#allocation2 + $0x52] sm:$0xff] }
 0x4d1   : > { %10482 = vmatprep.subr.bf16.mxu1 %v10481_v58 }
 0x4d3   : > { %9809 = vmatmul.mubr.f32.gmra.mrb[2].mxu1 %v12728_v51  ;;  %v10493_v51 = vpack.c.bf16 %v7616_v44, %v7615_v59  ;;  %v6807_v59 = vld [vmem:[#allocation2 + $0x172] sm:$0xff]  ;;  %v6810_v44 = vld [vmem:[#allocation2 + $0x19a] sm:$0xff] }
 0x4d4   : > { %9811 = vmatprep.mubr.f32.mxu1 %v12737_v55  ;;  %10484 = vmatpush3.bf16.msra.mxu1 %v10481_v58  ;;  %v7617_v55 = vld [vmem:[%s13066_s1 + $0x8d0] sm:$0xff]  ;;  %v6800_v58 = vld [vmem:[#allocation2 + $0x122] sm:$0xff] }
 0x4d5   : > { %10486 = vmatprep.subr.bf16.mxu1 %v10485_v5 }
 0x4d7   : > { %9812 = vmatmul.mubr.f32.gmra.mrb[4].mxu1 %v12740_v56  ;;  %v10497_v56 = vpack.c.bf16 %v7618_v45, %v7617_v55  ;;  %v12989_v55 = vld [vmem:[%s13067_s2 + $0x1] ss:$0 sm:$0xff] }
 0x4d8   : > { %9814 = vmatprep.mubr.f32.mxu1 %v12749_v32  ;;  %10488 = vmatpush3.bf16.msra.mxu1 %v10485_v5  ;;  %v7619_v32 = vld [vmem:[%s13066_s1 + $0x8e0] sm:$0xff] }
 0x4d9   : > { %10490 = vmatprep.subr.bf16.mxu1 %v10489_v1  ;;  %v6803_v5 = vld [vmem:[#allocation2 + $0x142] sm:$0xff] }
 0x4db   : > { %9815 = vmatmul.mubr.f32.gmra.mrb[6].mxu1 %v12752_v16  ;;  %v10501_v16 = vpack.c.bf16 %v7620_v26, %v7619_v32 }
 0x4dc   : > { %9817 = vmatprep.mubr.f32.mxu1 %v6418_v62  ;;  %10492 = vmatpush3.bf16.msra.mxu1 %v10489_v1  ;;  %v6806_v1 = vld [vmem:[#allocation2 + $0x16a] sm:$0xff] }
 0x4dd   : > { %10494 = vmatprep.subr.bf16.mxu1 %v10493_v51 }
 0x4df   : > { %9818 = vmatmul.mubr.f32.gmra.mrb[8].mxu1 %v12762_v53  ;;  %v10505_v53 = vpack.c.bf16 %v7622_v34, %v7621_v14 }
 0x4e0   : > { %9820 = vmatprep.mubr.f32.mxu1 %v6420_v2  ;;  %10496 = vmatpush3.bf16.msra.mxu1 %v10493_v51  ;;  %v6811_v51 = vld [vmem:[#allocation2 + $0x1a2] sm:$0xff] }
 0x4e1   : > { %10498 = vmatprep.subr.bf16.mxu1 %v10497_v56 }
 0x4e3   : > { %9821 = vmatmul.mubr.f32.gmra.mrb[10].mxu1 %v6421_v3 }
 0x4e4   : > { %9823 = vmatprep.mubr.f32.mxu1 %v6422_v47  ;;  %10500 = vmatpush3.bf16.msra.mxu1 %v10497_v56 }
 0x4e5   : > { %10502 = vmatprep.subr.bf16.mxu1 %v10501_v16 }
 0x4e7   : > { %9824 = vmatmul.mubr.f32.gmra.mrb[12].mxu1 %v6423_v19 }
 0x4e8   : > { %9826 = vmatprep.mubr.f32.mxu1 %v6424_v60  ;;  %10504 = vmatpush3.bf16.msra.mxu1 %v10501_v16 }
 0x4e9   : > { %10506 = vmatprep.subr.bf16.mxu1 %v10505_v53 }
 0x4eb   : > { %9827 = vmatmul.mubr.f32.gmra.mrb[14].mxu1 %v6425_v29 }
 0x4ec   : > { %9829 = vmatprep.mubr.f32.mxu1 %v6426_v30  ;;  %10508 = vmatpush3.bf16.msra.mxu1 %v10505_v53 }
 0x4ef   : > { %9830 = vmatmul.mubr.f32.gmra.mrb[16].mxu1 %v6427_v63 }
 0x4f0   : > { %9832 = vmatprep.mubr.f32.mxu1 %v6428_v37 }
 0x4f3   : > { %9833 = vmatmul.mubr.f32.gmra.mrb[18].mxu1 %v6429_v57 }
 0x4f4   : > { %9835 = vmatprep.mubr.f32.mxu1 %v6430_v20 }
 0x4f7   : > { %9836 = vmatmul.mubr.f32.gmra.mrb[20].mxu1 %v6431_v39 }
 0x4f8   : > { %9838 = vmatprep.mubr.f32.mxu1 %v6432_v13 }
 0x4fb   : > { %9839 = vmatmul.mubr.f32.gmra.mrb[22].mxu1 %v6433_v28 }
 0x4fc   : > { %9841 = vmatprep.mubr.f32.mxu1 %v6434_v11 }
 0x4ff   : > { %9842 = vmatmul.mubr.f32.gmra.mrb[24].mxu1 %v6435_v27 }
 0x500   : > { %9844 = vmatprep.mubr.f32.mxu1 %v6436_v25 }
 0x503   : > { %9845 = vmatmul.mubr.f32.gmra.mrb[26].mxu1 %v6437_v4 }
 0x504   : > { %9847 = vmatprep.mubr.f32.mxu1 %v6438_v48 }
 0x507   : > { %9848 = vmatmul.mubr.f32.gmra.mrb[28].mxu1 %v6439_v54 }
 0x508   : > { %9850 = vmatprep.mubr.f32.mxu1 %v6440_v15 }
 0x50b   : > { %9851 = vmatmul.mubr.f32.gmra.mrb[30].mxu1 %v6441_v12 }
 0x50c   : > { %9885 = vmatprep.mubr.f32.mxu1 %v6780_v23 }
 0x50f   : > { %9886 = vmatmul.mubr.f32.vlgmr.msra.gmra.mrb[0].mxu1 %v6781_v50 }
 0x510   : > { %9888 = vmatprep.mubr.f32.mxu1 %v6782_v18 }
 0x513   : > { %9889 = vmatmul.mubr.f32.gmra.mrb[2].mxu1 %v6783_v24 }
 0x514   : > { %9891 = vmatprep.mubr.f32.mxu1 %v6784_v21 }
 0x517   : > { %9892 = vmatmul.mubr.f32.gmra.mrb[4].mxu1 %v6785_v49 }
 0x518   : > { %9894 = vmatprep.mubr.f32.mxu1 %v6786_v35 }
 0x51b   : > { %9895 = vmatmul.mubr.f32.gmra.mrb[6].mxu1 %v6787_v36 }
 0x51c   : > { %9897 = vmatprep.mubr.f32.mxu1 %v6788_v61 }
 0x51f   : > { %9898 = vmatmul.mubr.f32.gmra.mrb[8].mxu1 %v6789_v22 }
 0x520   : > { %9900 = vmatprep.mubr.f32.mxu1 %v6790_v42 }
 0x523   : > { %9901 = vmatmul.mubr.f32.gmra.mrb[10].mxu1 %v6791_v38 }
 0x524   : > { %9903 = vmatprep.mubr.f32.mxu1 %v6792_v17 }
 0x527   : > { %9904 = vmatmul.mubr.f32.gmra.mrb[12].mxu1 %v6793_v33 }
 0x528   : > { %9906 = vmatprep.mubr.f32.mxu1 %v6794_v6 }
 0x52b   : > { %9907 = vmatmul.mubr.f32.gmra.mrb[14].mxu1 %v6795_v41 }
 0x52c   : > { %9909 = vmatprep.mubr.f32.mxu1 %v6796_v0 }
 0x52f   : > { %9910 = vmatmul.mubr.f32.gmra.mrb[16].mxu1 %v6797_v8 }
 0x530   : > { %9912 = vmatprep.mubr.f32.mxu1 %v6798_v52 }
 0x533   : > { %9913 = vmatmul.mubr.f32.gmra.mrb[18].mxu1 %v6799_v46 }
 0x534   : > { %9915 = vmatprep.mubr.f32.mxu1 %v6800_v58 }
 0x537   : > { %9916 = vmatmul.mubr.f32.gmra.mrb[20].mxu1 %v6801_v40 }
 0x538   : > { %9918 = vmatprep.mubr.f32.mxu1 %v6802_v31 }
 0x53b   : > { %9919 = vmatmul.mubr.f32.gmra.mrb[22].mxu1 %v6803_v5 }
 0x53c   : > { %9921 = vmatprep.mubr.f32.mxu1 %v6804_v10 }
 0x53f   : > { %9922 = vmatmul.mubr.f32.gmra.mrb[24].mxu1 %v6805_v9 }
 0x540   : > { %9924 = vmatprep.mubr.f32.mxu1 %v6806_v1 }
 0x543   : > { %9925 = vmatmul.mubr.f32.gmra.mrb[26].mxu1 %v6807_v59 }
 0x544   : > { %9927 = vmatprep.mubr.f32.mxu1 %v12877_v43 }
 0x547   : > { %9928 = vmatmul.mubr.f32.gmra.mrb[28].mxu1 %v12880_v7 }
 0x548   : > { %9930 = vmatprep.mubr.f32.mxu1 %v6810_v44 }
 0x54b   : > { %9931 = vmatmul.mubr.f32.gmra.mrb[30].mxu1 %v6811_v51 }
 0x5e2   : > { %v9887_v45 = vpop.f32.mrb[0].mxu1 }
 0x5e3   : > { %v7191_v62 = vadd.f32 %v9887_v45, %v12989_v55  ;;  %v6927_v56 = vpop.f32.mrb[1].mxu1 }
 0x5e4   : > { %v7190_v43 = vadd.f32 %v12989_v55, %v6927_v56 }
 0x5e5   : > { %v7223_v7 = vmax.f32 %v7191_v62, 0.0 }
 0x5e6   : > { %v7222_v32 = vmax.f32 %v7190_v43, 0.0  ;;  %v9890_v26 = vpop.f32.mrb[2].mxu1 }
 0x5e7   : > { %7255 = vst [vmem:[%s12997_s7 + $0x8] sm:$0xff] %v7223_v7  ;;  %v7193_v2 = vadd.f32 %v9890_v26, %v12989_v55  ;;  %v6937_v16 = vpop.f32.mrb[3].mxu1 }
 0x5e8   : > { %7254 = vst [vmem:[%s12997_s7] sm:$0xff] %v7222_v32  ;;  %v7192_v3 = vadd.f32 %v12989_v55, %v6937_v16 }
 0x5e9   : > { %v7225_v14 = vmax.f32 %v7193_v2, 0.0 }
 0x5ea   : > { %v7224_v34 = vmax.f32 %v7192_v3, 0.0  ;;  %v9893_v47 = vpop.f32.mrb[4].mxu1 }
 0x5eb   : > { %7257 = vst [vmem:[%s12997_s7 + $0x18] sm:$0xff] %v7225_v14  ;;  %v7195_v53 = vadd.f32 %v9893_v47, %v12989_v55  ;;  %v6947_v19 = vpop.f32.mrb[5].mxu1 }
 0x5ec   : > { %7256 = vst [vmem:[%s12997_s7 + $0x10] sm:$0xff] %v7224_v34  ;;  %v7194_v60 = vadd.f32 %v12989_v55, %v6947_v19 }
 0x5ed   : > { %v7227_v29 = vmax.f32 %v7195_v53, 0.0 }
 0x5ee   : > { %v7226_v30 = vmax.f32 %v7194_v60, 0.0  ;;  %v9896_v63 = vpop.f32.mrb[6].mxu1 }
 0x5ef   : > { %7259 = vst [vmem:[%s12997_s7 + $0x28] sm:$0xff] %v7227_v29  ;;  %v7197_v37 = vadd.f32 %v9896_v63, %v12989_v55  ;;  %v6957_v57 = vpop.f32.mrb[7].mxu1 }
 0x5f0   : > { %7258 = vst [vmem:[%s12997_s7 + $0x20] sm:$0xff] %v7226_v30  ;;  %v7196_v20 = vadd.f32 %v12989_v55, %v6957_v57 }
 0x5f1   : > { %v7229_v39 = vmax.f32 %v7197_v37, 0.0 }
 0x5f2   : > { %v7228_v13 = vmax.f32 %v7196_v20, 0.0  ;;  %v9899_v28 = vpop.f32.mrb[8].mxu1 }
 0x5f3   : > { %7261 = vst [vmem:[%s12997_s7 + $0x38] sm:$0xff] %v7229_v39  ;;  %v7199_v11 = vadd.f32 %v9899_v28, %v12989_v55  ;;  %v6967_v27 = vpop.f32.mrb[9].mxu1 }
 0x5f4   : > { %7260 = vst [vmem:[%s12997_s7 + $0x30] sm:$0xff] %v7228_v13  ;;  %v7198_v25 = vadd.f32 %v12989_v55, %v6967_v27 }
 0x5f5   : > { %v7231_v4 = vmax.f32 %v7199_v11, 0.0 }
 0x5f6   : > { %v7230_v48 = vmax.f32 %v7198_v25, 0.0  ;;  %v9902_v15 = vpop.f32.mrb[10].mxu1 }
 0x5f7   : > { %7263 = vst [vmem:[%s12997_s7 + $0x48] sm:$0xff] %v7231_v4  ;;  %v7201_v54 = vadd.f32 %v9902_v15, %v12989_v55  ;;  %v6977_v12 = vpop.f32.mrb[11].mxu1 }
 0x5f8   : > { %7262 = vst [vmem:[%s12997_s7 + $0x40] sm:$0xff] %v7230_v48  ;;  %v7200_v23 = vadd.f32 %v12989_v55, %v6977_v12 }
 0x5f9   : > { %v7233_v50 = vmax.f32 %v7201_v54, 0.0 }
 0x5fa   : > { %v7232_v18 = vmax.f32 %v7200_v23, 0.0  ;;  %v9905_v24 = vpop.f32.mrb[12].mxu1 }
 0x5fb   : > { %7265 = vst [vmem:[%s12997_s7 + $0x58] sm:$0xff] %v7233_v50  ;;  %v7203_v21 = vadd.f32 %v9905_v24, %v12989_v55  ;;  %v6987_v49 = vpop.f32.mrb[13].mxu1 }
 0x5fc   : > { %7264 = vst [vmem:[%s12997_s7 + $0x50] sm:$0xff] %v7232_v18  ;;  %v7202_v35 = vadd.f32 %v12989_v55, %v6987_v49 }
 0x5fd   : > { %v7235_v36 = vmax.f32 %v7203_v21, 0.0 }
 0x5fe   : > { %v7234_v61 = vmax.f32 %v7202_v35, 0.0  ;;  %v9908_v22 = vpop.f32.mrb[14].mxu1 }
 0x5ff   : > { %7267 = vst [vmem:[%s12997_s7 + $0x68] sm:$0xff] %v7235_v36  ;;  %v7205_v42 = vadd.f32 %v9908_v22, %v12989_v55  ;;  %v6997_v38 = vpop.f32.mrb[15].mxu1 }
 0x600   : > { %7266 = vst [vmem:[%s12997_s7 + $0x60] sm:$0xff] %v7234_v61  ;;  %v7204_v17 = vadd.f32 %v12989_v55, %v6997_v38 }
 0x601   : > { %v7237_v33 = vmax.f32 %v7205_v42, 0.0 }
 0x602   : > { %v7236_v6 = vmax.f32 %v7204_v17, 0.0  ;;  %v9911_v41 = vpop.f32.mrb[16].mxu1 }
 0x603   : > { %7269 = vst [vmem:[%s12997_s7 + $0x78] sm:$0xff] %v7237_v33  ;;  %v7207_v0 = vadd.f32 %v9911_v41, %v12989_v55  ;;  %v7007_v8 = vpop.f32.mrb[17].mxu1 }
 0x604   : > { %7268 = vst [vmem:[%s12997_s7 + $0x70] sm:$0xff] %v7236_v6  ;;  %v7206_v52 = vadd.f32 %v12989_v55, %v7007_v8 }
 0x605   : > { %v7239_v46 = vmax.f32 %v7207_v0, 0.0 }
 0x606   : > { %v7238_v58 = vmax.f32 %v7206_v52, 0.0  ;;  %v9914_v40 = vpop.f32.mrb[18].mxu1 }
 0x607   : > { %7271 = vst [vmem:[%s12997_s7 + $0x88] sm:$0xff] %v7239_v46  ;;  %v7209_v31 = vadd.f32 %v9914_v40, %v12989_v55  ;;  %v7017_v5 = vpop.f32.mrb[19].mxu1 }
 0x608   : > { %7270 = vst [vmem:[%s12997_s7 + $0x80] sm:$0xff] %v7238_v58  ;;  %v7208_v10 = vadd.f32 %v12989_v55, %v7017_v5 }
 0x609   : > { %v7241_v9 = vmax.f32 %v7209_v31, 0.0 }
 0x60a   : > { %v7240_v1 = vmax.f32 %v7208_v10, 0.0  ;;  %v9917_v59 = vpop.f32.mrb[20].mxu1 }
 0x60b   : > { %7273 = vst [vmem:[%s12997_s7 + $0x98] sm:$0xff] %v7241_v9  ;;  %v7211_v44 = vadd.f32 %v9917_v59, %v12989_v55  ;;  %v7027_v51 = vpop.f32.mrb[21].mxu1 }
 0x60c   : > { %7272 = vst [vmem:[%s12997_s7 + $0x90] sm:$0xff] %v7240_v1  ;;  %v7210_v45 = vadd.f32 %v12989_v55, %v7027_v51 }
 0x60d   : > { %v7243_v62 = vmax.f32 %v7211_v44, 0.0 }
 0x60e   : > { %v7242_v56 = vmax.f32 %v7210_v45, 0.0  ;;  %v9920_v43 = vpop.f32.mrb[22].mxu1 }
 0x60f   : > { %7275 = vst [vmem:[%s12997_s7 + $0xa8] sm:$0xff] %v7243_v62  ;;  %v7213_v7 = vadd.f32 %v9920_v43, %v12989_v55  ;;  %v7037_v32 = vpop.f32.mrb[23].mxu1 }
 0x610   : > { %7274 = vst [vmem:[%s12997_s7 + $0xa0] sm:$0xff] %v7242_v56  ;;  %v7212_v26 = vadd.f32 %v12989_v55, %v7037_v32 }
 0x611   : > { %v7245_v2 = vmax.f32 %v7213_v7, 0.0 }
 0x612   : > { %v7244_v16 = vmax.f32 %v7212_v26, 0.0  ;;  %v9923_v3 = vpop.f32.mrb[24].mxu1 }
 0x613   : > { %7277 = vst [vmem:[%s12997_s7 + $0xb8] sm:$0xff] %v7245_v2  ;;  %v7215_v14 = vadd.f32 %v9923_v3, %v12989_v55  ;;  %v7047_v34 = vpop.f32.mrb[25].mxu1 }
 0x614   : > { %7276 = vst [vmem:[%s12997_s7 + $0xb0] sm:$0xff] %v7244_v16  ;;  %v7214_v47 = vadd.f32 %v12989_v55, %v7047_v34 }
 0x615   : > { %v7247_v53 = vmax.f32 %v7215_v14, 0.0 }
 0x616   : > { %v7246_v19 = vmax.f32 %v7214_v47, 0.0  ;;  %v9926_v60 = vpop.f32.mrb[26].mxu1 }
 0x617   : > { %7279 = vst [vmem:[%s12997_s7 + $0xc8] sm:$0xff] %v7247_v53  ;;  %v7217_v29 = vadd.f32 %v9926_v60, %v12989_v55  ;;  %v7057_v30 = vpop.f32.mrb[27].mxu1 }
 0x618   : > { %7278 = vst [vmem:[%s12997_s7 + $0xc0] sm:$0xff] %v7246_v19  ;;  %v7216_v63 = vadd.f32 %v12989_v55, %v7057_v30 }
 0x619   : > { %v7249_v37 = vmax.f32 %v7217_v29, 0.0 }
 0x61a   : > { %v7248_v57 = vmax.f32 %v7216_v63, 0.0  ;;  %v9929_v20 = vpop.f32.mrb[28].mxu1 }
 0x61b   : > { %7281 = vst [vmem:[%s12997_s7 + $0xd8] sm:$0xff] %v7249_v37  ;;  %v7219_v39 = vadd.f32 %v9929_v20, %v12989_v55  ;;  %v7067_v13 = vpop.f32.mrb[29].mxu1 }
 0x61c   : > { %7280 = vst [vmem:[%s12997_s7 + $0xd0] sm:$0xff] %v7248_v57  ;;  %v7218_v28 = vadd.f32 %v12989_v55, %v7067_v13 }
 0x61d   : > { %v7251_v11 = vmax.f32 %v7219_v39, 0.0 }
 0x61e   : > { %v7250_v27 = vmax.f32 %v7218_v28, 0.0  ;;  %v9932_v25 = vpop.f32.mrb[30].mxu1 }
 0x61f   : > { %7283 = vst [vmem:[%s12997_s7 + $0xe8] sm:$0xff] %v7251_v11  ;;  %v7221_v4 = vadd.f32 %v9932_v25, %v12989_v55  ;;  %v7077_v48 = vpop.f32.mrb[31].mxu1 }
 0x620   : > { %7282 = vst [vmem:[%s12997_s7 + $0xe0] sm:$0xff] %v7250_v27  ;;  %v7220_v15 = vadd.f32 %v12989_v55, %v7077_v48 }
 0x621   : > { %v7253_v54 = vmax.f32 %v7221_v4, 0.0 }
 0x622   : > { %v7252_v12 = vmax.f32 %v7220_v15, 0.0 }
 0x623   : > { %7285 = vst [vmem:[%s12997_s7 + $0xf8] sm:$0xff] %v7253_v54 }
 0x624   : > { %7284 = vst [vmem:[%s12997_s7 + $0xf0] sm:$0xff] %v7252_v12 }
 0x625 PF: > { %s13_s12 = sadd.s32 1, %s11038_s12  }
 0x626   : > { %p10_p4 = scmp.ge.s32.totalorder %s13_s12, 4  }
 0x628   :  { %12 = sbr.rel (!%p10_p4) target bundleno = 1 (0x1), region = 82 }

</bundles_post_ra>
